<compile_context>
chip_gen: v6e
topology: v6e:2x2x1
jax: 0.10.0
libtpu: 0.0.40
codegen_flags: <defaults>
</compile_context>

<pallas_src>
import functools
import math

import jax
import jax.numpy as jnp
from jax import lax
from jax.experimental import pallas as pl
from jax.experimental.pallas import tpu as pltpu

# head output widths, in packed-column order:
#   type(4) | mass_dim(4) | attitude(7) | material(4) | thermal(3) | deployment(4)
_HEAD_OUT_DIMS = (4, 4, 7, 4, 3, 4)
_OUT_PAD = 128  # lane-dense packed head-output width (>= sum(_HEAD_OUT_DIMS)=26)


# ------------------------------------------------------------------ kernel


def _fused_forward_kernel(
    x_ref, attn_mask_ref, pool_ref,
    fe_w1, fe_b1, fe_w2, fe_b2,
    wqkv, bqkv, wo, bo, ln1g, ln1b, wff1, bff1, wff2, bff2, ln2g, ln2b,
    hw1, hb1, hw2, hb2,
    enc_ref, heads_ref,
    *, num_heads, num_layers, batch, seq, matmul_dtype,
):
    H = fe_w2.shape[1]
    hd = H // num_heads
    N = batch * seq
    scale = 1.0 / math.sqrt(hd)

    def mm(a, b):
        # Operands in matmul_dtype (bf16 by default: MXU-native on all gens);
        # accumulation stays f32.
        return jnp.dot(a.astype(matmul_dtype), b.astype(matmul_dtype),
                       preferred_element_type=jnp.float32)

    def mm_tb(a, b):
        # a @ b.T without an explicit XLU transpose (MXU consumes transposed RHS).
        return lax.dot_general(a.astype(matmul_dtype), b.astype(matmul_dtype),
                               dimension_numbers=(((1,), (1,)), ((), ())),
                               preferred_element_type=jnp.float32)

    def layernorm(z, gamma, beta, eps=1e-5):
        mu = jnp.mean(z, axis=-1, keepdims=True)
        var = jnp.mean((z - mu) * (z - mu), axis=-1, keepdims=True)
        return (z - mu) * lax.rsqrt(var + eps) * gamma + beta

    # Block-diagonal additive attention mask over (head, batch)-stacked rows.
    attn_mask = attn_mask_ref[...]                                # (nh*N, nh*N), f32

    # ---- feature extractor: Linear+ReLU, Linear+ReLU (dropout = identity) ----
    h = jnp.maximum(mm(x_ref[...], fe_w1[...]) + fe_b1[...], 0.0)
    h = jnp.maximum(mm(h, fe_w2[...]) + fe_b2[...], 0.0)          # (N, H), f32

    # ---- transformer encoder (post-norm, ReLU FFN, no final norm) ----
    for l in range(num_layers):                                   # static unroll
        # Packed QKV projection; columns grouped per head as [q_h | k_h | v_h].
        qkv = mm(h, wqkv[l]) + bqkv[l]                            # (N, 3H)

        # Stack heads onto the sublane axis: rows ordered (head, batch, seq).
        chunk = 3 * hd
        qkv_r = jnp.concatenate(
            [qkv[:, hh * chunk:(hh + 1) * chunk] for hh in range(num_heads)],
            axis=0)                                               # (nh*N, 3*hd)
        q_r = qkv_r[:, 0 * hd:1 * hd]
        k_r = qkv_r[:, 1 * hd:2 * hd]
        v_r = qkv_r[:, 2 * hd:3 * hd]

        # ONE score matmul for all (batch, head) pairs + block-diagonal mask.
        s = mm_tb(q_r, k_r) * scale + attn_mask                   # (nh*N, nh*N), f32
        s = s - jnp.max(s, axis=-1, keepdims=True)
        p = jnp.exp(s)
        p = p / jnp.sum(p, axis=-1, keepdims=True)                # exact softmax
        ctx = mm(p, v_r)                                          # (nh*N, hd)

        # Un-stack heads back onto lanes (head-major column order matches Wo rows).
        ctx_full = jnp.concatenate(
            [ctx[hh * N:(hh + 1) * N, :] for hh in range(num_heads)],
            axis=1)                                               # (N, H)
        attn = mm(ctx_full, wo[l]) + bo[l]                        # (N, H)

        h = layernorm(h + attn, ln1g[l], ln1b[l])
        ff = jnp.maximum(mm(h, wff1[l]) + bff1[l], 0.0)
        ff = mm(ff, wff2[l]) + bff2[l]
        h = layernorm(h + ff, ln2g[l], ln2b[l])

    enc_ref[...] = h                                              # (N, H) write-once

    # ---- mean pool over sequence as a single tiny matmul (MXU slack) ----
    pooled = mm(pool_ref[...], h)                                 # (B, H)

    # ---- all six heads: packed first layers + block-diagonal second layers ----
    mid = jnp.maximum(mm(pooled, hw1[...]) + hb1[...], 0.0)       # (B, sum_mid)
    heads_ref[...] = mm(mid, hw2[...]) + hb2[...]                 # (B, 128) lane-dense


# ------------------------------------------------------------------ wrapper


def physical_properties_forward(params, x, num_heads, matmul_dtype=jnp.bfloat16):
    """x: (B, S, input_dim) float32.  Inference path only (mask is None)."""
    B, S, Din = x.shape
    H = params["fe_w1"].shape[1]
    N = B * S
    num_layers = params["wqkv"].shape[0]
    out_pad = params["hw2"].shape[1]

    # Precomputed constants (tiny): block-diagonal additive mask over the
    # (head, batch)-stacked score matrix, and the mean-pooling matrix.
    R = num_heads * N
    blk = jnp.arange(R, dtype=jnp.int32) // S                     # (head*B + batch) id
    attn_mask = jnp.where(blk[:, None] == blk[None, :], 0.0, -1e9).astype(jnp.float32)
    pool_mat = jnp.repeat(jnp.eye(B, dtype=jnp.float32), S, axis=1) / float(S)  # (B, N)

    kernel = functools.partial(
        _fused_forward_kernel,
        num_heads=num_heads, num_layers=num_layers,
        batch=B, seq=S, matmul_dtype=matmul_dtype,
    )

    enc_flat, heads_out = pl.pallas_call(
        kernel,
        out_shape=(
            jax.ShapeDtypeStruct((N, H), jnp.float32),
            jax.ShapeDtypeStruct((B, out_pad), jnp.float32),
        ),
        compiler_params=pltpu.CompilerParams(vmem_limit_bytes=32 * 1024 * 1024),
    )(
        x.reshape(N, Din), attn_mask, pool_mat,
        params["fe_w1"], params["fe_b1"], params["fe_w2"], params["fe_b2"],
        params["wqkv"], params["bqkv"], params["wo"], params["bo"],
        params["ln1g"], params["ln1b"], params["wff1"], params["bff1"],
        params["wff2"], params["bff2"], params["ln2g"], params["ln2b"],
        params["hw1"], params["hb1"], params["hw2"], params["hb2"],
    )

    encoded = enc_flat.reshape(B, S, H)

    # unpack the lane-dense head slab (cheap, tiny)
    offs = [0]
    for d in _HEAD_OUT_DIMS:
        offs.append(offs[-1] + d)
    type_logits = heads_out[:, offs[0]:offs[1]]
    mass_dim = heads_out[:, offs[1]:offs[2]]
    attitude = heads_out[:, offs[2]:offs[3]]
    material = heads_out[:, offs[3]:offs[4]]
    thermal = heads_out[:, offs[4]:offs[5]]
    deployment_logits = heads_out[:, offs[5]:offs[6]]

    object_type = jax.nn.softmax(type_logits, axis=-1)
    deployment = jax.nn.softmax(deployment_logits, axis=-1)

    mass, length, width, height = jnp.split(mass_dim, 4, axis=-1)       # each (B,1)
    euler_angles = attitude[:, :3]
    angular_velocities = attitude[:, 3:6]
    tumbling_prob = jax.nn.sigmoid(attitude[:, 6])                      # (B,)
    density, reflectivity, thermal_expansion, material_type = jnp.split(material, 4, axis=-1)
    temperature, thermal_capacity, thermal_conductivity = jnp.split(thermal, 3, axis=-1)

    relu = lambda t: jnp.maximum(t, 0.0)
    return {
        "object_type": object_type,
        "mass": relu(mass),
        "dimensions": jnp.stack([relu(length), relu(width), relu(height)], axis=-1),  # (B,1,3)
        "euler_angles": euler_angles,
        "angular_velocities": angular_velocities,
        "tumbling_probability": tumbling_prob,
        "material_properties": {
            "density": relu(density),
            "reflectivity": jax.nn.sigmoid(reflectivity),
            "thermal_expansion": relu(thermal_expansion),
            "material_type": jax.nn.sigmoid(material_type),
        },
        "thermal_properties": {
            "temperature": temperature,
            "thermal_capacity": relu(thermal_capacity),
            "thermal_conductivity": relu(thermal_conductivity),
        },
        "deployment_state": deployment,
        "encoded_features": encoded,
    }


# ------------------------------------------------------------------ params


def init_params(key, input_dim, hidden_dim, num_heads, num_layers,
                out_pad=_OUT_PAD, weight_dtype=jnp.bfloat16):
    """Weight matrices are stored in `weight_dtype` (bf16 by default, MXU-native);
    biases and LayerNorm parameters stay f32 (all in-kernel elementwise math is f32)."""
    H = hidden_dim
    hd = H // num_heads
    keys = iter(jax.random.split(key, 1024))

    def dense(fan_in, fan_out):
        bound = 1.0 / math.sqrt(fan_in)
        w = jax.random.uniform(next(keys), (fan_in, fan_out), jnp.float32, -bound, bound)
        b = jax.random.uniform(next(keys), (1, fan_out), jnp.float32, -bound, bound)
        return w, b

    wcast = lambda w: w.astype(weight_dtype)

    def pack_qkv_w(wq, wk, wv):
        # (H, 3H) with columns grouped per head as [q_h | k_h | v_h] (hd each).
        qh = wq.reshape(H, num_heads, hd)
        kh = wk.reshape(H, num_heads, hd)
        vh = wv.reshape(H, num_heads, hd)
        return jnp.stack([qh, kh, vh], axis=2).reshape(H, 3 * H)

    def pack_qkv_b(bq, bk, bv):
        qh = bq.reshape(1, num_heads, hd)
        kh = bk.reshape(1, num_heads, hd)
        vh = bv.reshape(1, num_heads, hd)
        return jnp.stack([qh, kh, vh], axis=2).reshape(1, 3 * H)

    p = {}
    w, b = dense(input_dim, H); p["fe_w1"], p["fe_b1"] = wcast(w), b
    w, b = dense(H, H); p["fe_w2"], p["fe_b2"] = wcast(w), b

    wqkv_l, bqkv_l, wo_l, bo_l = [], [], [], []
    ln1g_l, ln1b_l, wff1_l, bff1_l = [], [], [], []
    wff2_l, bff2_l, ln2g_l, ln2b_l = [], [], [], []
    for _ in range(num_layers):
        wq, bq = dense(H, H)
        wk, bk = dense(H, H)
        wv, bv = dense(H, H)
        wqkv_l.append(pack_qkv_w(wq, wk, wv))                      # (H, 3H) per-head packed
        bqkv_l.append(pack_qkv_b(bq, bk, bv))                      # (1, 3H)
        w, b = dense(H, H); wo_l.append(w); bo_l.append(b)
        ln1g_l.append(jnp.ones((1, H), jnp.float32)); ln1b_l.append(jnp.zeros((1, H), jnp.float32))
        w, b = dense(H, 4 * H); wff1_l.append(w); bff1_l.append(b)
        w, b = dense(4 * H, H); wff2_l.append(w); bff2_l.append(b)
        ln2g_l.append(jnp.ones((1, H), jnp.float32)); ln2b_l.append(jnp.zeros((1, H), jnp.float32))

    stack_w = lambda xs: wcast(jnp.stack(xs, axis=0))
    stack_f = lambda xs: jnp.stack(xs, axis=0)
    p["wqkv"], p["bqkv"] = stack_w(wqkv_l), stack_f(bqkv_l)
    p["wo"], p["bo"] = stack_w(wo_l), stack_f(bo_l)
    p["ln1g"], p["ln1b"] = stack_f(ln1g_l), stack_f(ln1b_l)
    p["wff1"], p["bff1"] = stack_w(wff1_l), stack_f(bff1_l)
    p["wff2"], p["bff2"] = stack_w(wff2_l), stack_f(bff2_l)
    p["ln2g"], p["ln2b"] = stack_f(ln2g_l), stack_f(ln2b_l)

    # Six heads: first layers packed side-by-side, second layers block-diagonal,
    # output lane-padded to `out_pad` (lane-dense store; padded cols are zero).
    head_mids = [H, H, H, H, H, H // 2]
    head_outs = list(_HEAD_OUT_DIMS)
    total_mid = sum(head_mids)
    assert out_pad >= sum(head_outs)
    w1s, b1s = [], []
    hw2 = jnp.zeros((total_mid, out_pad), jnp.float32)
    hb2 = jnp.zeros((1, out_pad), jnp.float32)
    mo, oo = 0, 0
    for mid, out in zip(head_mids, head_outs):
        w1, b1 = dense(H, mid)
        w2, b2 = dense(mid, out)
        w1s.append(w1)
        b1s.append(b1)
        hw2 = hw2.at[mo:mo + mid, oo:oo + out].set(w2)
        hb2 = hb2.at[:, oo:oo + out].set(b2)
        mo += mid
        oo += out
    p["hw1"] = wcast(jnp.concatenate(w1s, axis=1))   # (H, total_mid)
    p["hb1"] = jnp.concatenate(b1s, axis=1)          # (1, total_mid)
    p["hw2"] = wcast(hw2)                            # (total_mid, out_pad) block-diagonal
    p["hb2"] = hb2                                   # (1, out_pad)
    return p


# ------------------------------------------------------------------ main


if __name__ == "__main__":
    # small config consistent with the module's forward
    batch, seq = 2, 8
    input_dim, hidden_dim, num_heads, num_layers = 32, 32, 4, 3

    key = jax.random.PRNGKey(0)
    pkey, xkey = jax.random.split(key)
    params = init_params(pkey, input_dim, hidden_dim, num_heads, num_layers)
    x = jax.random.normal(xkey, (batch, seq, input_dim), jnp.float32)

    forward = jax.jit(physical_properties_forward,
                      static_argnames=("num_heads", "matmul_dtype"))
    outputs = forward(params, x, num_heads=num_heads)
    jax.tree_util.tree_map(jax.block_until_ready, outputs)

    assert outputs["object_type"].shape == (batch, 4)
    assert outputs["dimensions"].shape == (batch, 1, 3)
    assert outputs["tumbling_probability"].shape == (batch,)
    assert outputs["encoded_features"].shape == (batch, seq, hidden_dim)
    print("KERNEL_OK")
</pallas_src>

<mosaic_0001>
module attributes {stable_mosaic.version = 11 : i64} {
  func.func @_fused_forward_kernel(%arg0: memref<16x32xf32, #tpu.memory_space<vmem>>, %arg1: memref<64x64xf32, #tpu.memory_space<vmem>>, %arg2: memref<2x16xf32, #tpu.memory_space<vmem>>, %arg3: memref<32x32xbf16, #tpu.memory_space<vmem>>, %arg4: memref<1x32xf32, #tpu.memory_space<vmem>>, %arg5: memref<32x32xbf16, #tpu.memory_space<vmem>>, %arg6: memref<1x32xf32, #tpu.memory_space<vmem>>, %arg7: memref<3x32x96xbf16, #tpu.memory_space<vmem>>, %arg8: memref<3x1x96xf32, #tpu.memory_space<vmem>>, %arg9: memref<3x32x32xbf16, #tpu.memory_space<vmem>>, %arg10: memref<3x1x32xf32, #tpu.memory_space<vmem>>, %arg11: memref<3x1x32xf32, #tpu.memory_space<vmem>>, %arg12: memref<3x1x32xf32, #tpu.memory_space<vmem>>, %arg13: memref<3x32x128xbf16, #tpu.memory_space<vmem>>, %arg14: memref<3x1x128xf32, #tpu.memory_space<vmem>>, %arg15: memref<3x128x32xbf16, #tpu.memory_space<vmem>>, %arg16: memref<3x1x32xf32, #tpu.memory_space<vmem>>, %arg17: memref<3x1x32xf32, #tpu.memory_space<vmem>>, %arg18: memref<3x1x32xf32, #tpu.memory_space<vmem>>, %arg19: memref<32x176xbf16, #tpu.memory_space<vmem>>, %arg20: memref<1x176xf32, #tpu.memory_space<vmem>>, %arg21: memref<176x128xbf16, #tpu.memory_space<vmem>>, %arg22: memref<1x128xf32, #tpu.memory_space<vmem>>, %arg23: memref<16x32xf32, #tpu.memory_space<vmem>>, %arg24: memref<2x128xf32, #tpu.memory_space<vmem>>) attributes {dimension_semantics = [], scalar_prefetch = 0 : i64, scratch_operands = 0 : i64, tpu.core_type = #tpu.core_type<tc>} {
    %c0 = arith.constant 0 : index
    %c0_0 = arith.constant 0 : index
    %0 = vector.load %arg1[%c0, %c0_0] : memref<64x64xf32, #tpu.memory_space<vmem>>, vector<64x64xf32>
    %c0_1 = arith.constant 0 : index
    %c0_2 = arith.constant 0 : index
    %1 = vector.load %arg0[%c0_1, %c0_2] : memref<16x32xf32, #tpu.memory_space<vmem>>, vector<16x32xf32>
    %c0_3 = arith.constant 0 : index
    %c0_4 = arith.constant 0 : index
    %2 = vector.load %arg3[%c0_3, %c0_4] : memref<32x32xbf16, #tpu.memory_space<vmem>>, vector<32x32xbf16>
    %3 = arith.truncf %1 : vector<16x32xf32> to vector<16x32xbf16>
    %cst = arith.constant dense<0.000000e+00> : vector<16x32xf32>
    %4 = tpu.matmul %3, %2, %cst {dimension_numbers = #tpu.dot_dimension_numbers<[1], [0], [0], [1], [0, 0, 1, 1], [], []>} : vector<16x32xbf16>, vector<32x32xbf16>, vector<16x32xf32> -> vector<16x32xf32>
    %c0_5 = arith.constant 0 : index
    %c0_6 = arith.constant 0 : index
    %5 = vector.load %arg4[%c0_5, %c0_6] : memref<1x32xf32, #tpu.memory_space<vmem>>, vector<1x32xf32>
    %6 = vector.broadcast %5 : vector<1x32xf32> to vector<16x32xf32>
    %7 = arith.addf %4, %6 : vector<16x32xf32>
    %cst_7 = arith.constant 0.000000e+00 : f32
    %8 = vector.broadcast %cst_7 : f32 to vector<16x32xf32>
    %9 = arith.maximumf %7, %8 : vector<16x32xf32>
    %c0_8 = arith.constant 0 : index
    %c0_9 = arith.constant 0 : index
    %10 = vector.load %arg5[%c0_8, %c0_9] : memref<32x32xbf16, #tpu.memory_space<vmem>>, vector<32x32xbf16>
    %11 = arith.truncf %9 : vector<16x32xf32> to vector<16x32xbf16>
    %cst_10 = arith.constant dense<0.000000e+00> : vector<16x32xf32>
    %12 = tpu.matmul %11, %10, %cst_10 {dimension_numbers = #tpu.dot_dimension_numbers<[1], [0], [0], [1], [0, 0, 1, 1], [], []>} : vector<16x32xbf16>, vector<32x32xbf16>, vector<16x32xf32> -> vector<16x32xf32>
    %c0_11 = arith.constant 0 : index
    %c0_12 = arith.constant 0 : index
    %13 = vector.load %arg6[%c0_11, %c0_12] : memref<1x32xf32, #tpu.memory_space<vmem>>, vector<1x32xf32>
    %14 = vector.broadcast %13 : vector<1x32xf32> to vector<16x32xf32>
    %15 = arith.addf %12, %14 : vector<16x32xf32>
    %cst_13 = arith.constant 0.000000e+00 : f32
    %16 = vector.broadcast %cst_13 : f32 to vector<16x32xf32>
    %17 = arith.maximumf %15, %16 : vector<16x32xf32>
    %c0_14 = arith.constant 0 : index
    %c0_15 = arith.constant 0 : index
    %c0_16 = arith.constant 0 : index
    %18 = vector.load %arg7[%c0_14, %c0_15, %c0_16] : memref<3x32x96xbf16, #tpu.memory_space<vmem>>, vector<1x32x96xbf16>
    %19 = vector.shape_cast %18 : vector<1x32x96xbf16> to vector<32x96xbf16>
    %20 = arith.truncf %17 : vector<16x32xf32> to vector<16x32xbf16>
    %cst_17 = arith.constant dense<0.000000e+00> : vector<16x96xf32>
    %21 = tpu.matmul %20, %19, %cst_17 {dimension_numbers = #tpu.dot_dimension_numbers<[1], [0], [0], [1], [0, 0, 1, 1], [], []>} : vector<16x32xbf16>, vector<32x96xbf16>, vector<16x96xf32> -> vector<16x96xf32>
    %c0_18 = arith.constant 0 : index
    %c0_19 = arith.constant 0 : index
    %c0_20 = arith.constant 0 : index
    %22 = vector.load %arg8[%c0_18, %c0_19, %c0_20] : memref<3x1x96xf32, #tpu.memory_space<vmem>>, vector<1x1x96xf32>
    %23 = vector.shape_cast %22 : vector<1x1x96xf32> to vector<1x96xf32>
    %24 = vector.broadcast %23 : vector<1x96xf32> to vector<16x96xf32>
    %25 = arith.addf %21, %24 : vector<16x96xf32>
    %26 = vector.extract_strided_slice %25 {offsets = [0, 0], sizes = [16, 24], strides = [1, 1]} : vector<16x96xf32> to vector<16x24xf32>
    %27 = vector.extract_strided_slice %25 {offsets = [0, 24], sizes = [16, 24], strides = [1, 1]} : vector<16x96xf32> to vector<16x24xf32>
    %28 = vector.extract_strided_slice %25 {offsets = [0, 48], sizes = [16, 24], strides = [1, 1]} : vector<16x96xf32> to vector<16x24xf32>
    %29 = vector.extract_strided_slice %25 {offsets = [0, 72], sizes = [16, 24], strides = [1, 1]} : vector<16x96xf32> to vector<16x24xf32>
    %30 = tpu.concatenate %26, %27, %28, %29 in 0 : vector<16x24xf32>, vector<16x24xf32>, vector<16x24xf32>, vector<16x24xf32> -> vector<64x24xf32>
    %31 = vector.extract_strided_slice %30 {offsets = [0, 0], sizes = [64, 8], strides = [1, 1]} : vector<64x24xf32> to vector<64x8xf32>
    %32 = vector.extract_strided_slice %30 {offsets = [0, 8], sizes = [64, 8], strides = [1, 1]} : vector<64x24xf32> to vector<64x8xf32>
    %33 = vector.extract_strided_slice %30 {offsets = [0, 16], sizes = [64, 8], strides = [1, 1]} : vector<64x24xf32> to vector<64x8xf32>
    %34 = arith.truncf %31 : vector<64x8xf32> to vector<64x8xbf16>
    %35 = arith.truncf %32 : vector<64x8xf32> to vector<64x8xbf16>
    %cst_21 = arith.constant dense<0.000000e+00> : vector<64x64xf32>
    %36 = tpu.matmul %34, %35, %cst_21 {dimension_numbers = #tpu.dot_dimension_numbers<[1], [1], [0], [0], [0, 0, 1, 0], [], []>} : vector<64x8xbf16>, vector<64x8xbf16>, vector<64x64xf32> -> vector<64x64xf32>
    %cst_22 = arith.constant 0.353553385 : f32
    %37 = vector.broadcast %cst_22 : f32 to vector<64x64xf32>
    %38 = arith.mulf %36, %37 : vector<64x64xf32>
    %39 = arith.addf %38, %0 : vector<64x64xf32>
    %cst_23 = arith.constant dense<0xFF800000> : vector<64xf32>
    %40 = vector.multi_reduction <maximumf>, %39, %cst_23 [1] : vector<64x64xf32> to vector<64xf32>
    %41 = vector.shape_cast %40 : vector<64xf32> to vector<64x1xf32>
    %42 = vector.broadcast %41 : vector<64x1xf32> to vector<64x64xf32>
    %43 = arith.subf %39, %42 : vector<64x64xf32>
    %44 = math.exp %43 : vector<64x64xf32>
    %cst_24 = arith.constant dense<0.000000e+00> : vector<64xf32>
    %45 = vector.multi_reduction <add>, %44, %cst_24 [1] : vector<64x64xf32> to vector<64xf32>
    %46 = vector.shape_cast %45 : vector<64xf32> to vector<64x1xf32>
    %47 = vector.broadcast %46 : vector<64x1xf32> to vector<64x64xf32>
    %48 = arith.divf %44, %47 : vector<64x64xf32>
    %49 = arith.truncf %48 : vector<64x64xf32> to vector<64x64xbf16>
    %50 = arith.truncf %33 : vector<64x8xf32> to vector<64x8xbf16>
    %cst_25 = arith.constant dense<0.000000e+00> : vector<64x8xf32>
    %51 = tpu.matmul %49, %50, %cst_25 {dimension_numbers = #tpu.dot_dimension_numbers<[1], [0], [0], [1], [0, 0, 1, 1], [], []>} : vector<64x64xbf16>, vector<64x8xbf16>, vector<64x8xf32> -> vector<64x8xf32>
    %52 = vector.extract_strided_slice %51 {offsets = [0, 0], sizes = [16, 8], strides = [1, 1]} : vector<64x8xf32> to vector<16x8xf32>
    %53 = vector.extract_strided_slice %51 {offsets = [16, 0], sizes = [16, 8], strides = [1, 1]} : vector<64x8xf32> to vector<16x8xf32>
    %54 = vector.extract_strided_slice %51 {offsets = [32, 0], sizes = [16, 8], strides = [1, 1]} : vector<64x8xf32> to vector<16x8xf32>
    %55 = vector.extract_strided_slice %51 {offsets = [48, 0], sizes = [16, 8], strides = [1, 1]} : vector<64x8xf32> to vector<16x8xf32>
    %56 = tpu.concatenate %52, %53, %54, %55 in 1 : vector<16x8xf32>, vector<16x8xf32>, vector<16x8xf32>, vector<16x8xf32> -> vector<16x32xf32>
    %c0_26 = arith.constant 0 : index
    %c0_27 = arith.constant 0 : index
    %c0_28 = arith.constant 0 : index
    %57 = vector.load %arg9[%c0_26, %c0_27, %c0_28] : memref<3x32x32xbf16, #tpu.memory_space<vmem>>, vector<1x32x32xbf16>
    %58 = vector.shape_cast %57 : vector<1x32x32xbf16> to vector<32x32xbf16>
    %59 = arith.truncf %56 : vector<16x32xf32> to vector<16x32xbf16>
    %cst_29 = arith.constant dense<0.000000e+00> : vector<16x32xf32>
    %60 = tpu.matmul %59, %58, %cst_29 {dimension_numbers = #tpu.dot_dimension_numbers<[1], [0], [0], [1], [0, 0, 1, 1], [], []>} : vector<16x32xbf16>, vector<32x32xbf16>, vector<16x32xf32> -> vector<16x32xf32>
    %c0_30 = arith.constant 0 : index
    %c0_31 = arith.constant 0 : index
    %c0_32 = arith.constant 0 : index
    %61 = vector.load %arg10[%c0_30, %c0_31, %c0_32] : memref<3x1x32xf32, #tpu.memory_space<vmem>>, vector<1x1x32xf32>
    %62 = vector.shape_cast %61 : vector<1x1x32xf32> to vector<1x32xf32>
    %63 = vector.broadcast %62 : vector<1x32xf32> to vector<16x32xf32>
    %64 = arith.addf %60, %63 : vector<16x32xf32>
    %65 = arith.addf %17, %64 : vector<16x32xf32>
    %c0_33 = arith.constant 0 : index
    %c0_34 = arith.constant 0 : index
    %c0_35 = arith.constant 0 : index
    %66 = vector.load %arg11[%c0_33, %c0_34, %c0_35] : memref<3x1x32xf32, #tpu.memory_space<vmem>>, vector<1x1x32xf32>
    %67 = vector.shape_cast %66 : vector<1x1x32xf32> to vector<1x32xf32>
    %c0_36 = arith.constant 0 : index
    %c0_37 = arith.constant 0 : index
    %c0_38 = arith.constant 0 : index
    %68 = vector.load %arg12[%c0_36, %c0_37, %c0_38] : memref<3x1x32xf32, #tpu.memory_space<vmem>>, vector<1x1x32xf32>
    %69 = vector.shape_cast %68 : vector<1x1x32xf32> to vector<1x32xf32>
    %cst_39 = arith.constant dense<0.000000e+00> : vector<16xf32>
    %70 = vector.multi_reduction <add>, %65, %cst_39 [1] : vector<16x32xf32> to vector<16xf32>
    %71 = vector.shape_cast %70 : vector<16xf32> to vector<16x1xf32>
    %cst_40 = arith.constant 3.200000e+01 : f32
    %72 = vector.broadcast %cst_40 : f32 to vector<16x1xf32>
    %73 = arith.divf %71, %72 : vector<16x1xf32>
    %74 = vector.broadcast %73 : vector<16x1xf32> to vector<16x32xf32>
    %75 = arith.subf %65, %74 : vector<16x32xf32>
    %76 = vector.broadcast %73 : vector<16x1xf32> to vector<16x32xf32>
    %77 = arith.subf %65, %76 : vector<16x32xf32>
    %78 = arith.mulf %75, %77 : vector<16x32xf32>
    %cst_41 = arith.constant dense<0.000000e+00> : vector<16xf32>
    %79 = vector.multi_reduction <add>, %78, %cst_41 [1] : vector<16x32xf32> to vector<16xf32>
    %80 = vector.shape_cast %79 : vector<16xf32> to vector<16x1xf32>
    %cst_42 = arith.constant 3.200000e+01 : f32
    %81 = vector.broadcast %cst_42 : f32 to vector<16x1xf32>
    %82 = arith.divf %80, %81 : vector<16x1xf32>
    %83 = vector.broadcast %73 : vector<16x1xf32> to vector<16x32xf32>
    %84 = arith.subf %65, %83 : vector<16x32xf32>
    %cst_43 = arith.constant 9.99999974E-6 : f32
    %85 = vector.broadcast %cst_43 : f32 to vector<16x1xf32>
    %86 = arith.addf %82, %85 : vector<16x1xf32>
    %87 = math.rsqrt %86 : vector<16x1xf32>
    %88 = vector.broadcast %87 : vector<16x1xf32> to vector<16x32xf32>
    %89 = arith.mulf %84, %88 : vector<16x32xf32>
    %90 = vector.broadcast %67 : vector<1x32xf32> to vector<16x32xf32>
    %91 = arith.mulf %89, %90 : vector<16x32xf32>
    %92 = vector.broadcast %69 : vector<1x32xf32> to vector<16x32xf32>
    %93 = arith.addf %91, %92 : vector<16x32xf32>
    %c0_44 = arith.constant 0 : index
    %c0_45 = arith.constant 0 : index
    %c0_46 = arith.constant 0 : index
    %94 = vector.load %arg13[%c0_44, %c0_45, %c0_46] : memref<3x32x128xbf16, #tpu.memory_space<vmem>>, vector<1x32x128xbf16>
    %95 = vector.shape_cast %94 : vector<1x32x128xbf16> to vector<32x128xbf16>
    %96 = arith.truncf %93 : vector<16x32xf32> to vector<16x32xbf16>
    %cst_47 = arith.constant dense<0.000000e+00> : vector<16x128xf32>
    %97 = tpu.matmul %96, %95, %cst_47 {dimension_numbers = #tpu.dot_dimension_numbers<[1], [0], [0], [1], [0, 0, 1, 1], [], []>} : vector<16x32xbf16>, vector<32x128xbf16>, vector<16x128xf32> -> vector<16x128xf32>
    %c0_48 = arith.constant 0 : index
    %c0_49 = arith.constant 0 : index
    %c0_50 = arith.constant 0 : index
    %98 = vector.load %arg14[%c0_48, %c0_49, %c0_50] : memref<3x1x128xf32, #tpu.memory_space<vmem>>, vector<1x1x128xf32>
    %99 = vector.shape_cast %98 : vector<1x1x128xf32> to vector<1x128xf32>
    %100 = vector.broadcast %99 : vector<1x128xf32> to vector<16x128xf32>
    %101 = arith.addf %97, %100 : vector<16x128xf32>
    %cst_51 = arith.constant 0.000000e+00 : f32
    %102 = vector.broadcast %cst_51 : f32 to vector<16x128xf32>
    %103 = arith.maximumf %101, %102 : vector<16x128xf32>
    %c0_52 = arith.constant 0 : index
    %c0_53 = arith.constant 0 : index
    %c0_54 = arith.constant 0 : index
    %104 = vector.load %arg15[%c0_52, %c0_53, %c0_54] : memref<3x128x32xbf16, #tpu.memory_space<vmem>>, vector<1x128x32xbf16>
    %105 = vector.shape_cast %104 : vector<1x128x32xbf16> to vector<128x32xbf16>
    %106 = arith.truncf %103 : vector<16x128xf32> to vector<16x128xbf16>
    %cst_55 = arith.constant dense<0.000000e+00> : vector<16x32xf32>
    %107 = tpu.matmul %106, %105, %cst_55 {dimension_numbers = #tpu.dot_dimension_numbers<[1], [0], [0], [1], [0, 0, 1, 1], [], []>} : vector<16x128xbf16>, vector<128x32xbf16>, vector<16x32xf32> -> vector<16x32xf32>
    %c0_56 = arith.constant 0 : index
    %c0_57 = arith.constant 0 : index
    %c0_58 = arith.constant 0 : index
    %108 = vector.load %arg16[%c0_56, %c0_57, %c0_58] : memref<3x1x32xf32, #tpu.memory_space<vmem>>, vector<1x1x32xf32>
    %109 = vector.shape_cast %108 : vector<1x1x32xf32> to vector<1x32xf32>
    %110 = vector.broadcast %109 : vector<1x32xf32> to vector<16x32xf32>
    %111 = arith.addf %107, %110 : vector<16x32xf32>
    %112 = arith.addf %93, %111 : vector<16x32xf32>
    %c0_59 = arith.constant 0 : index
    %c0_60 = arith.constant 0 : index
    %c0_61 = arith.constant 0 : index
    %113 = vector.load %arg17[%c0_59, %c0_60, %c0_61] : memref<3x1x32xf32, #tpu.memory_space<vmem>>, vector<1x1x32xf32>
    %114 = vector.shape_cast %113 : vector<1x1x32xf32> to vector<1x32xf32>
    %c0_62 = arith.constant 0 : index
    %c0_63 = arith.constant 0 : index
    %c0_64 = arith.constant 0 : index
    %115 = vector.load %arg18[%c0_62, %c0_63, %c0_64] : memref<3x1x32xf32, #tpu.memory_space<vmem>>, vector<1x1x32xf32>
    %116 = vector.shape_cast %115 : vector<1x1x32xf32> to vector<1x32xf32>
    %cst_65 = arith.constant dense<0.000000e+00> : vector<16xf32>
    %117 = vector.multi_reduction <add>, %112, %cst_65 [1] : vector<16x32xf32> to vector<16xf32>
    %118 = vector.shape_cast %117 : vector<16xf32> to vector<16x1xf32>
    %cst_66 = arith.constant 3.200000e+01 : f32
    %119 = vector.broadcast %cst_66 : f32 to vector<16x1xf32>
    %120 = arith.divf %118, %119 : vector<16x1xf32>
    %121 = vector.broadcast %120 : vector<16x1xf32> to vector<16x32xf32>
    %122 = arith.subf %112, %121 : vector<16x32xf32>
    %123 = vector.broadcast %120 : vector<16x1xf32> to vector<16x32xf32>
    %124 = arith.subf %112, %123 : vector<16x32xf32>
    %125 = arith.mulf %122, %124 : vector<16x32xf32>
    %cst_67 = arith.constant dense<0.000000e+00> : vector<16xf32>
    %126 = vector.multi_reduction <add>, %125, %cst_67 [1] : vector<16x32xf32> to vector<16xf32>
    %127 = vector.shape_cast %126 : vector<16xf32> to vector<16x1xf32>
    %cst_68 = arith.constant 3.200000e+01 : f32
    %128 = vector.broadcast %cst_68 : f32 to vector<16x1xf32>
    %129 = arith.divf %127, %128 : vector<16x1xf32>
    %130 = vector.broadcast %120 : vector<16x1xf32> to vector<16x32xf32>
    %131 = arith.subf %112, %130 : vector<16x32xf32>
    %cst_69 = arith.constant 9.99999974E-6 : f32
    %132 = vector.broadcast %cst_69 : f32 to vector<16x1xf32>
    %133 = arith.addf %129, %132 : vector<16x1xf32>
    %134 = math.rsqrt %133 : vector<16x1xf32>
    %135 = vector.broadcast %134 : vector<16x1xf32> to vector<16x32xf32>
    %136 = arith.mulf %131, %135 : vector<16x32xf32>
    %137 = vector.broadcast %114 : vector<1x32xf32> to vector<16x32xf32>
    %138 = arith.mulf %136, %137 : vector<16x32xf32>
    %139 = vector.broadcast %116 : vector<1x32xf32> to vector<16x32xf32>
    %140 = arith.addf %138, %139 : vector<16x32xf32>
    %c1 = arith.constant 1 : index
    %c0_70 = arith.constant 0 : index
    %c0_71 = arith.constant 0 : index
    %141 = vector.load %arg7[%c1, %c0_70, %c0_71] : memref<3x32x96xbf16, #tpu.memory_space<vmem>>, vector<1x32x96xbf16>
    %142 = vector.shape_cast %141 : vector<1x32x96xbf16> to vector<32x96xbf16>
    %143 = arith.truncf %140 : vector<16x32xf32> to vector<16x32xbf16>
    %cst_72 = arith.constant dense<0.000000e+00> : vector<16x96xf32>
    %144 = tpu.matmul %143, %142, %cst_72 {dimension_numbers = #tpu.dot_dimension_numbers<[1], [0], [0], [1], [0, 0, 1, 1], [], []>} : vector<16x32xbf16>, vector<32x96xbf16>, vector<16x96xf32> -> vector<16x96xf32>
    %c1_73 = arith.constant 1 : index
    %c0_74 = arith.constant 0 : index
    %c0_75 = arith.constant 0 : index
    %145 = vector.load %arg8[%c1_73, %c0_74, %c0_75] : memref<3x1x96xf32, #tpu.memory_space<vmem>>, vector<1x1x96xf32>
    %146 = vector.shape_cast %145 : vector<1x1x96xf32> to vector<1x96xf32>
    %147 = vector.broadcast %146 : vector<1x96xf32> to vector<16x96xf32>
    %148 = arith.addf %144, %147 : vector<16x96xf32>
    %149 = vector.extract_strided_slice %148 {offsets = [0, 0], sizes = [16, 24], strides = [1, 1]} : vector<16x96xf32> to vector<16x24xf32>
    %150 = vector.extract_strided_slice %148 {offsets = [0, 24], sizes = [16, 24], strides = [1, 1]} : vector<16x96xf32> to vector<16x24xf32>
    %151 = vector.extract_strided_slice %148 {offsets = [0, 48], sizes = [16, 24], strides = [1, 1]} : vector<16x96xf32> to vector<16x24xf32>
    %152 = vector.extract_strided_slice %148 {offsets = [0, 72], sizes = [16, 24], strides = [1, 1]} : vector<16x96xf32> to vector<16x24xf32>
    %153 = tpu.concatenate %149, %150, %151, %152 in 0 : vector<16x24xf32>, vector<16x24xf32>, vector<16x24xf32>, vector<16x24xf32> -> vector<64x24xf32>
    %154 = vector.extract_strided_slice %153 {offsets = [0, 0], sizes = [64, 8], strides = [1, 1]} : vector<64x24xf32> to vector<64x8xf32>
    %155 = vector.extract_strided_slice %153 {offsets = [0, 8], sizes = [64, 8], strides = [1, 1]} : vector<64x24xf32> to vector<64x8xf32>
    %156 = vector.extract_strided_slice %153 {offsets = [0, 16], sizes = [64, 8], strides = [1, 1]} : vector<64x24xf32> to vector<64x8xf32>
    %157 = arith.truncf %154 : vector<64x8xf32> to vector<64x8xbf16>
    %158 = arith.truncf %155 : vector<64x8xf32> to vector<64x8xbf16>
    %cst_76 = arith.constant dense<0.000000e+00> : vector<64x64xf32>
    %159 = tpu.matmul %157, %158, %cst_76 {dimension_numbers = #tpu.dot_dimension_numbers<[1], [1], [0], [0], [0, 0, 1, 0], [], []>} : vector<64x8xbf16>, vector<64x8xbf16>, vector<64x64xf32> -> vector<64x64xf32>
    %cst_77 = arith.constant 0.353553385 : f32
    %160 = vector.broadcast %cst_77 : f32 to vector<64x64xf32>
    %161 = arith.mulf %159, %160 : vector<64x64xf32>
    %162 = arith.addf %161, %0 : vector<64x64xf32>
    %cst_78 = arith.constant dense<0xFF800000> : vector<64xf32>
    %163 = vector.multi_reduction <maximumf>, %162, %cst_78 [1] : vector<64x64xf32> to vector<64xf32>
    %164 = vector.shape_cast %163 : vector<64xf32> to vector<64x1xf32>
    %165 = vector.broadcast %164 : vector<64x1xf32> to vector<64x64xf32>
    %166 = arith.subf %162, %165 : vector<64x64xf32>
    %167 = math.exp %166 : vector<64x64xf32>
    %cst_79 = arith.constant dense<0.000000e+00> : vector<64xf32>
    %168 = vector.multi_reduction <add>, %167, %cst_79 [1] : vector<64x64xf32> to vector<64xf32>
    %169 = vector.shape_cast %168 : vector<64xf32> to vector<64x1xf32>
    %170 = vector.broadcast %169 : vector<64x1xf32> to vector<64x64xf32>
    %171 = arith.divf %167, %170 : vector<64x64xf32>
    %172 = arith.truncf %171 : vector<64x64xf32> to vector<64x64xbf16>
    %173 = arith.truncf %156 : vector<64x8xf32> to vector<64x8xbf16>
    %cst_80 = arith.constant dense<0.000000e+00> : vector<64x8xf32>
    %174 = tpu.matmul %172, %173, %cst_80 {dimension_numbers = #tpu.dot_dimension_numbers<[1], [0], [0], [1], [0, 0, 1, 1], [], []>} : vector<64x64xbf16>, vector<64x8xbf16>, vector<64x8xf32> -> vector<64x8xf32>
    %175 = vector.extract_strided_slice %174 {offsets = [0, 0], sizes = [16, 8], strides = [1, 1]} : vector<64x8xf32> to vector<16x8xf32>
    %176 = vector.extract_strided_slice %174 {offsets = [16, 0], sizes = [16, 8], strides = [1, 1]} : vector<64x8xf32> to vector<16x8xf32>
    %177 = vector.extract_strided_slice %174 {offsets = [32, 0], sizes = [16, 8], strides = [1, 1]} : vector<64x8xf32> to vector<16x8xf32>
    %178 = vector.extract_strided_slice %174 {offsets = [48, 0], sizes = [16, 8], strides = [1, 1]} : vector<64x8xf32> to vector<16x8xf32>
    %179 = tpu.concatenate %175, %176, %177, %178 in 1 : vector<16x8xf32>, vector<16x8xf32>, vector<16x8xf32>, vector<16x8xf32> -> vector<16x32xf32>
    %c1_81 = arith.constant 1 : index
    %c0_82 = arith.constant 0 : index
    %c0_83 = arith.constant 0 : index
    %180 = vector.load %arg9[%c1_81, %c0_82, %c0_83] : memref<3x32x32xbf16, #tpu.memory_space<vmem>>, vector<1x32x32xbf16>
    %181 = vector.shape_cast %180 : vector<1x32x32xbf16> to vector<32x32xbf16>
    %182 = arith.truncf %179 : vector<16x32xf32> to vector<16x32xbf16>
    %cst_84 = arith.constant dense<0.000000e+00> : vector<16x32xf32>
    %183 = tpu.matmul %182, %181, %cst_84 {dimension_numbers = #tpu.dot_dimension_numbers<[1], [0], [0], [1], [0, 0, 1, 1], [], []>} : vector<16x32xbf16>, vector<32x32xbf16>, vector<16x32xf32> -> vector<16x32xf32>
    %c1_85 = arith.constant 1 : index
    %c0_86 = arith.constant 0 : index
    %c0_87 = arith.constant 0 : index
    %184 = vector.load %arg10[%c1_85, %c0_86, %c0_87] : memref<3x1x32xf32, #tpu.memory_space<vmem>>, vector<1x1x32xf32>
    %185 = vector.shape_cast %184 : vector<1x1x32xf32> to vector<1x32xf32>
    %186 = vector.broadcast %185 : vector<1x32xf32> to vector<16x32xf32>
    %187 = arith.addf %183, %186 : vector<16x32xf32>
    %188 = arith.addf %140, %187 : vector<16x32xf32>
    %c1_88 = arith.constant 1 : index
    %c0_89 = arith.constant 0 : index
    %c0_90 = arith.constant 0 : index
    %189 = vector.load %arg11[%c1_88, %c0_89, %c0_90] : memref<3x1x32xf32, #tpu.memory_space<vmem>>, vector<1x1x32xf32>
    %190 = vector.shape_cast %189 : vector<1x1x32xf32> to vector<1x32xf32>
    %c1_91 = arith.constant 1 : index
    %c0_92 = arith.constant 0 : index
    %c0_93 = arith.constant 0 : index
    %191 = vector.load %arg12[%c1_91, %c0_92, %c0_93] : memref<3x1x32xf32, #tpu.memory_space<vmem>>, vector<1x1x32xf32>
    %192 = vector.shape_cast %191 : vector<1x1x32xf32> to vector<1x32xf32>
    %cst_94 = arith.constant dense<0.000000e+00> : vector<16xf32>
    %193 = vector.multi_reduction <add>, %188, %cst_94 [1] : vector<16x32xf32> to vector<16xf32>
    %194 = vector.shape_cast %193 : vector<16xf32> to vector<16x1xf32>
    %cst_95 = arith.constant 3.200000e+01 : f32
    %195 = vector.broadcast %cst_95 : f32 to vector<16x1xf32>
    %196 = arith.divf %194, %195 : vector<16x1xf32>
    %197 = vector.broadcast %196 : vector<16x1xf32> to vector<16x32xf32>
    %198 = arith.subf %188, %197 : vector<16x32xf32>
    %199 = vector.broadcast %196 : vector<16x1xf32> to vector<16x32xf32>
    %200 = arith.subf %188, %199 : vector<16x32xf32>
    %201 = arith.mulf %198, %200 : vector<16x32xf32>
    %cst_96 = arith.constant dense<0.000000e+00> : vector<16xf32>
    %202 = vector.multi_reduction <add>, %201, %cst_96 [1] : vector<16x32xf32> to vector<16xf32>
    %203 = vector.shape_cast %202 : vector<16xf32> to vector<16x1xf32>
    %cst_97 = arith.constant 3.200000e+01 : f32
    %204 = vector.broadcast %cst_97 : f32 to vector<16x1xf32>
    %205 = arith.divf %203, %204 : vector<16x1xf32>
    %206 = vector.broadcast %196 : vector<16x1xf32> to vector<16x32xf32>
    %207 = arith.subf %188, %206 : vector<16x32xf32>
    %cst_98 = arith.constant 9.99999974E-6 : f32
    %208 = vector.broadcast %cst_98 : f32 to vector<16x1xf32>
    %209 = arith.addf %205, %208 : vector<16x1xf32>
    %210 = math.rsqrt %209 : vector<16x1xf32>
    %211 = vector.broadcast %210 : vector<16x1xf32> to vector<16x32xf32>
    %212 = arith.mulf %207, %211 : vector<16x32xf32>
    %213 = vector.broadcast %190 : vector<1x32xf32> to vector<16x32xf32>
    %214 = arith.mulf %212, %213 : vector<16x32xf32>
    %215 = vector.broadcast %192 : vector<1x32xf32> to vector<16x32xf32>
    %216 = arith.addf %214, %215 : vector<16x32xf32>
    %c1_99 = arith.constant 1 : index
    %c0_100 = arith.constant 0 : index
    %c0_101 = arith.constant 0 : index
    %217 = vector.load %arg13[%c1_99, %c0_100, %c0_101] : memref<3x32x128xbf16, #tpu.memory_space<vmem>>, vector<1x32x128xbf16>
    %218 = vector.shape_cast %217 : vector<1x32x128xbf16> to vector<32x128xbf16>
    %219 = arith.truncf %216 : vector<16x32xf32> to vector<16x32xbf16>
    %cst_102 = arith.constant dense<0.000000e+00> : vector<16x128xf32>
    %220 = tpu.matmul %219, %218, %cst_102 {dimension_numbers = #tpu.dot_dimension_numbers<[1], [0], [0], [1], [0, 0, 1, 1], [], []>} : vector<16x32xbf16>, vector<32x128xbf16>, vector<16x128xf32> -> vector<16x128xf32>
    %c1_103 = arith.constant 1 : index
    %c0_104 = arith.constant 0 : index
    %c0_105 = arith.constant 0 : index
    %221 = vector.load %arg14[%c1_103, %c0_104, %c0_105] : memref<3x1x128xf32, #tpu.memory_space<vmem>>, vector<1x1x128xf32>
    %222 = vector.shape_cast %221 : vector<1x1x128xf32> to vector<1x128xf32>
    %223 = vector.broadcast %222 : vector<1x128xf32> to vector<16x128xf32>
    %224 = arith.addf %220, %223 : vector<16x128xf32>
    %cst_106 = arith.constant 0.000000e+00 : f32
    %225 = vector.broadcast %cst_106 : f32 to vector<16x128xf32>
    %226 = arith.maximumf %224, %225 : vector<16x128xf32>
    %c1_107 = arith.constant 1 : index
    %c0_108 = arith.constant 0 : index
    %c0_109 = arith.constant 0 : index
    %227 = vector.load %arg15[%c1_107, %c0_108, %c0_109] : memref<3x128x32xbf16, #tpu.memory_space<vmem>>, vector<1x128x32xbf16>
    %228 = vector.shape_cast %227 : vector<1x128x32xbf16> to vector<128x32xbf16>
    %229 = arith.truncf %226 : vector<16x128xf32> to vector<16x128xbf16>
    %cst_110 = arith.constant dense<0.000000e+00> : vector<16x32xf32>
    %230 = tpu.matmul %229, %228, %cst_110 {dimension_numbers = #tpu.dot_dimension_numbers<[1], [0], [0], [1], [0, 0, 1, 1], [], []>} : vector<16x128xbf16>, vector<128x32xbf16>, vector<16x32xf32> -> vector<16x32xf32>
    %c1_111 = arith.constant 1 : index
    %c0_112 = arith.constant 0 : index
    %c0_113 = arith.constant 0 : index
    %231 = vector.load %arg16[%c1_111, %c0_112, %c0_113] : memref<3x1x32xf32, #tpu.memory_space<vmem>>, vector<1x1x32xf32>
    %232 = vector.shape_cast %231 : vector<1x1x32xf32> to vector<1x32xf32>
    %233 = vector.broadcast %232 : vector<1x32xf32> to vector<16x32xf32>
    %234 = arith.addf %230, %233 : vector<16x32xf32>
    %235 = arith.addf %216, %234 : vector<16x32xf32>
    %c1_114 = arith.constant 1 : index
    %c0_115 = arith.constant 0 : index
    %c0_116 = arith.constant 0 : index
    %236 = vector.load %arg17[%c1_114, %c0_115, %c0_116] : memref<3x1x32xf32, #tpu.memory_space<vmem>>, vector<1x1x32xf32>
    %237 = vector.shape_cast %236 : vector<1x1x32xf32> to vector<1x32xf32>
    %c1_117 = arith.constant 1 : index
    %c0_118 = arith.constant 0 : index
    %c0_119 = arith.constant 0 : index
    %238 = vector.load %arg18[%c1_117, %c0_118, %c0_119] : memref<3x1x32xf32, #tpu.memory_space<vmem>>, vector<1x1x32xf32>
    %239 = vector.shape_cast %238 : vector<1x1x32xf32> to vector<1x32xf32>
    %cst_120 = arith.constant dense<0.000000e+00> : vector<16xf32>
    %240 = vector.multi_reduction <add>, %235, %cst_120 [1] : vector<16x32xf32> to vector<16xf32>
    %241 = vector.shape_cast %240 : vector<16xf32> to vector<16x1xf32>
    %cst_121 = arith.constant 3.200000e+01 : f32
    %242 = vector.broadcast %cst_121 : f32 to vector<16x1xf32>
    %243 = arith.divf %241, %242 : vector<16x1xf32>
    %244 = vector.broadcast %243 : vector<16x1xf32> to vector<16x32xf32>
    %245 = arith.subf %235, %244 : vector<16x32xf32>
    %246 = vector.broadcast %243 : vector<16x1xf32> to vector<16x32xf32>
    %247 = arith.subf %235, %246 : vector<16x32xf32>
    %248 = arith.mulf %245, %247 : vector<16x32xf32>
    %cst_122 = arith.constant dense<0.000000e+00> : vector<16xf32>
    %249 = vector.multi_reduction <add>, %248, %cst_122 [1] : vector<16x32xf32> to vector<16xf32>
    %250 = vector.shape_cast %249 : vector<16xf32> to vector<16x1xf32>
    %cst_123 = arith.constant 3.200000e+01 : f32
    %251 = vector.broadcast %cst_123 : f32 to vector<16x1xf32>
    %252 = arith.divf %250, %251 : vector<16x1xf32>
    %253 = vector.broadcast %243 : vector<16x1xf32> to vector<16x32xf32>
    %254 = arith.subf %235, %253 : vector<16x32xf32>
    %cst_124 = arith.constant 9.99999974E-6 : f32
    %255 = vector.broadcast %cst_124 : f32 to vector<16x1xf32>
    %256 = arith.addf %252, %255 : vector<16x1xf32>
    %257 = math.rsqrt %256 : vector<16x1xf32>
    %258 = vector.broadcast %257 : vector<16x1xf32> to vector<16x32xf32>
    %259 = arith.mulf %254, %258 : vector<16x32xf32>
    %260 = vector.broadcast %237 : vector<1x32xf32> to vector<16x32xf32>
    %261 = arith.mulf %259, %260 : vector<16x32xf32>
    %262 = vector.broadcast %239 : vector<1x32xf32> to vector<16x32xf32>
    %263 = arith.addf %261, %262 : vector<16x32xf32>
    %c2 = arith.constant 2 : index
    %c0_125 = arith.constant 0 : index
    %c0_126 = arith.constant 0 : index
    %264 = vector.load %arg7[%c2, %c0_125, %c0_126] : memref<3x32x96xbf16, #tpu.memory_space<vmem>>, vector<1x32x96xbf16>
    %265 = vector.shape_cast %264 : vector<1x32x96xbf16> to vector<32x96xbf16>
    %266 = arith.truncf %263 : vector<16x32xf32> to vector<16x32xbf16>
    %cst_127 = arith.constant dense<0.000000e+00> : vector<16x96xf32>
    %267 = tpu.matmul %266, %265, %cst_127 {dimension_numbers = #tpu.dot_dimension_numbers<[1], [0], [0], [1], [0, 0, 1, 1], [], []>} : vector<16x32xbf16>, vector<32x96xbf16>, vector<16x96xf32> -> vector<16x96xf32>
    %c2_128 = arith.constant 2 : index
    %c0_129 = arith.constant 0 : index
    %c0_130 = arith.constant 0 : index
    %268 = vector.load %arg8[%c2_128, %c0_129, %c0_130] : memref<3x1x96xf32, #tpu.memory_space<vmem>>, vector<1x1x96xf32>
    %269 = vector.shape_cast %268 : vector<1x1x96xf32> to vector<1x96xf32>
    %270 = vector.broadcast %269 : vector<1x96xf32> to vector<16x96xf32>
    %271 = arith.addf %267, %270 : vector<16x96xf32>
    %272 = vector.extract_strided_slice %271 {offsets = [0, 0], sizes = [16, 24], strides = [1, 1]} : vector<16x96xf32> to vector<16x24xf32>
    %273 = vector.extract_strided_slice %271 {offsets = [0, 24], sizes = [16, 24], strides = [1, 1]} : vector<16x96xf32> to vector<16x24xf32>
    %274 = vector.extract_strided_slice %271 {offsets = [0, 48], sizes = [16, 24], strides = [1, 1]} : vector<16x96xf32> to vector<16x24xf32>
    %275 = vector.extract_strided_slice %271 {offsets = [0, 72], sizes = [16, 24], strides = [1, 1]} : vector<16x96xf32> to vector<16x24xf32>
    %276 = tpu.concatenate %272, %273, %274, %275 in 0 : vector<16x24xf32>, vector<16x24xf32>, vector<16x24xf32>, vector<16x24xf32> -> vector<64x24xf32>
    %277 = vector.extract_strided_slice %276 {offsets = [0, 0], sizes = [64, 8], strides = [1, 1]} : vector<64x24xf32> to vector<64x8xf32>
    %278 = vector.extract_strided_slice %276 {offsets = [0, 8], sizes = [64, 8], strides = [1, 1]} : vector<64x24xf32> to vector<64x8xf32>
    %279 = vector.extract_strided_slice %276 {offsets = [0, 16], sizes = [64, 8], strides = [1, 1]} : vector<64x24xf32> to vector<64x8xf32>
    %280 = arith.truncf %277 : vector<64x8xf32> to vector<64x8xbf16>
    %281 = arith.truncf %278 : vector<64x8xf32> to vector<64x8xbf16>
    %cst_131 = arith.constant dense<0.000000e+00> : vector<64x64xf32>
    %282 = tpu.matmul %280, %281, %cst_131 {dimension_numbers = #tpu.dot_dimension_numbers<[1], [1], [0], [0], [0, 0, 1, 0], [], []>} : vector<64x8xbf16>, vector<64x8xbf16>, vector<64x64xf32> -> vector<64x64xf32>
    %cst_132 = arith.constant 0.353553385 : f32
    %283 = vector.broadcast %cst_132 : f32 to vector<64x64xf32>
    %284 = arith.mulf %282, %283 : vector<64x64xf32>
    %285 = arith.addf %284, %0 : vector<64x64xf32>
    %cst_133 = arith.constant dense<0xFF800000> : vector<64xf32>
    %286 = vector.multi_reduction <maximumf>, %285, %cst_133 [1] : vector<64x64xf32> to vector<64xf32>
    %287 = vector.shape_cast %286 : vector<64xf32> to vector<64x1xf32>
    %288 = vector.broadcast %287 : vector<64x1xf32> to vector<64x64xf32>
    %289 = arith.subf %285, %288 : vector<64x64xf32>
    %290 = math.exp %289 : vector<64x64xf32>
    %cst_134 = arith.constant dense<0.000000e+00> : vector<64xf32>
    %291 = vector.multi_reduction <add>, %290, %cst_134 [1] : vector<64x64xf32> to vector<64xf32>
    %292 = vector.shape_cast %291 : vector<64xf32> to vector<64x1xf32>
    %293 = vector.broadcast %292 : vector<64x1xf32> to vector<64x64xf32>
    %294 = arith.divf %290, %293 : vector<64x64xf32>
    %295 = arith.truncf %294 : vector<64x64xf32> to vector<64x64xbf16>
    %296 = arith.truncf %279 : vector<64x8xf32> to vector<64x8xbf16>
    %cst_135 = arith.constant dense<0.000000e+00> : vector<64x8xf32>
    %297 = tpu.matmul %295, %296, %cst_135 {dimension_numbers = #tpu.dot_dimension_numbers<[1], [0], [0], [1], [0, 0, 1, 1], [], []>} : vector<64x64xbf16>, vector<64x8xbf16>, vector<64x8xf32> -> vector<64x8xf32>
    %298 = vector.extract_strided_slice %297 {offsets = [0, 0], sizes = [16, 8], strides = [1, 1]} : vector<64x8xf32> to vector<16x8xf32>
    %299 = vector.extract_strided_slice %297 {offsets = [16, 0], sizes = [16, 8], strides = [1, 1]} : vector<64x8xf32> to vector<16x8xf32>
    %300 = vector.extract_strided_slice %297 {offsets = [32, 0], sizes = [16, 8], strides = [1, 1]} : vector<64x8xf32> to vector<16x8xf32>
    %301 = vector.extract_strided_slice %297 {offsets = [48, 0], sizes = [16, 8], strides = [1, 1]} : vector<64x8xf32> to vector<16x8xf32>
    %302 = tpu.concatenate %298, %299, %300, %301 in 1 : vector<16x8xf32>, vector<16x8xf32>, vector<16x8xf32>, vector<16x8xf32> -> vector<16x32xf32>
    %c2_136 = arith.constant 2 : index
    %c0_137 = arith.constant 0 : index
    %c0_138 = arith.constant 0 : index
    %303 = vector.load %arg9[%c2_136, %c0_137, %c0_138] : memref<3x32x32xbf16, #tpu.memory_space<vmem>>, vector<1x32x32xbf16>
    %304 = vector.shape_cast %303 : vector<1x32x32xbf16> to vector<32x32xbf16>
    %305 = arith.truncf %302 : vector<16x32xf32> to vector<16x32xbf16>
    %cst_139 = arith.constant dense<0.000000e+00> : vector<16x32xf32>
    %306 = tpu.matmul %305, %304, %cst_139 {dimension_numbers = #tpu.dot_dimension_numbers<[1], [0], [0], [1], [0, 0, 1, 1], [], []>} : vector<16x32xbf16>, vector<32x32xbf16>, vector<16x32xf32> -> vector<16x32xf32>
    %c2_140 = arith.constant 2 : index
    %c0_141 = arith.constant 0 : index
    %c0_142 = arith.constant 0 : index
    %307 = vector.load %arg10[%c2_140, %c0_141, %c0_142] : memref<3x1x32xf32, #tpu.memory_space<vmem>>, vector<1x1x32xf32>
    %308 = vector.shape_cast %307 : vector<1x1x32xf32> to vector<1x32xf32>
    %309 = vector.broadcast %308 : vector<1x32xf32> to vector<16x32xf32>
    %310 = arith.addf %306, %309 : vector<16x32xf32>
    %311 = arith.addf %263, %310 : vector<16x32xf32>
    %c2_143 = arith.constant 2 : index
    %c0_144 = arith.constant 0 : index
    %c0_145 = arith.constant 0 : index
    %312 = vector.load %arg11[%c2_143, %c0_144, %c0_145] : memref<3x1x32xf32, #tpu.memory_space<vmem>>, vector<1x1x32xf32>
    %313 = vector.shape_cast %312 : vector<1x1x32xf32> to vector<1x32xf32>
    %c2_146 = arith.constant 2 : index
    %c0_147 = arith.constant 0 : index
    %c0_148 = arith.constant 0 : index
    %314 = vector.load %arg12[%c2_146, %c0_147, %c0_148] : memref<3x1x32xf32, #tpu.memory_space<vmem>>, vector<1x1x32xf32>
    %315 = vector.shape_cast %314 : vector<1x1x32xf32> to vector<1x32xf32>
    %cst_149 = arith.constant dense<0.000000e+00> : vector<16xf32>
    %316 = vector.multi_reduction <add>, %311, %cst_149 [1] : vector<16x32xf32> to vector<16xf32>
    %317 = vector.shape_cast %316 : vector<16xf32> to vector<16x1xf32>
    %cst_150 = arith.constant 3.200000e+01 : f32
    %318 = vector.broadcast %cst_150 : f32 to vector<16x1xf32>
    %319 = arith.divf %317, %318 : vector<16x1xf32>
    %320 = vector.broadcast %319 : vector<16x1xf32> to vector<16x32xf32>
    %321 = arith.subf %311, %320 : vector<16x32xf32>
    %322 = vector.broadcast %319 : vector<16x1xf32> to vector<16x32xf32>
    %323 = arith.subf %311, %322 : vector<16x32xf32>
    %324 = arith.mulf %321, %323 : vector<16x32xf32>
    %cst_151 = arith.constant dense<0.000000e+00> : vector<16xf32>
    %325 = vector.multi_reduction <add>, %324, %cst_151 [1] : vector<16x32xf32> to vector<16xf32>
    %326 = vector.shape_cast %325 : vector<16xf32> to vector<16x1xf32>
    %cst_152 = arith.constant 3.200000e+01 : f32
    %327 = vector.broadcast %cst_152 : f32 to vector<16x1xf32>
    %328 = arith.divf %326, %327 : vector<16x1xf32>
    %329 = vector.broadcast %319 : vector<16x1xf32> to vector<16x32xf32>
    %330 = arith.subf %311, %329 : vector<16x32xf32>
    %cst_153 = arith.constant 9.99999974E-6 : f32
    %331 = vector.broadcast %cst_153 : f32 to vector<16x1xf32>
    %332 = arith.addf %328, %331 : vector<16x1xf32>
    %333 = math.rsqrt %332 : vector<16x1xf32>
    %334 = vector.broadcast %333 : vector<16x1xf32> to vector<16x32xf32>
    %335 = arith.mulf %330, %334 : vector<16x32xf32>
    %336 = vector.broadcast %313 : vector<1x32xf32> to vector<16x32xf32>
    %337 = arith.mulf %335, %336 : vector<16x32xf32>
    %338 = vector.broadcast %315 : vector<1x32xf32> to vector<16x32xf32>
    %339 = arith.addf %337, %338 : vector<16x32xf32>
    %c2_154 = arith.constant 2 : index
    %c0_155 = arith.constant 0 : index
    %c0_156 = arith.constant 0 : index
    %340 = vector.load %arg13[%c2_154, %c0_155, %c0_156] : memref<3x32x128xbf16, #tpu.memory_space<vmem>>, vector<1x32x128xbf16>
    %341 = vector.shape_cast %340 : vector<1x32x128xbf16> to vector<32x128xbf16>
    %342 = arith.truncf %339 : vector<16x32xf32> to vector<16x32xbf16>
    %cst_157 = arith.constant dense<0.000000e+00> : vector<16x128xf32>
    %343 = tpu.matmul %342, %341, %cst_157 {dimension_numbers = #tpu.dot_dimension_numbers<[1], [0], [0], [1], [0, 0, 1, 1], [], []>} : vector<16x32xbf16>, vector<32x128xbf16>, vector<16x128xf32> -> vector<16x128xf32>
    %c2_158 = arith.constant 2 : index
    %c0_159 = arith.constant 0 : index
    %c0_160 = arith.constant 0 : index
    %344 = vector.load %arg14[%c2_158, %c0_159, %c0_160] : memref<3x1x128xf32, #tpu.memory_space<vmem>>, vector<1x1x128xf32>
    %345 = vector.shape_cast %344 : vector<1x1x128xf32> to vector<1x128xf32>
    %346 = vector.broadcast %345 : vector<1x128xf32> to vector<16x128xf32>
    %347 = arith.addf %343, %346 : vector<16x128xf32>
    %cst_161 = arith.constant 0.000000e+00 : f32
    %348 = vector.broadcast %cst_161 : f32 to vector<16x128xf32>
    %349 = arith.maximumf %347, %348 : vector<16x128xf32>
    %c2_162 = arith.constant 2 : index
    %c0_163 = arith.constant 0 : index
    %c0_164 = arith.constant 0 : index
    %350 = vector.load %arg15[%c2_162, %c0_163, %c0_164] : memref<3x128x32xbf16, #tpu.memory_space<vmem>>, vector<1x128x32xbf16>
    %351 = vector.shape_cast %350 : vector<1x128x32xbf16> to vector<128x32xbf16>
    %352 = arith.truncf %349 : vector<16x128xf32> to vector<16x128xbf16>
    %cst_165 = arith.constant dense<0.000000e+00> : vector<16x32xf32>
    %353 = tpu.matmul %352, %351, %cst_165 {dimension_numbers = #tpu.dot_dimension_numbers<[1], [0], [0], [1], [0, 0, 1, 1], [], []>} : vector<16x128xbf16>, vector<128x32xbf16>, vector<16x32xf32> -> vector<16x32xf32>
    %c2_166 = arith.constant 2 : index
    %c0_167 = arith.constant 0 : index
    %c0_168 = arith.constant 0 : index
    %354 = vector.load %arg16[%c2_166, %c0_167, %c0_168] : memref<3x1x32xf32, #tpu.memory_space<vmem>>, vector<1x1x32xf32>
    %355 = vector.shape_cast %354 : vector<1x1x32xf32> to vector<1x32xf32>
    %356 = vector.broadcast %355 : vector<1x32xf32> to vector<16x32xf32>
    %357 = arith.addf %353, %356 : vector<16x32xf32>
    %358 = arith.addf %339, %357 : vector<16x32xf32>
    %c2_169 = arith.constant 2 : index
    %c0_170 = arith.constant 0 : index
    %c0_171 = arith.constant 0 : index
    %359 = vector.load %arg17[%c2_169, %c0_170, %c0_171] : memref<3x1x32xf32, #tpu.memory_space<vmem>>, vector<1x1x32xf32>
    %360 = vector.shape_cast %359 : vector<1x1x32xf32> to vector<1x32xf32>
    %c2_172 = arith.constant 2 : index
    %c0_173 = arith.constant 0 : index
    %c0_174 = arith.constant 0 : index
    %361 = vector.load %arg18[%c2_172, %c0_173, %c0_174] : memref<3x1x32xf32, #tpu.memory_space<vmem>>, vector<1x1x32xf32>
    %362 = vector.shape_cast %361 : vector<1x1x32xf32> to vector<1x32xf32>
    %cst_175 = arith.constant dense<0.000000e+00> : vector<16xf32>
    %363 = vector.multi_reduction <add>, %358, %cst_175 [1] : vector<16x32xf32> to vector<16xf32>
    %364 = vector.shape_cast %363 : vector<16xf32> to vector<16x1xf32>
    %cst_176 = arith.constant 3.200000e+01 : f32
    %365 = vector.broadcast %cst_176 : f32 to vector<16x1xf32>
    %366 = arith.divf %364, %365 : vector<16x1xf32>
    %367 = vector.broadcast %366 : vector<16x1xf32> to vector<16x32xf32>
    %368 = arith.subf %358, %367 : vector<16x32xf32>
    %369 = vector.broadcast %366 : vector<16x1xf32> to vector<16x32xf32>
    %370 = arith.subf %358, %369 : vector<16x32xf32>
    %371 = arith.mulf %368, %370 : vector<16x32xf32>
    %cst_177 = arith.constant dense<0.000000e+00> : vector<16xf32>
    %372 = vector.multi_reduction <add>, %371, %cst_177 [1] : vector<16x32xf32> to vector<16xf32>
    %373 = vector.shape_cast %372 : vector<16xf32> to vector<16x1xf32>
    %cst_178 = arith.constant 3.200000e+01 : f32
    %374 = vector.broadcast %cst_178 : f32 to vector<16x1xf32>
    %375 = arith.divf %373, %374 : vector<16x1xf32>
    %376 = vector.broadcast %366 : vector<16x1xf32> to vector<16x32xf32>
    %377 = arith.subf %358, %376 : vector<16x32xf32>
    %cst_179 = arith.constant 9.99999974E-6 : f32
    %378 = vector.broadcast %cst_179 : f32 to vector<16x1xf32>
    %379 = arith.addf %375, %378 : vector<16x1xf32>
    %380 = math.rsqrt %379 : vector<16x1xf32>
    %381 = vector.broadcast %380 : vector<16x1xf32> to vector<16x32xf32>
    %382 = arith.mulf %377, %381 : vector<16x32xf32>
    %383 = vector.broadcast %360 : vector<1x32xf32> to vector<16x32xf32>
    %384 = arith.mulf %382, %383 : vector<16x32xf32>
    %385 = vector.broadcast %362 : vector<1x32xf32> to vector<16x32xf32>
    %386 = arith.addf %384, %385 : vector<16x32xf32>
    %c0_180 = arith.constant 0 : index
    %c0_181 = arith.constant 0 : index
    %387 = vector.load %arg23[%c0_180, %c0_181] : memref<16x32xf32, #tpu.memory_space<vmem>>, vector<16x32xf32>
    tpu.vector_store %arg23[%c0_180, %c0_181], %386 {strides = array<i32>} : memref<16x32xf32, #tpu.memory_space<vmem>>, vector<16x32xf32>,
    %c0_182 = arith.constant 0 : index
    %c0_183 = arith.constant 0 : index
    %388 = vector.load %arg2[%c0_182, %c0_183] : memref<2x16xf32, #tpu.memory_space<vmem>>, vector<2x16xf32>
    %389 = arith.truncf %388 : vector<2x16xf32> to vector<2x16xbf16>
    %390 = arith.truncf %386 : vector<16x32xf32> to vector<16x32xbf16>
    %cst_184 = arith.constant dense<0.000000e+00> : vector<2x32xf32>
    %391 = tpu.matmul %389, %390, %cst_184 {dimension_numbers = #tpu.dot_dimension_numbers<[1], [0], [0], [1], [0, 0, 1, 1], [], []>} : vector<2x16xbf16>, vector<16x32xbf16>, vector<2x32xf32> -> vector<2x32xf32>
    %c0_185 = arith.constant 0 : index
    %c0_186 = arith.constant 0 : index
    %392 = vector.load %arg19[%c0_185, %c0_186] : memref<32x176xbf16, #tpu.memory_space<vmem>>, vector<32x176xbf16>
    %393 = arith.truncf %391 : vector<2x32xf32> to vector<2x32xbf16>
    %cst_187 = arith.constant dense<0.000000e+00> : vector<2x176xf32>
    %394 = tpu.matmul %393, %392, %cst_187 {dimension_numbers = #tpu.dot_dimension_numbers<[1], [0], [0], [1], [0, 0, 1, 1], [], []>} : vector<2x32xbf16>, vector<32x176xbf16>, vector<2x176xf32> -> vector<2x176xf32>
    %c0_188 = arith.constant 0 : index
    %c0_189 = arith.constant 0 : index
    %395 = vector.load %arg20[%c0_188, %c0_189] : memref<1x176xf32, #tpu.memory_space<vmem>>, vector<1x176xf32>
    %396 = vector.broadcast %395 : vector<1x176xf32> to vector<2x176xf32>
    %397 = arith.addf %394, %396 : vector<2x176xf32>
    %cst_190 = arith.constant 0.000000e+00 : f32
    %398 = vector.broadcast %cst_190 : f32 to vector<2x176xf32>
    %399 = arith.maximumf %397, %398 : vector<2x176xf32>
    %c0_191 = arith.constant 0 : index
    %c0_192 = arith.constant 0 : index
    %400 = vector.load %arg21[%c0_191, %c0_192] : memref<176x128xbf16, #tpu.memory_space<vmem>>, vector<176x128xbf16>
    %401 = arith.truncf %399 : vector<2x176xf32> to vector<2x176xbf16>
    %cst_193 = arith.constant dense<0.000000e+00> : vector<2x128xf32>
    %402 = tpu.matmul %401, %400, %cst_193 {dimension_numbers = #tpu.dot_dimension_numbers<[1], [0], [0], [1], [0, 0, 1, 1], [], []>} : vector<2x176xbf16>, vector<176x128xbf16>, vector<2x128xf32> -> vector<2x128xf32>
    %c0_194 = arith.constant 0 : index
    %c0_195 = arith.constant 0 : index
    %403 = vector.load %arg22[%c0_194, %c0_195] : memref<1x128xf32, #tpu.memory_space<vmem>>, vector<1x128xf32>
    %404 = vector.broadcast %403 : vector<1x128xf32> to vector<2x128xf32>
    %405 = arith.addf %402, %404 : vector<2x128xf32>
    %c0_196 = arith.constant 0 : index
    %c0_197 = arith.constant 0 : index
    %406 = vector.load %arg24[%c0_196, %c0_197] : memref<2x128xf32, #tpu.memory_space<vmem>>, vector<2x128xf32>
    tpu.vector_store %arg24[%c0_196, %c0_197], %405 {strides = array<i32>} : memref<2x128xf32, #tpu.memory_space<vmem>>, vector<2x128xf32>,
    return
  }
}

</mosaic_0001>

<bundles_post_ra>
// kernel: physical_properties_forward.1
= control target key start
LH: loop header
LB: loop body
LE: loop exit
PB: predicated region body
PF: predicated region fallthrough
CT: control target
= control target key end

     0   :  { %s4871_s0 = inlined_call_operand.vmem [shape: f32[16,32], index: 0, kind: input, shape index: {}]   ;;  %s4872_s1 = inlined_call_operand.vmem [shape: f32[64,64], index: 1, kind: input, shape index: {}]   ;;  %s4873_s2 = inlined_call_operand.vmem [shape: f32[2,16], index: 2, kind: input, shape index: {}]   ;;  %s4874_s3 = inlined_call_operand.hbm [shape: bf16[32,32], index: 3, kind: input, shape index: {}]   ;;  %s4875_s4 = inlined_call_operand.hbm [shape: f32[1,32], index: 4, kind: input, shape index: {}]   ;;  %s4876_s5 = inlined_call_operand.hbm [shape: bf16[32,32], index: 5, kind: input, shape index: {}]   ;;  %s4877_s6 = inlined_call_operand.hbm [shape: f32[1,32], index: 6, kind: input, shape index: {}]   ;;  %s4878_s7 = inlined_call_operand.vmem [shape: bf16[3,32,96], index: 7, kind: input, shape index: {}]   ;;  %s4879_s8 = inlined_call_operand.vmem [shape: f32[3,1,96], index: 8, kind: input, shape index: {}]   ;;  %s4880_s9 = inlined_call_operand.vmem [shape: bf16[3,32,32], index: 9, kind: input, shape index: {}]   ;;  %s4881_s10 = inlined_call_operand.vmem [shape: f32[3,1,32], index: 10, kind: input, shape index: {}]   ;;  %s4882_s11 = inlined_call_operand.vmem [shape: f32[3,1,32], index: 11, kind: input, shape index: {}]   ;;  %s4883_s12 = inlined_call_operand.vmem [shape: f32[3,1,32], index: 12, kind: input, shape index: {}]   ;;  %s4884_s13 = inlined_call_operand.vmem [shape: bf16[3,32,128], index: 13, kind: input, shape index: {}]   ;;  %s4885_s14 = inlined_call_operand.hbm [shape: f32[3,1,128], index: 14, kind: input, shape index: {}]   ;;  %s4886_s15 = inlined_call_operand.vmem [shape: bf16[3,128,32], index: 15, kind: input, shape index: {}]   ;;  %s4887_s16 = inlined_call_operand.hbm [shape: f32[3,1,32], index: 16, kind: input, shape index: {}]   ;;  %s4888_s17 = inlined_call_operand.vmem [shape: f32[3,1,32], index: 17, kind: input, shape index: {}]   ;;  %s4889_s18 = inlined_call_operand.vmem [shape: f32[3,1,32], index: 18, kind: input, shape index: {}]   ;;  %s4890_s19 = inlined_call_operand.vmem [shape: bf16[32,176], index: 19, kind: input, shape index: {}]   ;;  %s4891_s20 = inlined_call_operand.hbm [shape: f32[1,176], index: 20, kind: input, shape index: {}]   ;;  %s4892_s21 = inlined_call_operand.vmem [shape: bf16[176,128], index: 21, kind: input, shape index: {}]   ;;  %s4893_s22 = inlined_call_operand.hbm [shape: f32[1,128], index: 22, kind: input, shape index: {}]   ;;  %s4894_s23 = inlined_call_operand.hbm [shape: f32[16,32], index: 23, kind: output, shape index: {0}]   ;;  %s4895_s24 = inlined_call_operand.vmem [shape: f32[2,128], index: 24, kind: output, shape index: {1}]  }
   0x1   :  { %4900 = sst [smem:[#allocation23_spill]] %s4871_s0 }
   0x2   :  { %4901 = sst [smem:[#allocation24_spill]] %s4872_s1 }
   0x3   :  { %4902 = sst [smem:[#allocation25_spill]] %s4873_s2 }
   0x4   :  { %4903 = sst [smem:[#allocation26_spill]] %s4874_s3 }
   0x5   :  { %4904 = sst [smem:[#allocation27_spill]] %s4875_s4 }
   0x6   :  { %4905 = sst [smem:[#allocation28_spill]] %s4876_s5 }
   0x7   :  { %4906 = sst [smem:[#allocation29_spill]] %s4877_s6 }
   0x8   :  { %4907 = sst [smem:[#allocation30_spill]] %s4878_s7 }
   0x9   :  { %4908 = sst [smem:[#allocation31_spill]] %s4879_s8 }
   0xa   :  { %4909 = sst [smem:[#allocation32_spill]] %s4895_s24 }
   0xb   :  { %30 = vsyncpa [#allocation3], 0 }
   0xc   :  { %31 = vsyncpa [#allocation6], 0 }
   0xd   :  { %32 = vsyncpa [#allocation9], 0 }
   0xe   :  { %33 = vsyncpa [#allocation12], 0 }
   0xf   :  { %34 = vsyncpa [#allocation15], 0 }
  0x10   :  { %35 = vsyncpa [#allocation4], 0  ;;  %s4009_s5 = smov [#allocation5]   ;;  %s4010_s27 = smov [#allocation8]  }
  0x11   :  { %s60_s26 = sshll.u32 %s4009_s5, 4  ;;  %s82_s28 = sshll.u32 %s4010_s27, 4  ;;  %s61_s26 = int_to_ptr.vmem [resolvable:$true] %s60_s26  ;;  %s83_s28 = int_to_ptr.vmem [resolvable:$true] %s82_s28 }
  0x12   :  { %s3825_s6 = scalar_lea.vmem %s61_s26, 16  ;;  %s3829_s2 = scalar_lea.vmem %s61_s26, 32 }
  0x13   :  { %p3826_p0 = scmp.ne.s32.totalorder %s61_s26, %s3825_s6  ;;  %p3830_p1 = scmp.lt.s32.totalorder %s61_s26, %s61_s26 }
  0x14   :  { %p3831_p2 = scmp.lt.s32.totalorder %s3829_s2, %s3825_s6 }
  0x16   :  { %p3832_p3 = por %p3831_p2, %p3830_p1 }
  0x18   :  { %p3833_p4 = pnand %p3832_p3, %p3826_p0 }
  0x1a   :  { %3836 = shalt.err (!%p3833_p4)
}
  0x1b   :  { %s4910_s7 = sld [smem:[#allocation27_spill]]  ;;  %s3845_s30 = scalar_lea.vmem %s83_s28, 16 }
  0x1c   :  { %p3846_p5 = scmp.ne.s32.totalorder %s83_s28, %s3845_s30  ;;  %s3849_s3 = scalar_lea.vmem %s83_s28, 32 }
  0x1d   :  { %p3850_p6 = scmp.lt.s32.totalorder %s83_s28, %s83_s28  ;;  %p3851_p7 = scmp.lt.s32.totalorder %s3849_s3, %s3845_s30 }
  0x1f   :  { %p3852_p8 = por %p3851_p7, %p3850_p6 }
  0x21   :  { %63 = dma.hbm_to_vmem [thread:$0]  %s4910_s7, 16, %s61_s26, [#allocation6]  }
  0x22   :  { %p3853_p9 = pnand %p3852_p8, %p3846_p5 }
  0x24   :  { %3856 = shalt.err (!%p3853_p9)
}
  0x25   :  { %s4911_s4 = sld [smem:[#allocation29_spill]]  ;;  %s4011_s1 = smov [#allocation11]  }
  0x26   :  { %s119_s5 = sshll.u32 %s4011_s1, 4  ;;  %s4012_s27 = smov [#allocation2]   ;;  %s120_s5 = int_to_ptr.vmem [resolvable:$true] %s119_s5 }
  0x27   :  { %s47_s6 = sshll.u32 %s4012_s27, 4  ;;  %s3865_s2 = scalar_lea.vmem %s120_s5, 48  ;;  %s48_s6 = int_to_ptr.vmem [resolvable:$true] %s47_s6 }
  0x28   :  { %p3866_p10 = scmp.ne.s32.totalorder %s120_s5, %s3865_s2  ;;  %s3869_s26 = scalar_lea.vmem %s120_s5, 64 }
  0x29   :  { %p3870_p11 = scmp.lt.s32.totalorder %s120_s5, %s120_s5  ;;  %p3871_p12 = scmp.lt.s32.totalorder %s3869_s26, %s3865_s2 }
  0x2b   :  { %85 = dma.hbm_to_vmem [thread:$0]  %s4911_s4, 16, %s83_s28, [#allocation9]  }
  0x2c   :  { %p3872_p13 = por %p3871_p12, %p3870_p11 }
  0x2e   :  { %p3873_p0 = pnand %p3872_p13, %p3866_p10 }
  0x30   :  { %3876 = shalt.err (!%p3873_p0)
}
  0x31   :  { %s4013_s29 = smov 16   ;;  %s4014_s0 = smov 1  }
  0x32   :  { %125 = dma.hbm_to_vmem [thread:$0]  %s4887_s16, 48, %s120_s5, [#allocation12], %s4013_s29, %s4013_s29, %s4014_s0  }
  0x33   :  { %s3885_s30 = scalar_lea.vmem %s48_s6, 256  ;;  %p3890_p2 = scmp.lt.s32.totalorder %s48_s6, %s48_s6 }
  0x34   :  { %p3886_p1 = scmp.ne.s32.totalorder %s48_s6, %s3885_s30  ;;  %p3891_p3 = scmp.lt.s32.totalorder %s3885_s30, %s3885_s30 }
  0x36   :  { %p3892_p4 = por %p3891_p3, %p3890_p2 }
  0x38   :  { %p3893_p5 = pnand %p3892_p4, %p3886_p1 }
  0x3a   :  { %3896 = shalt.err (!%p3893_p5)
}
  0x3b   :  { %s4015_s3 = smov 64   ;;  %s4016_s25 = smov 4  }
  0x3c   :  { %s4912_s1 = sld [smem:[#allocation26_spill]]  ;;  %s4017_s27 = smov [#allocation7]  }
  0x3d   :  { %s69_s2 = sshll.u32 %s4017_s27, 4  ;;  %s4018_s26 = smov [#allocation10]   ;;  %s70_s2 = int_to_ptr.vmem [resolvable:$true] %s69_s2 }
  0x3e   :  { %s105_s24 = sshll.u32 %s4018_s26, 4  ;;  %s3905_s16 = scalar_lea.vmem %s70_s2, 256  ;;  %s106_s24 = int_to_ptr.vmem [resolvable:$true] %s105_s24 }
  0x3f   :  { %p3906_p6 = scmp.ne.s32.totalorder %s70_s2, %s3905_s16  ;;  %p3910_p7 = scmp.lt.s32.totalorder %s70_s2, %s70_s2 }
  0x40   :  { %p3911_p8 = scmp.lt.s32.totalorder %s3905_s16, %s3905_s16 }
  0x42   :  { %53 = dma.hbm_to_vmem [thread:$0]  %s4912_s1, 256, %s48_s6, [#allocation3], %s4015_s3, %s4015_s3, %s4016_s25  }
  0x43   :  { %p3912_p9 = por %p3911_p8, %p3910_p7 }
  0x45   :  { %p3913_p10 = pnand %p3912_p9, %p3906_p6 }
  0x47   :  { %3916 = shalt.err (!%p3913_p10)
}
  0x48   :  { %s4913_s7 = sld [smem:[#allocation28_spill]]  ;;  %s3925_s30 = scalar_lea.vmem %s106_s24, 48 }
  0x49   :  { %p3926_p11 = scmp.ne.s32.totalorder %s106_s24, %s3925_s30  ;;  %s3929_s6 = scalar_lea.vmem %s106_s24, 64 }
  0x4a   :  { %p3930_p12 = scmp.lt.s32.totalorder %s106_s24, %s106_s24  ;;  %p3931_p13 = scmp.lt.s32.totalorder %s3929_s6, %s3925_s30 }
  0x4c   :  { %p3932_p0 = por %p3931_p13, %p3930_p12 }
  0x4e   :  { %75 = dma.hbm_to_vmem [thread:$0]  %s4913_s7, 256, %s70_s2, [#allocation6], %s4015_s3, %s4015_s3, %s4016_s25  }
  0x4f   :  { %p3933_p1 = pnand %p3932_p0, %p3926_p11 }
  0x51   :  { %3936 = shalt.err (!%p3933_p1)
}
  0x52   :  { %111 = dma.hbm_to_vmem [thread:$0]  %s4885_s14, 48, %s106_s24, [#allocation9], %s4013_s29, %s4013_s29, %s4014_s0  }
  0x53   :  { %s4019_s1 = smov [#allocation13]   ;;  %s4020_s26 = smov [#allocation14]  }
  0x54   :  { %s138_s27 = sshll.u32 %s4019_s1, 4  ;;  %s150_s16 = sshll.u32 %s4020_s26, 4  ;;  %s139_s27 = int_to_ptr.vmem [resolvable:$true] %s138_s27  ;;  %s151_s16 = int_to_ptr.vmem [resolvable:$true] %s150_s16 }
  0x55   :  { %s3945_s3 = scalar_lea.vmem %s139_s27, 32  ;;  %p3950_p3 = scmp.lt.s32.totalorder %s139_s27, %s139_s27 }
  0x56   :  { %p3946_p2 = scmp.ne.s32.totalorder %s139_s27, %s3945_s3  ;;  %p3951_p4 = scmp.lt.s32.totalorder %s3945_s3, %s3945_s3 }
  0x58   :  { %p3952_p5 = por %p3951_p4, %p3950_p3 }
  0x5a   :  { %p3953_p6 = pnand %p3952_p5, %p3946_p2 }
  0x5c   :  { %3956 = shalt.err (!%p3953_p6)
}
  0x5d   :  { %141 = dma.hbm_to_vmem [thread:$0]  %s4891_s20, 32, %s139_s27, [#allocation12]  }
  0x5e   :  { %s3965_s5 = scalar_lea.vmem %s151_s16, 16  ;;  %s3969_s14 = scalar_lea.vmem %s151_s16, 32 }
  0x5f   :  { %p3966_p7 = scmp.ne.s32.totalorder %s151_s16, %s3965_s5  ;;  %p3970_p8 = scmp.lt.s32.totalorder %s151_s16, %s151_s16 }
  0x60   :  { %p3971_p9 = scmp.lt.s32.totalorder %s3969_s14, %s3965_s5 }
  0x62   :  { %p3972_p10 = por %p3971_p9, %p3970_p8 }
  0x64   :  { %p3973_p11 = pnand %p3972_p10, %p3966_p7 }
  0x66   :  { %3976 = shalt.err (!%p3973_p11)
}
  0x67   :  { %153 = dma.hbm_to_vmem [thread:$0]  %s4893_s22, 16, %s151_s16, [#allocation15]  }
  0x68   :  { %3997 = dma.done.wait [#allocation3], 256  }
  0x69   :  { %3998 = vsyncadd [#allocation3], 4294967040 }
  0x6a   :  { %3999 = dma.done.wait [#allocation6], 272  }
  0x6b   :  { %4000 = vsyncadd [#allocation6], 4294967024 }
  0x6c   :  { %4001 = dma.done.wait [#allocation9], 64  }
  0x6d   :  { %4002 = vsyncadd [#allocation9], 4294967232 }
  0x6e   :  { %4003 = dma.done.wait [#allocation12], 80  }
  0x6f   :  { %4004 = vsyncadd [#allocation12], 4294967216 }
  0x70   :  { %4005 = dma.done.wait [#allocation15], 16  }
  0x71   :  { %4006 = vsyncadd [#allocation15], 4294967280  ;;  %v4021_v0 = vmov 0.0   ;;  %vm4022_vm0 = vmmov 0   ;;  %v3626_v1 = vld [vmem:[#allocation2 + $0x8] sm:$0xff]   ;;  %v3627_v2 = vld [vmem:[#allocation2] sm:$0xff]  }
  0x72   :  { %3250 = vmatprep.subr.bf16.mxu0 %v4021_v0  ;;  %3254 = vmatprep.mubr.msk.bf16.mxu0 %vm4022_vm0, %v4021_v0  ;;  %s4914_s28 = sld [smem:[#allocation23_spill]]  ;;  %vm213_vm1 = vcmask 261120   ;;  %v3628_v6 = vld [vmem:[#allocation7 + $0x8] sm:$0xff]   ;;  %v3629_v7 = vld [vmem:[#allocation7] sm:$0xff]   ;;  %v2946_v8 = vld [vmem:[#allocation5] ss:$0 sm:$0xff] }
  0x73   :  { %3258 = vmatprep.subr.bf16.mxu1 %v4021_v0  ;;  %3262 = vmatprep.mubr.msk.bf16.mxu1 %vm4022_vm0, %v4021_v0  ;;  %s4915_s4 = sld [smem:[#allocation30_spill]]  ;;  %v2950_v20 = vld [vmem:[#allocation8] ss:$0 sm:$0xff]  ;;  %vm434_vm2 = vcmask 64512   ;;  %s4023_s25 = smov 104   ;;  %vm540_vm3 = vcmask 523264  }
  0x74   :  { %3251 = vmatpush3.bf16.msra.mxu0 %v3626_v1  ;;  %3259 = vmatpush3.bf16.msra.mxu1 %v3628_v6  ;;  %s4916_s3 = sld [smem:[#allocation31_spill]]  ;;  %s4024_s2 = smov 56   ;;  %vm748_vm4 = vcmask 130048   ;;  %vm751_vm5 = vcmask 195584   ;;  %vm2876_vm6 = vcmask 392192  }
  0x75   :  { %3252 = vmatprep.subr.bf16.mxu0 %v4021_v0  ;;  %3260 = vmatprep.subr.bf16.mxu1 %v4021_v0  ;;  %s4025_s5 = smov 80   ;;  %s4026_s14 = smov 120  }
  0x76   :  { %s4917_s20 = sld [smem:[#allocation24_spill]]  ;;  %s4027_s7 = smov 112  }
  0x77   :  { %s4028_s27 = smov 8   ;;  %s4029_s26 = smov 24  }
  0x78   :  { %v187_v3 = vld [vmem:[%s4914_s28] sm:$0xff]  ;;  %v188_v4 = vld [vmem:[%s4914_s28 + $0x8] sm:$0xff]  ;;  %3253 = vmatpush3.bf16.msra.mxu0 %v3627_v2  ;;  %3261 = vmatpush3.bf16.msra.mxu1 %v3629_v7  ;;  %s4918_s28 = sld [smem:[#allocation25_spill]] }
  0x79   :  { %v193_v5 = vpack.c.bf16 %v188_v4, %v187_v3  ;;  %3266 = vmatprep.subr.bf16.mxu0 %v4021_v0  ;;  %v3630_v18 = vld [vmem:[%s4915_s4 + $0x8] sm:$0xff]   ;;  %v3631_v19 = vld [vmem:[%s4915_s4] sm:$0xff]  }
  0x7a   :  { %v2954_v31 = vld [vmem:[%s4916_s3] ss:$0 sm:$0xff] }
  0x7b   :  { %3255 = vmatmul.mubr.msk.bf16.vlgmr.msra.gmra.mxu0 %vm213_vm1, %v193_v5 }
  0x7c   :  { %3270 = vmatprep.mubr.msk.bf16.mxu0 %vm4022_vm0, %v4021_v0  ;;  %3267 = vmatpush3.bf16.msra.mxu0 %v3630_v18  ;;  %v4269_v61 = vld [vmem:[%s4917_s20] sm:$0xff]  ;;  %v4274_v1 = vld [vmem:[%s4917_s20 + $0x18] sm:$0xff]  ;;  %v4280_v6 = vld [vmem:[%s4917_s20 + $0x8] sm:$0xff] }
  0x7d   :  { %3268 = vmatprep.subr.bf16.mxu0 %v4021_v0 }
  0x80   :  { %3269 = vmatpush3.bf16.msra.mxu0 %v3631_v19  ;;  %v4296_v19 = vld [vmem:[%s4917_s20 + $0x20] sm:$0xff] }
 0x13b   :  { %v251_v9 = vpop.f32.mrf.mxu0 }
 0x13c   :  { %v252_v11 = vadd.f32 %v2946_v8, %v251_v9 }
 0x13d   :  { %v3256_v10 = vpop.f32.mrf.mxu0 }
 0x13e   :  { %v258_v15 = vmax.f32 %v252_v11, 0.0  ;;  %v4287_v10 = vld [vmem:[%s4917_s20 + $0x10] sm:$0xff] }
 0x13f   :  { %v254_v12 = vpop.f32.mrf.mxu0 }
 0x140   :  { %v255_v13 = vadd.f32 %v2946_v8, %v254_v12 }
 0x141   :  { %v3257_v14 = vpop.f32.mrf.mxu0 }
 0x142   :  { %v259_v16 = vmax.f32 %v255_v13, 0.0 }
 0x144   :  { %v264_v17 = vpack.c.bf16 %v259_v16, %v258_v15 }
 0x146   :  { %3263 = vmatmul.mubr.msk.bf16.vlgmr.msra.gmra.mxu1 %vm213_vm1, %v264_v17 }
 0x206   :  { %v321_v21 = vpop.f32.mrf.mxu1 }
 0x207   :  { %v4214_v23 = vadd.f32 %v2950_v20, %v321_v21 }
 0x208   :  { %v3264_v22 = vpop.f32.mrf.mxu1 }
 0x209   :  { %v328_v27 = vmax.f32 %v4214_v23, 0.0  ;;  %v4302_v22 = vld [vmem:[%s4917_s20 + $0x28] sm:$0xff] }
 0x20a   :  { %v324_v24 = vpop.f32.mrf.mxu1 }
 0x20b   :  { %v4216_v25 = vadd.f32 %v2950_v20, %v324_v24 }
 0x20c   :  { %v3265_v26 = vpop.f32.mrf.mxu1 }
 0x20d   :  { %v329_v28 = vmax.f32 %v4216_v25, 0.0  ;;  %v3634_v25 = vld [vmem:[%s4884_s13 + $0x8] sm:$0xff]  }
 0x20f   :  { %v334_v29 = vpack.c.bf16 %v329_v28, %v328_v27 }
 0x211   :  { %3271 = vmatmul.mubr.msk.bf16.vlgmr.msra.gmra.mxu0 %vm213_vm1, %v334_v29 }
 0x2d1   :  { %v391_v30 = vpop.f32.mrf.mxu0 }
 0x2d2   :  { %v392_v34 = vadd.f32 %v2954_v31, %v391_v30 }
 0x2d3   :  { %v3272_v32 = vpop.f32.mrf.mxu0 }
 0x2d4   :  { %v4313_v32 = vld [vmem:[%s4917_s20 + $0x38] sm:$0xff] }
 0x2d5   :  { %v394_v33 = vpop.f32.mrf.mxu0 }
 0x2d6   :  { %v395_v35 = vadd.f32 %v2954_v31, %v394_v33  ;;  %v4308_v31 = vld [vmem:[%s4917_s20 + $0x30] sm:$0xff] }
 0x2d7   :  { %v3273_v36 = vpop.f32.mrf.mxu0 }
 0x2d8   :  { %v3546_v37 = vpack.i.bf16 %v395_v35, %v392_v34  ;;  %v4228_v38 = vpack.c.bf16 %v395_v35, %v392_v34 }
 0x2da   :  { %3547 = vrot.lane.b32.xlu1 %v3546_v37, %s4023_s25  ;;  %3537 = vrot.lane.b32.xlu0 %v3546_v37, %s4024_s2 }
 0x2db   :  { %3282 = vmatprep.mubr.msk.bf16.mxu1 %vm434_vm2, %v4228_v38 }
 0x2de   :  { %3542 = vrot.lane.b32.xlu0 %v3546_v37, %s4025_s5 }
 0x34c   :  { %v3548_v39 = vpop.permute.xlu1 %3547  ;;  %v3538_v40 = vpop.permute.xlu0 %3537 }
 0x34d   :  { %v3540_v41 = vunpack.i.h.bf16 %v3538_v40  ;;  %v3539_v42 = vunpack.i.l.bf16 %v3538_v40  ;;  %v3550_v43 = vunpack.i.h.bf16 %v3548_v39  ;;  %v3549_v44 = vunpack.i.l.bf16 %v3548_v39 }
 0x34f   :  { %v4235_v45 = vpack.c.bf16 %v3540_v41, %v3539_v42  ;;  %v4241_v50 = vpack.c.bf16 %v3550_v43, %v3549_v44 }
 0x350   :  { %v3543_v46 = vpop.permute.xlu0 %3542 }
 0x351   :  { %v3545_v47 = vunpack.i.h.bf16 %v3543_v46  ;;  %v3544_v48 = vunpack.i.l.bf16 %v3543_v46  ;;  %432 = vrot.lane.b32.xlu1 %v4235_v45, %s4026_s14 }
 0x353   :  { %v4239_v49 = vpack.c.bf16 %v3545_v47, %v3544_v48 }
 0x355   :  { %430 = vrot.lane.b32.xlu0 %v4239_v49, %s4026_s14  ;;  %428 = vrot.lane.b32.xlu1 %v4241_v50, %s4026_s14 }
 0x359   :  { %426 = vrot.lane.b32.xlu0 %v4228_v38, %s4026_s14 }
 0x3c3   :  { %v433_v51 = vpop.permute.xlu1 %432 }
 0x3c4   :  { %3500 = vmatprep.subr.msk.bf16.mxu1 %vm434_vm2, %v433_v51  ;;  %v457_v52 = vsel %vm434_vm2, %v433_v51, 0 }
 0x3c5   :  { %3275 = vmatpush3.bf16.xpose.msra.mxu1 %v457_v52 }
 0x3c7   :  { %v431_v53 = vpop.permute.xlu0 %430  ;;  %v429_v55 = vpop.permute.xlu1 %428 }
 0x3c8   :  { %3501 = vmatprep.subr.msk.bf16.mxu1 %vm434_vm2, %v431_v53  ;;  %v454_v54 = vsel %vm434_vm2, %v431_v53, 0  ;;  %v451_v56 = vsel %vm434_vm2, %v429_v55, 0 }
 0x3cb   :  { %v427_v57 = vpop.permute.xlu0 %426 }
 0x3cc   :  { %v448_v58 = vsel %vm434_vm2, %v427_v57, 0 }
 0x3cd   :  { %3277 = vmatpush3.bf16.xpose.msra.mxu1 %v454_v54 }
 0x3ce   :  { %3502 = vmatprep.subr.msk.bf16.mxu1 %vm434_vm2, %v429_v55 }
 0x3d5   :  { %3279 = vmatpush3.bf16.xpose.msra.mxu1 %v451_v56 }
 0x3d6   :  { %3503 = vmatprep.subr.msk.bf16.mxu1 %vm434_vm2, %v427_v57 }
 0x3dd   :  { %3281 = vmatpush3.bf16.xpose.msra.mxu1 %v448_v58 }
 0x3de   :  { %3322 = vmatprep.subr.bf16.mxu1 %v4021_v0 }
 0x3e4   :  { %3283 = vmatmul.mubr.msk.bf16.vlgmr.msra.gmra.mxu1 %vm434_vm2, %v4241_v50 }
 0x3e5   :  { %3286 = vmatprep.mubr.msk.bf16.mxu1 %vm434_vm2, %v4239_v49 }
 0x3ec   :  { %3287 = vmatmul.mubr.msk.bf16.gmra.mxu1 %vm434_vm2, %v4235_v45 }
 0x3ed   :  { %3338 = vmatprep.mubr.msk.bf16.mxu1 %vm4022_vm0, %v4021_v0 }
 0x4a4   :  { %v3284_v59 = vpop.f32.mrf.mxu1 }
 0x4a5   :  { %v526_v4 = vmul.f32 0.35355338, %v3284_v59 }
 0x4a6   :  { %v493_v60 = vpop.f32.mrf.mxu1 }
 0x4a7   :  { %v524_v62 = vmul.f32 0.35355338, %v493_v60  ;;  %v534_v14 = vadd.f32 %v526_v4, %v4287_v10 }
 0x4a8   :  { %v3285_v63 = vpop.f32.mrf.mxu1 }
 0x4a9   :  { %v527_v2 = vmul.f32 0.35355338, %v3285_v63  ;;  %v532_v3 = vadd.f32 %v524_v62, %v4269_v61  ;;  %v547_v21 = vsel %vm540_vm3, %v534_v14, -inf }
 0x4aa   :  { %v496_v5 = vpop.f32.mrf.mxu1 }
 0x4ab   :  { %v525_v7 = vmul.f32 0.35355338, %v496_v5  ;;  %v541_v8 = vsel %vm540_vm3, %v532_v3, -inf  ;;  %v535_v9 = vadd.f32 %v527_v2, %v4274_v1 }
 0x4ac   :  { %v3288_v11 = vpop.f32.mrf.mxu1  ;;  %542 = vmax.xlane.f32.xlu1 %v541_v8 }
 0x4ad   :  { %v533_v12 = vadd.f32 %v525_v7, %v4280_v6  ;;  %v550_v17 = vsel %vm540_vm3, %v535_v9, -inf  ;;  %v530_v24 = vmul.f32 0.35355338, %v3288_v11 }
 0x4ae   :  { %v509_v13 = vpop.f32.mrf.mxu1 }
 0x4af   :  { %v528_v15 = vmul.f32 0.35355338, %v509_v13  ;;  %v544_v16 = vsel %vm540_vm3, %v533_v12, -inf  ;;  %v538_v36 = vadd.f32 %v530_v24, %v4308_v31 }
 0x4b0   :  { %v3289_v18 = vpop.f32.mrf.mxu1  ;;  %545 = vmax.xlane.f32.xlu0 %v544_v16  ;;  %551 = vmax.xlane.f32.xlu1 %v550_v17 }
 0x4b1   :  { %v531_v26 = vmul.f32 0.35355338, %v3289_v18  ;;  %v536_v30 = vadd.f32 %v528_v15, %v4296_v19  ;;  %v559_v39 = vsel %vm540_vm3, %v538_v36, -inf }
 0x4b2   :  { %v512_v20 = vpop.f32.mrf.mxu1 }
 0x4b3   :  { %v529_v29 = vmul.f32 0.35355338, %v512_v20  ;;  %v553_v34 = vsel %vm540_vm3, %v536_v30, -inf  ;;  %v539_v37 = vadd.f32 %v531_v26, %v4313_v32 }
 0x4b4   :  { %548 = vmax.xlane.f32.xlu0 %v547_v21 }
 0x4b5   :  { %v537_v33 = vadd.f32 %v529_v29, %v4302_v22  ;;  %v562_v40 = vsel %vm540_vm3, %v539_v37, -inf }
 0x4b7   :  { %v556_v35 = vsel %vm540_vm3, %v537_v33, -inf }
 0x4b8   :  { %554 = vmax.xlane.f32.xlu0 %v553_v34  ;;  %557 = vmax.xlane.f32.xlu1 %v556_v35 }
 0x4bc   :  { %560 = vmax.xlane.f32.xlu0 %v559_v39  ;;  %563 = vmax.xlane.f32.xlu1 %v562_v40 }
 0x4cd   :  { %637 = vrot.lane.b32.xlu1 %v4239_v49, %s4027_s7 }
 0x4d2   :  { %639 = vrot.lane.b32.xlu0 %v4235_v45, %s4027_s7 }
 0x535   :  { %v543_v41 = vpop.xlane.xlu1 %542 }
 0x536   :  { %v565_v47 = vsub.f32 %v532_v3, %v543_v41 }
 0x538   :  { %v573_v54 = vmul.f32 1.442695, %v565_v47 }
 0x539   :  { %v546_v42 = vpop.xlane.xlu0 %545  ;;  %v552_v43 = vpop.xlane.xlu1 %551 }
 0x53a   :  { %v566_v44 = vsub.f32 %v533_v12, %v546_v42  ;;  %v568_v46 = vsub.f32 %v535_v9, %v552_v43 }
 0x53c   :  { %v579_v48 = vmul.f32 1.442695, %v568_v46  ;;  %v575_v51 = vmul.f32 1.442695, %v566_v44 }
 0x53d   :  { %v549_v52 = vpop.xlane.xlu0 %548 }
 0x53e   :  { %v567_v53 = vsub.f32 %v534_v14, %v549_v52  ;;  %3689 = vpow2.f32 %v579_v48 }
 0x53f   :  { %3691 = vpow2.f32 %v575_v51 }
 0x540   :  { %v577_v55 = vmul.f32 1.442695, %v567_v53 }
 0x541   :  { %v555_v56 = vpop.xlane.xlu0 %554  ;;  %v558_v57 = vpop.xlane.xlu1 %557 }
 0x542   :  { %3693 = vpow2.f32 %v577_v55  ;;  %v569_v49 = vsub.f32 %v536_v30, %v555_v56  ;;  %v570_v45 = vsub.f32 %v537_v33, %v558_v57 }
 0x543   :  { %3695 = vpow2.f32 %v573_v54 }
 0x544   :  { %v581_v63 = vmul.f32 1.442695, %v569_v49  ;;  %v583_v4 = vmul.f32 1.442695, %v570_v45 }
 0x545   :  { %v561_v58 = vpop.xlane.xlu0 %560  ;;  %v564_v59 = vpop.xlane.xlu1 %563 }
 0x546   :  { %v571_v60 = vsub.f32 %v538_v36, %v561_v58  ;;  %v572_v62 = vsub.f32 %v539_v37, %v564_v59 }
 0x548   :  { %v585_v2 = vmul.f32 1.442695, %v571_v60  ;;  %v587_v3 = vmul.f32 1.442695, %v572_v62 }
 0x549   :  { %v640_v5 = vpop.permute.xlu0 %639  ;;  %v638_v7 = vpop.permute.xlu1 %637 }
 0x54a   :  { %3697 = vpow2.f32 %v585_v2  ;;  %3290 = vmatprep.subr.bf16.mxu0 %v640_v5  ;;  %v3632_v2 = vld [vmem:[%s4880_s9 + $0x8] sm:$0xff]  }
 0x54b   :  { %3699 = vpow2.f32 %v587_v3  ;;  %3291 = vmatpush3.bf16.msra.mxu0 %v640_v5  ;;  %v3690_v8 = vpop.eup %3689 }
 0x54c   :  { %3701 = vpow2.f32 %v581_v63  ;;  %3292 = vmatprep.subr.bf16.mxu0 %v638_v7  ;;  %v598_v9 = vsel %vm540_vm3, %v3690_v8, 0.0  ;;  %v3692_v11 = vpop.eup %3691 }
 0x54d   :  { %3703 = vpow2.f32 %v583_v4  ;;  %599 = vadd.xlane.f32.xlu1 %v598_v9  ;;  %v592_v15 = vsel %vm540_vm3, %v3692_v11, 0.0 }
 0x54f   :  { %v3694_v12 = vpop.eup %3693  ;;  %3293 = vmatpush3.bf16.msra.mxu0 %v638_v7 }
 0x550   :  { %v595_v13 = vsel %vm540_vm3, %v3694_v12, 0.0  ;;  %v3696_v14 = vpop.eup %3695 }
 0x551   :  { %596 = vadd.xlane.f32.xlu0 %v595_v13  ;;  %593 = vadd.xlane.f32.xlu1 %v592_v15  ;;  %v589_v16 = vsel %vm540_vm3, %v3696_v14, 0.0 }
 0x555   :  { %590 = vadd.xlane.f32.xlu0 %v589_v16 }
 0x557   :  { %v3698_v17 = vpop.eup %3697 }
 0x558   :  { %v3700_v18 = vpop.eup %3699  ;;  %v607_v20 = vsel %vm540_vm3, %v3698_v17, 0.0 }
 0x559   :  { %v3702_v21 = vpop.eup %3701  ;;  %608 = vadd.xlane.f32.xlu0 %v607_v20  ;;  %v610_v24 = vsel %vm540_vm3, %v3700_v18, 0.0 }
 0x55a   :  { %v3704_v26 = vpop.eup %3703  ;;  %611 = vadd.xlane.f32.xlu1 %v610_v24  ;;  %v601_v29 = vsel %vm540_vm3, %v3702_v21, 0.0 }
 0x55b   :  { %v604_v30 = vsel %vm540_vm3, %v3704_v26, 0.0 }
 0x55d   :  { %602 = vadd.xlane.f32.xlu0 %v601_v29 }
 0x55e   :  { %605 = vadd.xlane.f32.xlu1 %v604_v30 }
 0x56f   :  { %635 = vrot.lane.b32.xlu1 %v4241_v50, %s4027_s7 }
 0x573   :  { %633 = vrot.lane.b32.xlu0 %v4228_v38, %s4027_s7 }
 0x5d6   :  { %v600_v33 = vpop.xlane.xlu1 %599 }
 0x5da   :  { %v597_v34 = vpop.xlane.xlu0 %596  ;;  %v594_v35 = vpop.xlane.xlu1 %593 }
 0x5db   :  { %3705 = vrcp.f32 %v594_v35 }
 0x5dc   :  { %3707 = vrcp.f32 %v597_v34 }
 0x5de   :  { %v591_v36 = vpop.xlane.xlu0 %590 }
 0x5df   :  { %3709 = vrcp.f32 %v591_v36 }
 0x5e0   :  { %3711 = vrcp.f32 %v600_v33 }
 0x5e2   :  { %v609_v37 = vpop.xlane.xlu0 %608 }
 0x5e3   :  { %v612_v39 = vpop.xlane.xlu1 %611  ;;  %3713 = vrcp.f32 %v609_v37 }
 0x5e4   :  { %3715 = vrcp.f32 %v612_v39 }
 0x5e6   :  { %v603_v40 = vpop.xlane.xlu0 %602 }
 0x5e7   :  { %3717 = vrcp.f32 %v603_v40  ;;  %v606_v41 = vpop.xlane.xlu1 %605 }
 0x5e8   :  { %3719 = vrcp.f32 %v606_v41  ;;  %v3706_v50 = vpop.eup %3705 }
 0x5e9   :  { %v3708_v42 = vpop.eup %3707  ;;  %v616_v48 = vmul.f32 %v3706_v50, %v3692_v11  ;;  %v2966_v50 = vld [vmem:[%s4881_s10] ss:$0 sm:$0xff] }
 0x5ea   :  { %v634_v46 = vpop.permute.xlu0 %633  ;;  %v618_v51 = vmul.f32 %v3708_v42, %v3694_v12 }
 0x5eb   :  { %v636_v43 = vpop.permute.xlu1 %635 }
 0x5ec   :  { %v3710_v38 = vpop.eup %3709  ;;  %3294 = vmatprep.subr.bf16.mxu0 %v636_v43 }
 0x5ed   :  { %v3712_v44 = vpop.eup %3711  ;;  %3295 = vmatpush3.bf16.msra.mxu0 %v636_v43  ;;  %v614_v47 = vmul.f32 %v3710_v38, %v3696_v14 }
 0x5ee   :  { %3296 = vmatprep.subr.bf16.mxu0 %v634_v46  ;;  %v620_v53 = vmul.f32 %v3712_v44, %v3690_v8  ;;  %v3633_v8 = vld [vmem:[%s4880_s9] sm:$0xff]  }
 0x5ef   :  { %v629_v52 = vpack.c.bf16 %v616_v48, %v614_v47 }
 0x5f0   :  { %v3714_v54 = vpop.eup %3713  ;;  %v630_v55 = vpack.c.bf16 %v620_v53, %v618_v51 }
 0x5f1   :  { %3297 = vmatpush3.bf16.msra.mxu0 %v634_v46  ;;  %3298 = vmatprep.mubr.msk.bf16.mxu0 %vm540_vm3, %v629_v52  ;;  %v3716_v56 = vpop.eup %3715  ;;  %v626_v59 = vmul.f32 %v3714_v54, %v3698_v17 }
 0x5f2   :  { %3306 = vmatprep.subr.bf16.mxu0 %v4021_v0  ;;  %v628_v60 = vmul.f32 %v3716_v56, %v3700_v18 }
 0x5f4   :  { %v3718_v57 = vpop.eup %3717  ;;  %3299 = vmatmul.mubr.msk.bf16.vlgmr.msra.gmra.mxu0 %vm540_vm3, %v630_v55  ;;  %v632_v63 = vpack.c.bf16 %v628_v60, %v626_v59  ;;  %v3636_v60 = vld [vmem:[%s4886_s15 + $0x38] sm:$0xff]  }
 0x5f5   :  { %v3720_v49 = vpop.eup %3719  ;;  %v622_v45 = vmul.f32 %v3718_v57, %v3702_v21  ;;  %3307 = vmatpush3.bf16.msra.mxu0 %v3632_v2  ;;  %3323 = vmatpush3.bf16.msra.mxu1 %v3636_v60  ;;  %v3639_v2 = vld [vmem:[%s4886_s15 + $0x20] sm:$0xff]  }
 0x5f6   :  { %v624_v58 = vmul.f32 %v3720_v49, %v3704_v26  ;;  %3308 = vmatprep.subr.bf16.mxu0 %v4021_v0  ;;  %3324 = vmatprep.subr.bf16.mxu1 %v4021_v0 }
 0x5f8   :  { %v631_v62 = vpack.c.bf16 %v624_v58, %v622_v45 }
 0x5f9   :  { %3309 = vmatpush3.bf16.msra.mxu0 %v3633_v8 }
 0x5fa   :  { %3302 = vmatprep.mubr.msk.bf16.mxu0 %vm540_vm3, %v631_v62  ;;  %3314 = vmatprep.subr.bf16.mxu0 %v4021_v0  ;;  %v3637_v62 = vld [vmem:[%s4886_s15 + $0x30] sm:$0xff]  }
 0x5fb   :  { %3325 = vmatpush3.bf16.msra.mxu1 %v3637_v62  ;;  %v3644_v62 = vld [vmem:[%s4915_s4 + $0x18] sm:$0xff]  }
 0x5fc   :  { %3303 = vmatmul.mubr.msk.bf16.gmra.mxu0 %vm540_vm3, %v632_v63  ;;  %v3638_v63 = vld [vmem:[%s4886_s15 + $0x28] sm:$0xff]   ;;  %3326 = vmatprep.subr.bf16.mxu1 %v4021_v0 }
 0x5fd   :  { %3310 = vmatprep.mubr.msk.bf16.mxu0 %vm4022_vm0, %v4021_v0 }
 0x5ff   :  { %3327 = vmatpush3.bf16.msra.mxu1 %v3638_v63  ;;  %v3645_v63 = vld [vmem:[%s4915_s4 + $0x10] sm:$0xff]  }
 0x600   :  { %3328 = vmatprep.subr.bf16.mxu1 %v4021_v0 }
 0x603   :  { %3329 = vmatpush3.bf16.msra.mxu1 %v3639_v2 }
 0x604   :  { %3330 = vmatprep.subr.bf16.mxu1 %v4021_v0 }
 0x6b4   :  { %v3300_v3 = vpop.f32.mrf.mxu0 }
 0x6b6   :  { %v691_v4 = vpop.f32.mrf.mxu0 }
 0x6b8   :  { %v3301_v5 = vpop.f32.mrf.mxu0 }
 0x6b9   :  { %v3551_v7 = vpack.i.bf16 %v3301_v5, %v3300_v3  ;;  %v3640_v3 = vld [vmem:[%s4886_s15 + $0x18] sm:$0xff]  }
 0x6ba   :  { %v694_v9 = vpop.f32.mrf.mxu0  ;;  %3331 = vmatpush3.bf16.msra.mxu1 %v3640_v3 }
 0x6bb   :  { %3552 = vrot.lane.b32.xlu1 %v3551_v7, %s4028_s27  ;;  %3332 = vmatprep.subr.bf16.mxu1 %v4021_v0 }
 0x6bc   :  { %v3304_v11 = vpop.f32.mrf.mxu0 }
 0x6be   :  { %v707_v12 = vpop.f32.mrf.mxu0 }
 0x6c0   :  { %v3305_v13 = vpop.f32.mrf.mxu0 }
 0x6c1   :  { %v3561_v14 = vpack.i.bf16 %v3305_v13, %v3304_v11 }
 0x6c2   :  { %v710_v15 = vpop.f32.mrf.mxu0 }
 0x6c3   :  { %v3556_v16 = vpack.i.bf16 %v710_v15, %v707_v12  ;;  %3562 = vrot.lane.b32.xlu1 %v3561_v14, %s4029_s26  ;;  %v2970_v14 = vld [vmem:[%s4882_s11] ss:$0 sm:$0xff] }
 0x6c5   :  { %3557 = vrot.lane.b32.xlu0 %v3556_v16, %s4013_s29 }
 0x72d   :  { %v3553_v17 = vpop.permute.xlu1 %3552 }
 0x72e   :  { %v3555_v18 = vunpack.i.h.bf16 %v3553_v17  ;;  %v3554_v20 = vunpack.i.l.bf16 %v3553_v17 }
 0x730   :  { %v746_v30 = vsel %vm434_vm2, %v691_v4, %v3554_v20  ;;  %v747_v33 = vsel %vm434_vm2, %v694_v9, %v3555_v18  ;;  %v2971_v18 = vld [vmem:[%s4883_s12] ss:$0 sm:$0xff] }
 0x735   :  { %v3563_v21 = vpop.permute.xlu1 %3562 }
 0x736   :  { %v3565_v34 = vunpack.i.h.bf16 %v3563_v21  ;;  %v3564_v35 = vunpack.i.l.bf16 %v3563_v21 }
 0x737   :  { %v3558_v24 = vpop.permute.xlu0 %3557 }
 0x738   :  { %v3560_v26 = vunpack.i.h.bf16 %v3558_v24  ;;  %v3559_v29 = vunpack.i.l.bf16 %v3558_v24 }
 0x73a   :  { %v750_v36 = vsel %vm748_vm4, %v747_v33, %v3560_v26  ;;  %v749_v37 = vsel %vm748_vm4, %v746_v30, %v3559_v29  ;;  %v3641_v29 = vld [vmem:[%s4886_s15 + $0x10] sm:$0xff]   ;;  %v3642_v30 = vld [vmem:[%s4886_s15 + $0x8] sm:$0xff]   ;;  %v3643_v33 = vld [vmem:[%s4886_s15] sm:$0xff]  }
 0x73b   :  { %v753_v39 = vsel %vm751_vm5, %v750_v36, %v3565_v34  ;;  %v752_v40 = vsel %vm751_vm5, %v749_v37, %v3564_v35  ;;  %3333 = vmatpush3.bf16.msra.mxu1 %v3641_v29  ;;  %v2972_v34 = vld [vmem:[#allocation10] ss:$0 sm:$0xff] }
 0x73c   :  { %v758_v41 = vpack.c.bf16 %v753_v39, %v752_v40  ;;  %3334 = vmatprep.subr.bf16.mxu1 %v4021_v0 }
 0x73e   :  { %3311 = vmatmul.mubr.msk.bf16.vlgmr.msra.gmra.mxu0 %vm213_vm1, %v758_v41 }
 0x73f   :  { %3318 = vmatprep.mubr.msk.bf16.mxu0 %vm4022_vm0, %v4021_v0  ;;  %3315 = vmatpush3.bf16.msra.mxu0 %v3634_v25 }
 0x740   :  { %3316 = vmatprep.subr.bf16.mxu0 %v4021_v0  ;;  %3335 = vmatpush3.bf16.msra.mxu1 %v3642_v30 }
 0x741   :  { %3336 = vmatprep.subr.bf16.mxu1 %v4021_v0 }
 0x744   :  { %3337 = vmatpush3.bf16.msra.mxu1 %v3643_v33 }
 0x7fe   :  { %v815_v42 = vpop.f32.mrf.mxu0 }
 0x7ff   :  { %v816_v43 = vadd.f32 %v2966_v50, %v815_v42 }
 0x800   :  { %v3312_v38 = vpop.f32.mrf.mxu0 }
 0x801   :  { %v822_v44 = vadd.f32 %v816_v43, %v328_v27  ;;  %v2976_v38 = vld [vmem:[#allocation11] ss:$0 sm:$0xff] }
 0x802   :  { %v818_v46 = vpop.f32.mrf.mxu0 }
 0x803   :  { %v819_v47 = vadd.f32 %v2966_v50, %v818_v46  ;;  %v826_v48 = vsel %vm213_vm1, %v822_v44, 0.0 }
 0x804   :  { %827 = vadd.xlane.f32.xlu0 %v826_v48  ;;  %v3313_v51 = vpop.f32.mrf.mxu0 }
 0x805   :  { %v823_v52 = vadd.f32 %v819_v47, %v329_v28  ;;  %v3635_v28 = vld [vmem:[%s4884_s13] sm:$0xff]  }
 0x806   :  { %3317 = vmatpush3.bf16.msra.mxu0 %v3635_v28 }
 0x807   :  { %v829_v53 = vsel %vm213_vm1, %v823_v52, 0.0  ;;  %3342 = vmatprep.subr.bf16.mxu0 %v4021_v0 }
 0x808   :  { %830 = vadd.xlane.f32.xlu1 %v829_v53 }
 0x88d   :  { %v828_v54 = vpop.xlane.xlu0 %827 }
 0x88e   :  { %v833_v55 = vmul.f32 0.03125, %v828_v54 }
 0x890   :  { %v835_v56 = vsub.f32 %v822_v44, %v833_v55 }
 0x891   :  { %v831_v57 = vpop.xlane.xlu1 %830 }
 0x892   :  { %v834_v49 = vmul.f32 0.03125, %v831_v57  ;;  %v837_v45 = vmul.f32 %v835_v56, %v835_v56 }
 0x894   :  { %v836_v23 = vsub.f32 %v823_v52, %v834_v49  ;;  %v839_v27 = vsel %vm213_vm1, %v837_v45, 0.0 }
 0x895   :  { %840 = vadd.xlane.f32.xlu0 %v839_v27 }
 0x896   :  { %v838_v58 = vmul.f32 %v836_v23, %v836_v23 }
 0x898   :  { %v842_v59 = vsel %vm213_vm1, %v838_v58, 0.0 }
 0x899   :  { %843 = vadd.xlane.f32.xlu0 %v842_v59 }
 0x91e   :  { %v841_v4 = vpop.xlane.xlu0 %840 }
 0x91f   :  { %v845_v5 = vmul.f32 0.03125, %v841_v4 }
 0x921   :  { %v847_v7 = vadd.f32 1e-05, %v845_v5 }
 0x922   :  { %v844_v8 = vpop.xlane.xlu0 %843 }
 0x923   :  { %3721 = vrsqrt.f32 %v847_v7  ;;  %v846_v9 = vmul.f32 0.03125, %v844_v8 }
 0x925   :  { %v848_v11 = vadd.f32 1e-05, %v846_v9 }
 0x927   :  { %3723 = vrsqrt.f32 %v848_v11 }
 0x930   :  { %v3722_v12 = vpop.eup %3721 }
 0x931   :  { %v851_v13 = vmul.f32 %v3722_v12, %v835_v56  ;;  %v2985_v12 = vld [vmem:[%s4888_s17] ss:$0 sm:$0xff] }
 0x933   :  { %v859_v17 = vmul.f32 %v2970_v14, %v851_v13 }
 0x934   :  { %v3724_v15 = vpop.eup %3723 }
 0x935   :  { %v852_v16 = vmul.f32 %v3724_v15, %v836_v23  ;;  %v867_v21 = vadd.f32 %v2971_v18, %v859_v17 }
 0x937   :  { %v860_v20 = vmul.f32 %v2970_v14, %v852_v16  ;;  %v2986_v16 = vld [vmem:[%s4889_s18] ss:$0 sm:$0xff] }
 0x939   :  { %v868_v24 = vadd.f32 %v2971_v18, %v860_v20 }
 0x93b   :  { %v873_v26 = vpack.c.bf16 %v868_v24, %v867_v21 }
 0x93d   :  { %3319 = vmatmul.mubr.msk.bf16.vlgmr.msra.gmra.mxu0 %vm213_vm1, %v873_v26  ;;  %v2992_v26 = vld [vmem:[%s4916_s3 + $0x1] ss:$0 sm:$0xff] }
 0x93e   :  { %3346 = vmatprep.mubr.msk.bf16.mxu0 %vm4022_vm0, %v4021_v0  ;;  %3343 = vmatpush3.bf16.msra.mxu0 %v3644_v62 }
 0x93f   :  { %3344 = vmatprep.subr.bf16.mxu0 %v4021_v0 }
 0x942   :  { %3345 = vmatpush3.bf16.msra.mxu0 %v3645_v63 }
 0x9fd   :  { %v930_v35 = vpop.f32.mrf.mxu0 }
 0x9fe   :  { %v931_v37 = vadd.f32 %v2972_v34, %v930_v35 }
 0x9ff   :  { %v3320_v36 = vpop.f32.mrf.mxu0 }
 0xa00   :  { %v937_v50 = vmax.f32 %v931_v37, 0.0 }
 0xa01   :  { %v933_v39 = vpop.f32.mrf.mxu0 }
 0xa02   :  { %v934_v40 = vadd.f32 %v2972_v34, %v933_v39 }
 0xa03   :  { %v3321_v41 = vpop.f32.mrf.mxu0 }
 0xa04   :  { %v938_v42 = vmax.f32 %v934_v40, 0.0 }
 0xa06   :  { %v955_v43 = vpack.c.bf16 %v938_v42, %v937_v50 }
 0xa08   :  { %3339 = vmatmul.mubr.bf16.vlgmr.msra.gmra.mxu1 %v955_v43 }
 0xac8   :  { %v1045_v44 = vpop.f32.mrf.mxu1 }
 0xac9   :  { %v1046_v46 = vadd.f32 %v2976_v38, %v1045_v44 }
 0xaca   :  { %v3340_v47 = vpop.f32.mrf.mxu1 }
 0xacb   :  { %v1052_v48 = vadd.f32 %v1046_v46, %v867_v21 }
 0xacc   :  { %v1048_v51 = vpop.f32.mrf.mxu1 }
 0xacd   :  { %v1049_v52 = vadd.f32 %v2976_v38, %v1048_v51  ;;  %v1056_v53 = vsel %vm213_vm1, %v1052_v48, 0.0 }
 0xace   :  { %1057 = vadd.xlane.f32.xlu1 %v1056_v53  ;;  %v3341_v54 = vpop.f32.mrf.mxu1 }
 0xacf   :  { %v1053_v55 = vadd.f32 %v1049_v52, %v868_v24 }
 0xad1   :  { %v1059_v56 = vsel %vm213_vm1, %v1053_v55, 0.0 }
 0xad2   :  { %1060 = vadd.xlane.f32.xlu0 %v1059_v56 }
 0xb57   :  { %v1058_v57 = vpop.xlane.xlu1 %1057 }
 0xb58   :  { %v1062_v49 = vmul.f32 0.03125, %v1058_v57 }
 0xb5a   :  { %v1064_v45 = vsub.f32 %v1052_v48, %v1062_v49 }
 0xb5b   :  { %v1061_v23 = vpop.xlane.xlu0 %1060 }
 0xb5c   :  { %v1063_v27 = vmul.f32 0.03125, %v1061_v23  ;;  %v1066_v58 = vmul.f32 %v1064_v45, %v1064_v45 }
 0xb5e   :  { %v1065_v59 = vsub.f32 %v1053_v55, %v1063_v27  ;;  %v1068_v25 = vsel %vm213_vm1, %v1066_v58, 0.0 }
 0xb5f   :  { %1069 = vadd.xlane.f32.xlu1 %v1068_v25 }
 0xb60   :  { %v1067_v28 = vmul.f32 %v1065_v59, %v1065_v59 }
 0xb62   :  { %v1071_v60 = vsel %vm213_vm1, %v1067_v28, 0.0 }
 0xb63   :  { %1072 = vadd.xlane.f32.xlu0 %v1071_v60 }
 0xbe8   :  { %v1070_v2 = vpop.xlane.xlu1 %1069 }
 0xbe9   :  { %v1074_v3 = vmul.f32 0.03125, %v1070_v2 }
 0xbeb   :  { %v1076_v4 = vadd.f32 1e-05, %v1074_v3 }
 0xbec   :  { %v1073_v5 = vpop.xlane.xlu0 %1072 }
 0xbed   :  { %3725 = vrsqrt.f32 %v1076_v4  ;;  %v1075_v7 = vmul.f32 0.03125, %v1073_v5 }
 0xbef   :  { %v1077_v8 = vadd.f32 1e-05, %v1075_v7 }
 0xbf1   :  { %3727 = vrsqrt.f32 %v1077_v8 }
 0xbfa   :  { %v3726_v9 = vpop.eup %3725 }
 0xbfb   :  { %v1080_v11 = vmul.f32 %v3726_v9, %v1064_v45 }
 0xbfd   :  { %v1088_v15 = vmul.f32 %v2985_v12, %v1080_v11 }
 0xbfe   :  { %v3728_v13 = vpop.eup %3727 }
 0xbff   :  { %v1081_v14 = vmul.f32 %v3728_v13, %v1065_v59  ;;  %v4441_v18 = vadd.f32 %v2986_v16, %v1088_v15 }
 0xc01   :  { %v1089_v17 = vmul.f32 %v2985_v12, %v1081_v14 }
 0xc03   :  { %v4443_v20 = vadd.f32 %v2986_v16, %v1089_v17 }
 0xc05   :  { %v1103_v21 = vpack.c.bf16 %v4443_v20, %v4441_v18 }
 0xc07   :  { %3347 = vmatmul.mubr.msk.bf16.vlgmr.msra.gmra.mxu0 %vm213_vm1, %v1103_v21 }
 0xcc7   :  { %v1161_v24 = vpop.f32.mrf.mxu0 }
 0xcc8   :  { %v1162_v33 = vadd.f32 %v2992_v26, %v1161_v24 }
 0xcc9   :  { %v3348_v29 = vpop.f32.mrf.mxu0 }
 0xccb   :  { %v1164_v30 = vpop.f32.mrf.mxu0 }
 0xccc   :  { %v1165_v34 = vadd.f32 %v2992_v26, %v1164_v30 }
 0xccd   :  { %v3349_v35 = vpop.f32.mrf.mxu0 }
 0xcce   :  { %v3571_v36 = vpack.i.bf16 %v1165_v34, %v1162_v33  ;;  %v4451_v37 = vpack.c.bf16 %v1165_v34, %v1162_v33 }
 0xcd0   :  { %3572 = vrot.lane.b32.xlu0 %v3571_v36, %s4025_s5  ;;  %3567 = vrot.lane.b32.xlu1 %v3571_v36, %s4024_s2 }
 0xcd1   :  { %3358 = vmatprep.mubr.msk.bf16.mxu0 %vm434_vm2, %v4451_v37 }
 0xcd4   :  { %3577 = vrot.lane.b32.xlu1 %v3571_v36, %s4023_s25 }
 0xd42   :  { %v3573_v39 = vpop.permute.xlu0 %3572  ;;  %v3568_v40 = vpop.permute.xlu1 %3567 }
 0xd43   :  { %v3575_v41 = vunpack.i.h.bf16 %v3573_v39  ;;  %v3574_v50 = vunpack.i.l.bf16 %v3573_v39  ;;  %v3570_v42 = vunpack.i.h.bf16 %v3568_v40  ;;  %v3569_v43 = vunpack.i.l.bf16 %v3568_v40 }
 0xd45   :  { %v4458_v38 = vpack.c.bf16 %v3575_v41, %v3574_v50  ;;  %v4460_v44 = vpack.c.bf16 %v3570_v42, %v3569_v43 }
 0xd46   :  { %v3578_v46 = vpop.permute.xlu1 %3577 }
 0xd47   :  { %v3580_v47 = vunpack.i.h.bf16 %v3578_v46  ;;  %v3579_v48 = vunpack.i.l.bf16 %v3578_v46  ;;  %1200 = vrot.lane.b32.xlu0 %v4458_v38, %s4026_s14  ;;  %1202 = vrot.lane.b32.xlu1 %v4460_v44, %s4026_s14 }
 0xd49   :  { %v4466_v51 = vpack.c.bf16 %v3580_v47, %v3579_v48 }
 0xd4b   :  { %1198 = vrot.lane.b32.xlu1 %v4466_v51, %s4026_s14  ;;  %1196 = vrot.lane.b32.xlu0 %v4451_v37, %s4026_s14 }
 0xdb9   :  { %v1203_v52 = vpop.permute.xlu1 %1202  ;;  %v1201_v54 = vpop.permute.xlu0 %1200 }
 0xdba   :  { %v1226_v53 = vsel %vm434_vm2, %v1203_v52, 0  ;;  %3504 = vmatprep.subr.msk.bf16.mxu0 %vm434_vm2, %v1203_v52  ;;  %v1223_v55 = vsel %vm434_vm2, %v1201_v54, 0 }
 0xdbb   :  { %3351 = vmatpush3.bf16.xpose.msra.mxu0 %v1226_v53 }
 0xdbc   :  { %3505 = vmatprep.subr.msk.bf16.mxu0 %vm434_vm2, %v1201_v54 }
 0xdbd   :  { %v1199_v56 = vpop.permute.xlu1 %1198  ;;  %v1197_v49 = vpop.permute.xlu0 %1196 }
 0xdbe   :  { %v1220_v57 = vsel %vm434_vm2, %v1199_v56, 0  ;;  %v1217_v45 = vsel %vm434_vm2, %v1197_v49, 0 }
 0xdc3   :  { %3353 = vmatpush3.bf16.xpose.msra.mxu0 %v1223_v55 }
 0xdc4   :  { %3506 = vmatprep.subr.msk.bf16.mxu0 %vm434_vm2, %v1199_v56 }
 0xdcb   :  { %3355 = vmatpush3.bf16.xpose.msra.mxu0 %v1220_v57 }
 0xdcc   :  { %3507 = vmatprep.subr.msk.bf16.mxu0 %vm434_vm2, %v1197_v49 }
 0xdd3   :  { %3357 = vmatpush3.bf16.xpose.msra.mxu0 %v1217_v45 }
 0xdd4   :  { %3382 = vmatprep.subr.bf16.mxu0 %v4021_v0 }
 0xdda   :  { %3359 = vmatmul.mubr.msk.bf16.vlgmr.msra.gmra.mxu0 %vm434_vm2, %v4466_v51 }
 0xddb   :  { %3362 = vmatprep.mubr.msk.bf16.mxu0 %vm434_vm2, %v4458_v38 }
 0xde2   :  { %3363 = vmatmul.mubr.msk.bf16.gmra.mxu0 %vm434_vm2, %v4460_v44 }
 0xde3   :  { %3386 = vmatprep.mubr.msk.bf16.mxu0 %vm4022_vm0, %v4021_v0 }
 0xe9a   :  { %v3360_v23 = vpop.f32.mrf.mxu0 }
 0xe9b   :  { %v1295_v60 = vmul.f32 0.35355338, %v3360_v23 }
 0xe9c   :  { %v1262_v27 = vpop.f32.mrf.mxu0 }
 0xe9d   :  { %v1293_v58 = vmul.f32 0.35355338, %v1262_v27  ;;  %v1303_v8 = vadd.f32 %v1295_v60, %v4287_v10 }
 0xe9e   :  { %v3361_v59 = vpop.f32.mrf.mxu0 }
 0xe9f   :  { %v1296_v25 = vmul.f32 0.35355338, %v3361_v59  ;;  %v1301_v28 = vadd.f32 %v1293_v58, %v4269_v61  ;;  %v1315_v14 = vsel %vm540_vm3, %v1303_v8, -inf }
 0xea0   :  { %v1265_v62 = vpop.f32.mrf.mxu0 }
 0xea1   :  { %v1294_v63 = vmul.f32 0.35355338, %v1265_v62  ;;  %v1309_v2 = vsel %vm540_vm3, %v1301_v28, -inf  ;;  %v1304_v3 = vadd.f32 %v1296_v25, %v4274_v1 }
 0xea2   :  { %1310 = vmax.xlane.f32.xlu1 %v1309_v2  ;;  %v3364_v4 = vpop.f32.mrf.mxu0 }
 0xea3   :  { %v1302_v5 = vadd.f32 %v1294_v63, %v4280_v6  ;;  %v1318_v11 = vsel %vm540_vm3, %v1304_v3, -inf  ;;  %v1299_v15 = vmul.f32 0.35355338, %v3364_v4 }
 0xea4   :  { %v1278_v7 = vpop.f32.mrf.mxu0 }
 0xea5   :  { %v1297_v9 = vmul.f32 0.35355338, %v1278_v7  ;;  %v1312_v12 = vsel %vm540_vm3, %v1302_v5, -inf  ;;  %v1307_v24 = vadd.f32 %v1299_v15, %v4308_v31 }
 0xea6   :  { %1319 = vmax.xlane.f32.xlu1 %v1318_v11  ;;  %1313 = vmax.xlane.f32.xlu0 %v1312_v12  ;;  %v3365_v61 = vpop.f32.mrf.mxu0 }
 0xea7   :  { %v1300_v1 = vmul.f32 0.35355338, %v3365_v61  ;;  %v1305_v17 = vadd.f32 %v1297_v9, %v4296_v19  ;;  %v1327_v29 = vsel %vm540_vm3, %v1307_v24, -inf }
 0xea8   :  { %v1281_v13 = vpop.f32.mrf.mxu0 }
 0xea9   :  { %v1298_v16 = vmul.f32 0.35355338, %v1281_v13  ;;  %v1321_v10 = vsel %vm540_vm3, %v1305_v17, -inf  ;;  %v1308_v26 = vadd.f32 %v1300_v1, %v4313_v32 }
 0xeaa   :  { %1316 = vmax.xlane.f32.xlu0 %v1315_v14 }
 0xeab   :  { %v1306_v6 = vadd.f32 %v1298_v16, %v4302_v22  ;;  %v1330_v30 = vsel %vm540_vm3, %v1308_v26, -inf }
 0xead   :  { %v1324_v21 = vsel %vm540_vm3, %v1306_v6, -inf }
 0xeae   :  { %1322 = vmax.xlane.f32.xlu0 %v1321_v10  ;;  %1325 = vmax.xlane.f32.xlu1 %v1324_v21 }
 0xeb2   :  { %1328 = vmax.xlane.f32.xlu0 %v1327_v29  ;;  %1331 = vmax.xlane.f32.xlu1 %v1330_v30 }
 0xec3   :  { %1405 = vrot.lane.b32.xlu1 %v4458_v38, %s4027_s7 }
 0xec8   :  { %1407 = vrot.lane.b32.xlu0 %v4460_v44, %s4027_s7 }
 0xf2b   :  { %v1311_v19 = vpop.xlane.xlu1 %1310 }
 0xf2c   :  { %v1333_v32 = vsub.f32 %v1301_v28, %v1311_v19 }
 0xf2e   :  { %v1341_v41 = vmul.f32 1.442695, %v1333_v32 }
 0xf2f   :  { %v1320_v22 = vpop.xlane.xlu1 %1319  ;;  %v1314_v33 = vpop.xlane.xlu0 %1313 }
 0xf30   :  { %v1336_v31 = vsub.f32 %v1304_v3, %v1320_v22  ;;  %v1334_v34 = vsub.f32 %v1302_v5, %v1314_v33 }
 0xf32   :  { %v1347_v35 = vmul.f32 1.442695, %v1336_v31  ;;  %v1343_v36 = vmul.f32 1.442695, %v1334_v34 }
 0xf33   :  { %v1317_v39 = vpop.xlane.xlu0 %1316 }
 0xf34   :  { %3729 = vpow2.f32 %v1347_v35  ;;  %v1335_v40 = vsub.f32 %v1303_v8, %v1317_v39 }
 0xf35   :  { %3731 = vpow2.f32 %v1343_v36 }
 0xf36   :  { %v1345_v50 = vmul.f32 1.442695, %v1335_v40 }
 0xf37   :  { %v1323_v42 = vpop.xlane.xlu0 %1322  ;;  %v1326_v43 = vpop.xlane.xlu1 %1325 }
 0xf38   :  { %3733 = vpow2.f32 %v1345_v50  ;;  %v1337_v38 = vsub.f32 %v1305_v17, %v1323_v42  ;;  %v1338_v44 = vsub.f32 %v1306_v6, %v1326_v43  ;;  %v3646_v50 = vld [vmem:[%s4880_s9 + $0x18] sm:$0xff]  }
 0xf39   :  { %3735 = vpow2.f32 %v1341_v41  ;;  %3383 = vmatpush3.bf16.msra.mxu0 %v3646_v50 }
 0xf3a   :  { %v1349_v53 = vmul.f32 1.442695, %v1337_v38  ;;  %v1351_v56 = vmul.f32 1.442695, %v1338_v44  ;;  %3384 = vmatprep.subr.bf16.mxu0 %v4021_v0 }
 0xf3b   :  { %v1329_v46 = vpop.xlane.xlu0 %1328  ;;  %v1332_v47 = vpop.xlane.xlu1 %1331 }
 0xf3c   :  { %v1339_v48 = vsub.f32 %v1307_v24, %v1329_v46  ;;  %v1340_v52 = vsub.f32 %v1308_v26, %v1332_v47  ;;  %v3647_v46 = vld [vmem:[%s4880_s9 + $0x10] sm:$0xff]  }
 0xf3d   :  { %3385 = vmatpush3.bf16.msra.mxu0 %v3647_v46 }
 0xf3e   :  { %v1353_v54 = vmul.f32 1.442695, %v1339_v48  ;;  %v1355_v55 = vmul.f32 1.442695, %v1340_v52  ;;  %3390 = vmatprep.subr.bf16.mxu0 %v4021_v0 }
 0xf3f   :  { %v1408_v57 = vpop.permute.xlu0 %1407  ;;  %v1406_v45 = vpop.permute.xlu1 %1405 }
 0xf40   :  { %3737 = vpow2.f32 %v1353_v54  ;;  %3366 = vmatprep.subr.bf16.mxu1 %v1408_v57 }
 0xf41   :  { %v3730_v49 = vpop.eup %3729  ;;  %3739 = vpow2.f32 %v1355_v55  ;;  %3367 = vmatpush3.bf16.msra.mxu1 %v1408_v57 }
 0xf42   :  { %3741 = vpow2.f32 %v1349_v53  ;;  %3368 = vmatprep.subr.bf16.mxu1 %v1406_v45  ;;  %v1366_v23 = vsel %vm540_vm3, %v3730_v49, 0.0  ;;  %v3732_v27 = vpop.eup %3731 }
 0xf43   :  { %3743 = vpow2.f32 %v1351_v56  ;;  %1367 = vadd.xlane.f32.xlu1 %v1366_v23  ;;  %v1360_v25 = vsel %vm540_vm3, %v3732_v27, 0.0 }
 0xf45   :  { %v3734_v58 = vpop.eup %3733  ;;  %3369 = vmatpush3.bf16.msra.mxu1 %v1406_v45 }
 0xf46   :  { %v1363_v59 = vsel %vm540_vm3, %v3734_v58, 0.0  ;;  %v3736_v28 = vpop.eup %3735 }
 0xf47   :  { %1364 = vadd.xlane.f32.xlu0 %v1363_v59  ;;  %1361 = vadd.xlane.f32.xlu1 %v1360_v25  ;;  %v1357_v60 = vsel %vm540_vm3, %v3736_v28, 0.0 }
 0xf4b   :  { %1358 = vadd.xlane.f32.xlu0 %v1357_v60 }
 0xf4d   :  { %v3738_v62 = vpop.eup %3737 }
 0xf4e   :  { %v3740_v63 = vpop.eup %3739  ;;  %v1375_v2 = vsel %vm540_vm3, %v3738_v62, 0.0 }
 0xf4f   :  { %v3742_v3 = vpop.eup %3741  ;;  %1376 = vadd.xlane.f32.xlu0 %v1375_v2  ;;  %v1378_v4 = vsel %vm540_vm3, %v3740_v63, 0.0 }
 0xf50   :  { %v3744_v5 = vpop.eup %3743  ;;  %1379 = vadd.xlane.f32.xlu1 %v1378_v4  ;;  %v1369_v7 = vsel %vm540_vm3, %v3742_v3, 0.0 }
 0xf51   :  { %v1372_v8 = vsel %vm540_vm3, %v3744_v5, 0.0 }
 0xf53   :  { %1370 = vadd.xlane.f32.xlu0 %v1369_v7  ;;  %v3009_v7 = vld [vmem:[%s4881_s10 + $0x1] ss:$0 sm:$0xff] }
 0xf54   :  { %1373 = vadd.xlane.f32.xlu1 %v1372_v8 }
 0xf65   :  { %1403 = vrot.lane.b32.xlu1 %v4466_v51, %s4027_s7 }
 0xf69   :  { %1401 = vrot.lane.b32.xlu0 %v4451_v37, %s4027_s7 }
 0xfcc   :  { %v1368_v9 = vpop.xlane.xlu1 %1367 }
 0xfd0   :  { %v1365_v11 = vpop.xlane.xlu0 %1364  ;;  %v1362_v12 = vpop.xlane.xlu1 %1361 }
 0xfd1   :  { %3745 = vrcp.f32 %v1362_v12 }
 0xfd2   :  { %3747 = vrcp.f32 %v1365_v11 }
 0xfd4   :  { %v1359_v61 = vpop.xlane.xlu0 %1358 }
 0xfd5   :  { %3749 = vrcp.f32 %v1359_v61 }
 0xfd6   :  { %3751 = vrcp.f32 %v1368_v9 }
 0xfd8   :  { %v1377_v13 = vpop.xlane.xlu0 %1376 }
 0xfd9   :  { %v1380_v14 = vpop.xlane.xlu1 %1379  ;;  %3753 = vrcp.f32 %v1377_v13 }
 0xfda   :  { %3755 = vrcp.f32 %v1380_v14 }
 0xfdc   :  { %v1371_v15 = vpop.xlane.xlu0 %1370 }
 0xfdd   :  { %3757 = vrcp.f32 %v1371_v15  ;;  %v1374_v1 = vpop.xlane.xlu1 %1373 }
 0xfde   :  { %3759 = vrcp.f32 %v1374_v1  ;;  %v3746_v51 = vpop.eup %3745 }
 0xfdf   :  { %v3748_v16 = vpop.eup %3747  ;;  %v1384_v24 = vmul.f32 %v3746_v51, %v3732_v27 }
 0xfe0   :  { %v1402_v10 = vpop.permute.xlu0 %1401  ;;  %v1386_v26 = vmul.f32 %v3748_v16, %v3734_v58 }
 0xfe1   :  { %v1404_v17 = vpop.permute.xlu1 %1403 }
 0xfe2   :  { %v3750_v37 = vpop.eup %3749  ;;  %3370 = vmatprep.subr.bf16.mxu1 %v1404_v17 }
 0xfe3   :  { %v3752_v6 = vpop.eup %3751  ;;  %3371 = vmatpush3.bf16.msra.mxu1 %v1404_v17  ;;  %v1382_v21 = vmul.f32 %v3750_v37, %v3736_v28 }
 0xfe4   :  { %3372 = vmatprep.subr.bf16.mxu1 %v1402_v10  ;;  %v1388_v30 = vmul.f32 %v3752_v6, %v3730_v49 }
 0xfe5   :  { %v1397_v29 = vpack.c.bf16 %v1384_v24, %v1382_v21 }
 0xfe6   :  { %v3754_v19 = vpop.eup %3753  ;;  %v1398_v22 = vpack.c.bf16 %v1388_v30, %v1386_v26  ;;  %v3649_v30 = vld [vmem:[%s4884_s13 + $0x10] sm:$0xff]  }
 0xfe7   :  { %3373 = vmatpush3.bf16.msra.mxu1 %v1402_v10  ;;  %3374 = vmatprep.mubr.msk.bf16.mxu1 %vm540_vm3, %v1397_v29  ;;  %v3756_v33 = vpop.eup %3755  ;;  %v1394_v36 = vmul.f32 %v3754_v19, %v3738_v62  ;;  %v3650_v19 = vld [vmem:[%s4886_s15 + $0x78] sm:$0xff]  }
 0xfe8   :  { %3398 = vmatprep.subr.bf16.mxu1 %v4021_v0  ;;  %v1396_v39 = vmul.f32 %v3756_v33, %v3740_v63  ;;  %v3652_v33 = vld [vmem:[%s4886_s15 + $0x68] sm:$0xff]  }
 0xfea   :  { %v3758_v31 = vpop.eup %3757  ;;  %3375 = vmatmul.mubr.msk.bf16.vlgmr.msra.gmra.mxu1 %vm540_vm3, %v1398_v22  ;;  %v1400_v41 = vpack.c.bf16 %v1396_v39, %v1394_v36  ;;  %v3651_v22 = vld [vmem:[%s4886_s15 + $0x70] sm:$0xff]  }
 0xfeb   :  { %v3760_v34 = vpop.eup %3759  ;;  %v1390_v32 = vmul.f32 %v3758_v31, %v3742_v3  ;;  %3399 = vmatpush3.bf16.msra.mxu1 %v3650_v19  ;;  %v3653_v31 = vld [vmem:[%s4886_s15 + $0x60] sm:$0xff]  }
 0xfec   :  { %v1392_v35 = vmul.f32 %v3760_v34, %v3744_v5  ;;  %3400 = vmatprep.subr.bf16.mxu1 %v4021_v0  ;;  %v3654_v34 = vld [vmem:[%s4886_s15 + $0x58] sm:$0xff]  }
 0xfee   :  { %v1399_v40 = vpack.c.bf16 %v1392_v35, %v1390_v32 }
 0xfef   :  { %3401 = vmatpush3.bf16.msra.mxu1 %v3651_v22 }
 0xff0   :  { %3378 = vmatprep.mubr.msk.bf16.mxu1 %vm540_vm3, %v1399_v40  ;;  %3402 = vmatprep.subr.bf16.mxu1 %v4021_v0 }
 0xff2   :  { %3379 = vmatmul.mubr.msk.bf16.gmra.mxu1 %vm540_vm3, %v1400_v41 }
 0xff3   :  { %3414 = vmatprep.mubr.msk.bf16.mxu1 %vm4022_vm0, %v4021_v0  ;;  %3403 = vmatpush3.bf16.msra.mxu1 %v3652_v33 }
 0xff4   :  { %3404 = vmatprep.subr.bf16.mxu1 %v4021_v0 }
 0xff7   :  { %3405 = vmatpush3.bf16.msra.mxu1 %v3653_v31  ;;  %v3052_v31 = vld [vmem:[%s4888_s17 + $0x1] ss:$0 sm:$0xff] }
 0xff8   :  { %3406 = vmatprep.subr.bf16.mxu1 %v4021_v0 }
 0xffb   :  { %3407 = vmatpush3.bf16.msra.mxu1 %v3654_v34 }
 0xffc   :  { %3408 = vmatprep.subr.bf16.mxu1 %v4021_v0 }
0x10aa   :  { %v3376_v42 = vpop.f32.mrf.mxu1 }
0x10ac   :  { %v1459_v43 = vpop.f32.mrf.mxu1 }
0x10ae   :  { %v3377_v38 = vpop.f32.mrf.mxu1 }
0x10af   :  { %v3581_v44 = vpack.i.bf16 %v3377_v38, %v3376_v42 }
0x10b0   :  { %v1462_v47 = vpop.f32.mrf.mxu1 }
0x10b1   :  { %3582 = vrot.lane.b32.xlu1 %v3581_v44, %s4028_s27 }
0x10b2   :  { %v3380_v48 = vpop.f32.mrf.mxu1 }
0x10b4   :  { %v1475_v52 = vpop.f32.mrf.mxu1 }
0x10b6   :  { %v3381_v53 = vpop.f32.mrf.mxu1 }
0x10b7   :  { %v3591_v54 = vpack.i.bf16 %v3381_v53, %v3380_v48 }
0x10b8   :  { %v1478_v55 = vpop.f32.mrf.mxu1 }
0x10b9   :  { %v3586_v56 = vpack.i.bf16 %v1478_v55, %v1475_v52  ;;  %3592 = vrot.lane.b32.xlu1 %v3591_v54, %s4029_s26  ;;  %v3655_v55 = vld [vmem:[%s4886_s15 + $0x50] sm:$0xff]  }
0x10ba   :  { %3409 = vmatpush3.bf16.msra.mxu1 %v3655_v55 }
0x10bb   :  { %3587 = vrot.lane.b32.xlu0 %v3586_v56, %s4013_s29  ;;  %3410 = vmatprep.subr.bf16.mxu1 %v4021_v0  ;;  %v3656_v56 = vld [vmem:[%s4886_s15 + $0x48] sm:$0xff]  }
0x10be   :  { %3411 = vmatpush3.bf16.msra.mxu1 %v3656_v56 }
0x10bf   :  { %3412 = vmatprep.subr.bf16.mxu1 %v4021_v0 }
0x1123   :  { %v3583_v57 = vpop.permute.xlu1 %3582 }
0x1124   :  { %v3585_v49 = vunpack.i.h.bf16 %v3583_v57  ;;  %v3584_v45 = vunpack.i.l.bf16 %v3583_v57  ;;  %v3657_v57 = vld [vmem:[%s4886_s15 + $0x40] sm:$0xff]  }
0x1125   :  { %3413 = vmatpush3.bf16.msra.mxu1 %v3657_v57 }
0x1126   :  { %v1514_v25 = vsel %vm434_vm2, %v1459_v43, %v3584_v45  ;;  %v1515_v28 = vsel %vm434_vm2, %v1462_v47, %v3585_v49  ;;  %v3015_v43 = vld [vmem:[%s4882_s11 + $0x1] ss:$0 sm:$0xff]  ;;  %v3021_v49 = vld [vmem:[#allocation10 + $0x1] ss:$0 sm:$0xff] }
0x1127   :  { %v3016_v47 = vld [vmem:[%s4883_s12 + $0x1] ss:$0 sm:$0xff] }
0x112b   :  { %v3593_v23 = vpop.permute.xlu1 %3592 }
0x112c   :  { %v3595_v60 = vunpack.i.h.bf16 %v3593_v23  ;;  %v3594_v62 = vunpack.i.l.bf16 %v3593_v23 }
0x112d   :  { %v3588_v27 = vpop.permute.xlu0 %3587 }
0x112e   :  { %v3590_v58 = vunpack.i.h.bf16 %v3588_v27  ;;  %v3589_v59 = vunpack.i.l.bf16 %v3588_v27 }
0x1130   :  { %v1517_v63 = vsel %vm748_vm4, %v1515_v28, %v3590_v58  ;;  %v1516_v2 = vsel %vm748_vm4, %v1514_v25, %v3589_v59 }
0x1131   :  { %v1519_v3 = vsel %vm751_vm5, %v1517_v63, %v3595_v60  ;;  %v1518_v4 = vsel %vm751_vm5, %v1516_v2, %v3594_v62  ;;  %v3041_v63 = vld [vmem:[#allocation11 + $0x1] ss:$0 sm:$0xff] }
0x1132   :  { %v1525_v5 = vpack.c.bf16 %v1519_v3, %v1518_v4 }
0x1134   :  { %3387 = vmatmul.mubr.msk.bf16.vlgmr.msra.gmra.mxu0 %vm213_vm1, %v1525_v5 }
0x1135   :  { %3394 = vmatprep.mubr.msk.bf16.mxu0 %vm4022_vm0, %v4021_v0 }
0x11f4   :  { %v1583_v8 = vpop.f32.mrf.mxu0 }
0x11f5   :  { %v1584_v9 = vadd.f32 %v3009_v7, %v1583_v8 }
0x11f6   :  { %v3388_v11 = vpop.f32.mrf.mxu0 }
0x11f7   :  { %v1590_v12 = vadd.f32 %v1584_v9, %v4441_v18 }
0x11f8   :  { %v1586_v61 = vpop.f32.mrf.mxu0 }
0x11f9   :  { %v1587_v13 = vadd.f32 %v3009_v7, %v1586_v61  ;;  %v1596_v14 = vsel %vm213_vm1, %v1590_v12, 0.0 }
0x11fa   :  { %1597 = vadd.xlane.f32.xlu0 %v1596_v14  ;;  %v3389_v15 = vpop.f32.mrf.mxu0 }
0x11fb   :  { %v1591_v1 = vadd.f32 %v1587_v13, %v4443_v20  ;;  %v3648_v20 = vld [vmem:[%s4884_s13 + $0x18] sm:$0xff]  }
0x11fc   :  { %3391 = vmatpush3.bf16.msra.mxu0 %v3648_v20 }
0x11fd   :  { %v1599_v51 = vsel %vm213_vm1, %v1591_v1, 0.0  ;;  %3392 = vmatprep.subr.bf16.mxu0 %v4021_v0 }
0x11fe   :  { %1600 = vadd.xlane.f32.xlu1 %v1599_v51 }
0x1200   :  { %3393 = vmatpush3.bf16.msra.mxu0 %v3649_v30 }
0x1201   :  { %3418 = vmatprep.subr.bf16.mxu0 %v4021_v0 }
0x1283   :  { %v1598_v16 = vpop.xlane.xlu0 %1597 }
0x1284   :  { %v1602_v17 = vmul.f32 0.03125, %v1598_v16 }
0x1286   :  { %v1604_v37 = vsub.f32 %v1590_v12, %v1602_v17 }
0x1287   :  { %v1601_v6 = vpop.xlane.xlu1 %1600 }
0x1288   :  { %v1603_v10 = vmul.f32 0.03125, %v1601_v6  ;;  %v1606_v21 = vmul.f32 %v1604_v37, %v1604_v37 }
0x128a   :  { %v1605_v24 = vsub.f32 %v1591_v1, %v1603_v10  ;;  %v1608_v18 = vsel %vm213_vm1, %v1606_v21, 0.0  ;;  %v3658_v21 = vld [vmem:[%s4915_s4 + $0x28] sm:$0xff]  }
0x128b   :  { %1609 = vadd.xlane.f32.xlu0 %v1608_v18 }
0x128c   :  { %v1607_v26 = vmul.f32 %v1605_v24, %v1605_v24 }
0x128e   :  { %v1611_v29 = vsel %vm213_vm1, %v1607_v26, 0.0 }
0x128f   :  { %1612 = vadd.xlane.f32.xlu0 %v1611_v29 }
0x1314   :  { %v1610_v32 = vpop.xlane.xlu0 %1609 }
0x1315   :  { %v1614_v35 = vmul.f32 0.03125, %v1610_v32 }
0x1317   :  { %v1616_v36 = vadd.f32 1e-05, %v1614_v35 }
0x1318   :  { %v1613_v39 = vpop.xlane.xlu0 %1612 }
0x1319   :  { %3761 = vrsqrt.f32 %v1616_v36  ;;  %v1615_v40 = vmul.f32 0.03125, %v1613_v39  ;;  %v3053_v36 = vld [vmem:[%s4889_s18 + $0x1] ss:$0 sm:$0xff] }
0x131b   :  { %v1617_v41 = vadd.f32 1e-05, %v1615_v40 }
0x131d   :  { %3763 = vrsqrt.f32 %v1617_v41 }
0x1326   :  { %v3762_v50 = vpop.eup %3761 }
0x1327   :  { %v1620_v42 = vmul.f32 %v3762_v50, %v1604_v37 }
0x1329   :  { %v1628_v46 = vmul.f32 %v3015_v43, %v1620_v42 }
0x132a   :  { %v3764_v38 = vpop.eup %3763 }
0x132b   :  { %v1621_v44 = vmul.f32 %v3764_v38, %v1605_v24  ;;  %v1636_v52 = vadd.f32 %v3016_v47, %v1628_v46  ;;  %v3659_v24 = vld [vmem:[%s4915_s4 + $0x20] sm:$0xff]  }
0x132d   :  { %v1629_v48 = vmul.f32 %v3015_v43, %v1621_v44  ;;  %v3059_v43 = vld [vmem:[%s4916_s3 + $0x2] ss:$0 sm:$0xff] }
0x132f   :  { %v1637_v53 = vadd.f32 %v3016_v47, %v1629_v48 }
0x1331   :  { %v1643_v54 = vpack.c.bf16 %v1637_v53, %v1636_v52 }
0x1333   :  { %3395 = vmatmul.mubr.msk.bf16.vlgmr.msra.gmra.mxu0 %vm213_vm1, %v1643_v54 }
0x1334   :  { %3422 = vmatprep.mubr.msk.bf16.mxu0 %vm4022_vm0, %v4021_v0  ;;  %3419 = vmatpush3.bf16.msra.mxu0 %v3658_v21 }
0x1335   :  { %3420 = vmatprep.subr.bf16.mxu0 %v4021_v0 }
0x1338   :  { %3421 = vmatpush3.bf16.msra.mxu0 %v3659_v24 }
0x13f3   :  { %v1701_v45 = vpop.f32.mrf.mxu0 }
0x13f4   :  { %v1702_v27 = vadd.f32 %v3021_v49, %v1701_v45 }
0x13f5   :  { %v3396_v23 = vpop.f32.mrf.mxu0 }
0x13f6   :  { %v1708_v28 = vmax.f32 %v1702_v27, 0.0 }
0x13f7   :  { %v1704_v58 = vpop.f32.mrf.mxu0 }
0x13f8   :  { %v1705_v59 = vadd.f32 %v3021_v49, %v1704_v58 }
0x13f9   :  { %v3397_v25 = vpop.f32.mrf.mxu0 }
0x13fa   :  { %v1709_v60 = vmax.f32 %v1705_v59, 0.0 }
0x13fc   :  { %v1727_v62 = vpack.c.bf16 %v1709_v60, %v1708_v28 }
0x13fe   :  { %3415 = vmatmul.mubr.bf16.vlgmr.msra.gmra.mxu1 %v1727_v62 }
0x14be   :  { %v1818_v2 = vpop.f32.mrf.mxu1 }
0x14bf   :  { %v1819_v3 = vadd.f32 %v3041_v63, %v1818_v2 }
0x14c0   :  { %v3416_v4 = vpop.f32.mrf.mxu1 }
0x14c1   :  { %v1825_v5 = vadd.f32 %v1819_v3, %v1636_v52 }
0x14c2   :  { %v1821_v7 = vpop.f32.mrf.mxu1 }
0x14c3   :  { %v1822_v8 = vadd.f32 %v3041_v63, %v1821_v7  ;;  %v1831_v9 = vsel %vm213_vm1, %v1825_v5, 0.0 }
0x14c4   :  { %1832 = vadd.xlane.f32.xlu1 %v1831_v9  ;;  %v3417_v11 = vpop.f32.mrf.mxu1 }
0x14c5   :  { %v1826_v12 = vadd.f32 %v1822_v8, %v1637_v53 }
0x14c7   :  { %v1834_v61 = vsel %vm213_vm1, %v1826_v12, 0.0 }
0x14c8   :  { %1835 = vadd.xlane.f32.xlu0 %v1834_v61 }
0x154d   :  { %v1833_v13 = vpop.xlane.xlu1 %1832 }
0x154e   :  { %v1837_v14 = vmul.f32 0.03125, %v1833_v13  ;;  %v3809_v13 = vld [vmem:[%s4917_s20] sm:$0xff] }
0x1550   :  { %v1839_v15 = vsub.f32 %v1825_v5, %v1837_v14 }
0x1551   :  { %v1836_v1 = vpop.xlane.xlu0 %1835 }
0x1552   :  { %v1838_v51 = vmul.f32 0.03125, %v1836_v1  ;;  %v1841_v16 = vmul.f32 %v1839_v15, %v1839_v15 }
0x1554   :  { %v1840_v17 = vsub.f32 %v1826_v12, %v1838_v51  ;;  %v1843_v37 = vsel %vm213_vm1, %v1841_v16, 0.0 }
0x1555   :  { %1844 = vadd.xlane.f32.xlu1 %v1843_v37 }
0x1556   :  { %v1842_v6 = vmul.f32 %v1840_v17, %v1840_v17 }
0x1558   :  { %v1846_v10 = vsel %vm213_vm1, %v1842_v6, 0.0 }
0x1559   :  { %1847 = vadd.xlane.f32.xlu0 %v1846_v10  ;;  %v3811_v10 = vld [vmem:[%s4917_s20 + $0x8] sm:$0xff] }
0x15de   :  { %v1845_v18 = vpop.xlane.xlu1 %1844 }
0x15df   :  { %v1849_v26 = vmul.f32 0.03125, %v1845_v18  ;;  %v3812_v18 = vld [vmem:[%s4917_s20 + $0x10] sm:$0xff] }
0x15e1   :  { %v1851_v29 = vadd.f32 1e-05, %v1849_v26 }
0x15e2   :  { %v1848_v20 = vpop.xlane.xlu0 %1847 }
0x15e3   :  { %3765 = vrsqrt.f32 %v1851_v29  ;;  %v1850_v30 = vmul.f32 0.03125, %v1848_v20 }
0x15e5   :  { %v1852_v19 = vadd.f32 1e-05, %v1850_v30 }
0x15e7   :  { %3767 = vrsqrt.f32 %v1852_v19 }
0x15f0   :  { %v3766_v22 = vpop.eup %3765 }
0x15f1   :  { %v1855_v33 = vmul.f32 %v3766_v22, %v1839_v15 }
0x15f3   :  { %v1863_v35 = vmul.f32 %v3052_v31, %v1855_v33 }
0x15f4   :  { %v3768_v34 = vpop.eup %3767 }
0x15f5   :  { %v1856_v32 = vmul.f32 %v3768_v34, %v1840_v17  ;;  %v4622_v40 = vadd.f32 %v3053_v36, %v1863_v35  ;;  %v3810_v17 = vld [vmem:[%s4917_s20 + $0x18] sm:$0xff]  ;;  %v3813_v35 = vld [vmem:[%s4917_s20 + $0x20] sm:$0xff] }
0x15f7   :  { %v1864_v39 = vmul.f32 %v3052_v31, %v1856_v32 }
0x15f9   :  { %v4624_v41 = vadd.f32 %v3053_v36, %v1864_v39  ;;  %v3814_v39 = vld [vmem:[%s4917_s20 + $0x28] sm:$0xff] }
0x15fb   :  { %v1878_v50 = vpack.c.bf16 %v4624_v41, %v4622_v40 }
0x15fd   :  { %3423 = vmatmul.mubr.msk.bf16.vlgmr.msra.gmra.mxu0 %vm213_vm1, %v1878_v50 }
0x16bd   :  { %v1936_v42 = vpop.f32.mrf.mxu0 }
0x16be   :  { %v1937_v46 = vadd.f32 %v3059_v43, %v1936_v42 }
0x16bf   :  { %v3424_v38 = vpop.f32.mrf.mxu0 }
0x16c0   :  { %v3815_v38 = vld [vmem:[%s4917_s20 + $0x30] sm:$0xff] }
0x16c1   :  { %v1939_v44 = vpop.f32.mrf.mxu0 }
0x16c2   :  { %v1940_v47 = vadd.f32 %v3059_v43, %v1939_v44 }
0x16c3   :  { %v3425_v48 = vpop.f32.mrf.mxu0 }
0x16c4   :  { %v3601_v52 = vpack.i.bf16 %v1940_v47, %v1937_v46  ;;  %v4632_v53 = vpack.c.bf16 %v1940_v47, %v1937_v46  ;;  %v3816_v46 = vld [vmem:[%s4917_s20 + $0x38] sm:$0xff] }
0x16c6   :  { %3602 = vrot.lane.b32.xlu0 %v3601_v52, %s4025_s5  ;;  %3597 = vrot.lane.b32.xlu1 %v3601_v52, %s4024_s2 }
0x16c7   :  { %3434 = vmatprep.mubr.msk.bf16.mxu0 %vm434_vm2, %v4632_v53 }
0x16ca   :  { %3607 = vrot.lane.b32.xlu1 %v3601_v52, %s4023_s25 }
0x1738   :  { %v3603_v54 = vpop.permute.xlu0 %3602  ;;  %v3598_v55 = vpop.permute.xlu1 %3597 }
0x1739   :  { %v3605_v56 = vunpack.i.h.bf16 %v3603_v54  ;;  %v3604_v57 = vunpack.i.l.bf16 %v3603_v54  ;;  %v3600_v49 = vunpack.i.h.bf16 %v3598_v55  ;;  %v3599_v45 = vunpack.i.l.bf16 %v3598_v55 }
0x173b   :  { %v4639_v23 = vpack.c.bf16 %v3605_v56, %v3604_v57  ;;  %v4641_v27 = vpack.c.bf16 %v3600_v49, %v3599_v45 }
0x173c   :  { %v3608_v58 = vpop.permute.xlu1 %3607 }
0x173d   :  { %v3610_v59 = vunpack.i.h.bf16 %v3608_v58  ;;  %v3609_v25 = vunpack.i.l.bf16 %v3608_v58  ;;  %1975 = vrot.lane.b32.xlu0 %v4639_v23, %s4026_s14  ;;  %1977 = vrot.lane.b32.xlu1 %v4641_v27, %s4026_s14 }
0x173f   :  { %v4647_v28 = vpack.c.bf16 %v3610_v59, %v3609_v25 }
0x1741   :  { %1973 = vrot.lane.b32.xlu1 %v4647_v28, %s4026_s14  ;;  %1971 = vrot.lane.b32.xlu0 %v4632_v53, %s4026_s14 }
0x17af   :  { %v1978_v60 = vpop.permute.xlu1 %1977  ;;  %v1976_v63 = vpop.permute.xlu0 %1975 }
0x17b0   :  { %v2001_v62 = vsel %vm434_vm2, %v1978_v60, 0  ;;  %3508 = vmatprep.subr.msk.bf16.mxu0 %vm434_vm2, %v1978_v60  ;;  %v1998_v2 = vsel %vm434_vm2, %v1976_v63, 0 }
0x17b1   :  { %3427 = vmatpush3.bf16.xpose.msra.mxu0 %v2001_v62 }
0x17b2   :  { %3509 = vmatprep.subr.msk.bf16.mxu0 %vm434_vm2, %v1976_v63 }
0x17b3   :  { %v1974_v3 = vpop.permute.xlu1 %1973  ;;  %v1972_v5 = vpop.permute.xlu0 %1971 }
0x17b4   :  { %v1995_v4 = vsel %vm434_vm2, %v1974_v3, 0  ;;  %v1992_v7 = vsel %vm434_vm2, %v1972_v5, 0 }
0x17b9   :  { %3429 = vmatpush3.bf16.xpose.msra.mxu0 %v1998_v2 }
0x17ba   :  { %3510 = vmatprep.subr.msk.bf16.mxu0 %vm434_vm2, %v1974_v3 }
0x17c1   :  { %3431 = vmatpush3.bf16.xpose.msra.mxu0 %v1995_v4 }
0x17c2   :  { %3511 = vmatprep.subr.msk.bf16.mxu0 %vm434_vm2, %v1972_v5 }
0x17c9   :  { %3433 = vmatpush3.bf16.xpose.msra.mxu0 %v1992_v7 }
0x17ca   :  { %3458 = vmatprep.subr.bf16.mxu0 %v4021_v0 }
0x17d0   :  { %3435 = vmatmul.mubr.msk.bf16.vlgmr.msra.gmra.mxu0 %vm434_vm2, %v4647_v28 }
0x17d1   :  { %3438 = vmatprep.mubr.msk.bf16.mxu0 %vm434_vm2, %v4639_v23 }
0x17d8   :  { %3439 = vmatmul.mubr.msk.bf16.gmra.mxu0 %vm434_vm2, %v4641_v27 }
0x17d9   :  { %3462 = vmatprep.mubr.msk.bf16.mxu0 %vm4022_vm0, %v4021_v0 }
0x1890   :  { %v3436_v8 = vpop.f32.mrf.mxu0 }
0x1891   :  { %v2070_v15 = vmul.f32 0.35355338, %v3436_v8 }
0x1892   :  { %v2037_v9 = vpop.f32.mrf.mxu0 }
0x1893   :  { %v2068_v11 = vmul.f32 0.35355338, %v2037_v9  ;;  %v2078_v26 = vadd.f32 %v3812_v18, %v2070_v15 }
0x1894   :  { %v3437_v12 = vpop.f32.mrf.mxu0 }
0x1895   :  { %v2071_v61 = vmul.f32 0.35355338, %v3437_v12  ;;  %v2076_v14 = vadd.f32 %v3809_v13, %v2068_v11  ;;  %v2090_v33 = vsel %vm540_vm3, %v2078_v26, -inf }
0x1896   :  { %v2040_v1 = vpop.f32.mrf.mxu0 }
0x1897   :  { %v2069_v51 = vmul.f32 0.35355338, %v2040_v1  ;;  %v2084_v16 = vsel %vm540_vm3, %v2076_v14, -inf  ;;  %v2079_v37 = vadd.f32 %v3810_v17, %v2071_v61 }
0x1898   :  { %2085 = vmax.xlane.f32.xlu1 %v2084_v16  ;;  %v3440_v6 = vpop.f32.mrf.mxu0 }
0x1899   :  { %v2077_v21 = vadd.f32 %v3811_v10, %v2069_v51  ;;  %v2093_v20 = vsel %vm540_vm3, %v2079_v37, -inf  ;;  %v2074_v31 = vmul.f32 0.35355338, %v3440_v6 }
0x189a   :  { %v2053_v24 = vpop.f32.mrf.mxu0 }
0x189b   :  { %v2072_v29 = vmul.f32 0.35355338, %v2053_v24  ;;  %v2087_v30 = vsel %vm540_vm3, %v2077_v21, -inf  ;;  %v2082_v44 = vadd.f32 %v3815_v38, %v2074_v31 }
0x189c   :  { %2094 = vmax.xlane.f32.xlu1 %v2093_v20  ;;  %2088 = vmax.xlane.f32.xlu0 %v2087_v30  ;;  %v3441_v19 = vpop.f32.mrf.mxu0 }
0x189d   :  { %v2075_v34 = vmul.f32 0.35355338, %v3441_v19  ;;  %v2080_v36 = vadd.f32 %v3813_v35, %v2072_v29  ;;  %v2102_v48 = vsel %vm540_vm3, %v2082_v44, -inf }
0x189e   :  { %v2056_v22 = vpop.f32.mrf.mxu0 }
0x189f   :  { %v2073_v32 = vmul.f32 0.35355338, %v2056_v22  ;;  %v2096_v42 = vsel %vm540_vm3, %v2080_v36, -inf  ;;  %v2083_v47 = vadd.f32 %v3816_v46, %v2075_v34 }
0x18a0   :  { %2091 = vmax.xlane.f32.xlu0 %v2090_v33 }
0x18a1   :  { %v2081_v50 = vadd.f32 %v3814_v39, %v2073_v32  ;;  %v2105_v52 = vsel %vm540_vm3, %v2083_v47, -inf }
0x18a3   :  { %v2099_v43 = vsel %vm540_vm3, %v2081_v50, -inf }
0x18a4   :  { %2097 = vmax.xlane.f32.xlu0 %v2096_v42  ;;  %2100 = vmax.xlane.f32.xlu1 %v2099_v43 }
0x18a8   :  { %2103 = vmax.xlane.f32.xlu0 %v2102_v48  ;;  %2106 = vmax.xlane.f32.xlu1 %v2105_v52 }
0x18b9   :  { %2180 = vrot.lane.b32.xlu1 %v4639_v23, %s4027_s7 }
0x18be   :  { %2182 = vrot.lane.b32.xlu0 %v4641_v27, %s4027_s7 }
0x1921   :  { %v2086_v54 = vpop.xlane.xlu1 %2085 }
0x1922   :  { %v2108_v45 = vsub.f32 %v2076_v14, %v2086_v54 }
0x1924   :  { %v2116_v62 = vmul.f32 1.442695, %v2108_v45 }
0x1925   :  { %v2095_v55 = vpop.xlane.xlu1 %2094  ;;  %v2089_v56 = vpop.xlane.xlu0 %2088 }
0x1926   :  { %v2111_v57 = vsub.f32 %v2079_v37, %v2095_v55  ;;  %v2109_v49 = vsub.f32 %v2077_v21, %v2089_v56 }
0x1928   :  { %v2122_v58 = vmul.f32 1.442695, %v2111_v57  ;;  %v2118_v59 = vmul.f32 1.442695, %v2109_v49 }
0x1929   :  { %v2092_v25 = vpop.xlane.xlu0 %2091 }
0x192a   :  { %3769 = vpow2.f32 %v2122_v58  ;;  %v2110_v60 = vsub.f32 %v2078_v26, %v2092_v25 }
0x192b   :  { %3771 = vpow2.f32 %v2118_v59 }
0x192c   :  { %v2120_v63 = vmul.f32 1.442695, %v2110_v60 }
0x192d   :  { %v2098_v2 = vpop.xlane.xlu0 %2097  ;;  %v2101_v3 = vpop.xlane.xlu1 %2100 }
0x192e   :  { %3773 = vpow2.f32 %v2120_v63  ;;  %v2112_v23 = vsub.f32 %v2080_v36, %v2098_v2  ;;  %v2113_v27 = vsub.f32 %v2081_v50, %v2101_v3  ;;  %v3660_v63 = vld [vmem:[%s4880_s9 + $0x28] sm:$0xff]  }
0x192f   :  { %3775 = vpow2.f32 %v2116_v62  ;;  %3459 = vmatpush3.bf16.msra.mxu0 %v3660_v63 }
0x1930   :  { %v2124_v9 = vmul.f32 1.442695, %v2112_v23  ;;  %v2126_v61 = vmul.f32 1.442695, %v2113_v27  ;;  %3460 = vmatprep.subr.bf16.mxu0 %v4021_v0 }
0x1931   :  { %v2104_v4 = vpop.xlane.xlu0 %2103  ;;  %v2107_v5 = vpop.xlane.xlu1 %2106 }
0x1932   :  { %v2114_v7 = vsub.f32 %v2082_v44, %v2104_v4  ;;  %v2115_v8 = vsub.f32 %v2083_v47, %v2107_v5  ;;  %v3661_v4 = vld [vmem:[%s4880_s9 + $0x20] sm:$0xff]  }
0x1933   :  { %3461 = vmatpush3.bf16.msra.mxu0 %v3661_v4 }
0x1934   :  { %v2128_v11 = vmul.f32 1.442695, %v2114_v7  ;;  %v2130_v12 = vmul.f32 1.442695, %v2115_v8  ;;  %3474 = vmatprep.subr.bf16.mxu0 %v4021_v0 }
0x1935   :  { %v2183_v13 = vpop.permute.xlu0 %2182  ;;  %v2181_v15 = vpop.permute.xlu1 %2180 }
0x1936   :  { %3777 = vpow2.f32 %v2128_v11  ;;  %3442 = vmatprep.subr.bf16.mxu1 %v2183_v13 }
0x1937   :  { %v3770_v14 = vpop.eup %3769  ;;  %3779 = vpow2.f32 %v2130_v12  ;;  %3443 = vmatpush3.bf16.msra.mxu1 %v2183_v13 }
0x1938   :  { %3781 = vpow2.f32 %v2124_v9  ;;  %3444 = vmatprep.subr.bf16.mxu1 %v2181_v15  ;;  %v2141_v1 = vsel %vm540_vm3, %v3770_v14, 0.0  ;;  %v3772_v51 = vpop.eup %3771 }
0x1939   :  { %3783 = vpow2.f32 %v2126_v61  ;;  %2142 = vadd.xlane.f32.xlu1 %v2141_v1  ;;  %v2135_v37 = vsel %vm540_vm3, %v3772_v51, 0.0 }
0x193b   :  { %v3774_v16 = vpop.eup %3773  ;;  %3445 = vmatpush3.bf16.msra.mxu1 %v2181_v15 }
0x193c   :  { %v2138_v17 = vsel %vm540_vm3, %v3774_v16, 0.0  ;;  %v3776_v6 = vpop.eup %3775 }
0x193d   :  { %2139 = vadd.xlane.f32.xlu0 %v2138_v17  ;;  %2136 = vadd.xlane.f32.xlu1 %v2135_v37  ;;  %v2132_v10 = vsel %vm540_vm3, %v3776_v6, 0.0 }
0x1941   :  { %2133 = vadd.xlane.f32.xlu0 %v2132_v10 }
0x1943   :  { %v3778_v21 = vpop.eup %3777 }
0x1944   :  { %v3780_v24 = vpop.eup %3779  ;;  %v2150_v18 = vsel %vm540_vm3, %v3778_v21, 0.0 }
0x1945   :  { %v3782_v26 = vpop.eup %3781  ;;  %2151 = vadd.xlane.f32.xlu0 %v2150_v18  ;;  %v2153_v29 = vsel %vm540_vm3, %v3780_v24, 0.0 }
0x1946   :  { %v3784_v20 = vpop.eup %3783  ;;  %2154 = vadd.xlane.f32.xlu1 %v2153_v29  ;;  %v2144_v30 = vsel %vm540_vm3, %v3782_v26, 0.0 }
0x1947   :  { %v2147_v19 = vsel %vm540_vm3, %v3784_v20, 0.0 }
0x1949   :  { %2145 = vadd.xlane.f32.xlu0 %v2144_v30  ;;  %v3076_v30 = vld [vmem:[%s4881_s10 + $0x2] ss:$0 sm:$0xff] }
0x194a   :  { %2148 = vadd.xlane.f32.xlu1 %v2147_v19 }
0x195b   :  { %2178 = vrot.lane.b32.xlu1 %v4647_v28, %s4027_s7 }
0x195f   :  { %2176 = vrot.lane.b32.xlu0 %v4632_v53, %s4027_s7 }
0x19c2   :  { %v2143_v22 = vpop.xlane.xlu1 %2142 }
0x19c6   :  { %v2140_v33 = vpop.xlane.xlu0 %2139  ;;  %v2137_v31 = vpop.xlane.xlu1 %2136 }
0x19c7   :  { %3785 = vrcp.f32 %v2137_v31 }
0x19c8   :  { %3787 = vrcp.f32 %v2140_v33 }
0x19ca   :  { %v2134_v34 = vpop.xlane.xlu0 %2133 }
0x19cb   :  { %3789 = vrcp.f32 %v2134_v34 }
0x19cc   :  { %3791 = vrcp.f32 %v2143_v22 }
0x19ce   :  { %v2152_v32 = vpop.xlane.xlu0 %2151 }
0x19cf   :  { %v2155_v35 = vpop.xlane.xlu1 %2154  ;;  %3793 = vrcp.f32 %v2152_v32 }
0x19d0   :  { %3795 = vrcp.f32 %v2155_v35 }
0x19d2   :  { %v2146_v36 = vpop.xlane.xlu0 %2145 }
0x19d3   :  { %3797 = vrcp.f32 %v2146_v36  ;;  %v2149_v39 = vpop.xlane.xlu1 %2148 }
0x19d4   :  { %3799 = vrcp.f32 %v2149_v39  ;;  %v3786_v28 = vpop.eup %3785 }
0x19d5   :  { %v3788_v50 = vpop.eup %3787  ;;  %v2159_v46 = vmul.f32 %v3786_v28, %v3772_v51 }
0x19d6   :  { %v2177_v38 = vpop.permute.xlu0 %2176  ;;  %v2161_v47 = vmul.f32 %v3788_v50, %v3774_v16 }
0x19d7   :  { %v2179_v42 = vpop.permute.xlu1 %2178 }
0x19d8   :  { %v3790_v53 = vpop.eup %3789  ;;  %3446 = vmatprep.subr.bf16.mxu1 %v2179_v42 }
0x19d9   :  { %v3792_v43 = vpop.eup %3791  ;;  %3447 = vmatpush3.bf16.msra.mxu1 %v2179_v42  ;;  %v2157_v44 = vmul.f32 %v3790_v53, %v3776_v6 }
0x19da   :  { %3448 = vmatprep.subr.bf16.mxu1 %v2177_v38  ;;  %v2163_v52 = vmul.f32 %v3792_v43, %v3770_v14 }
0x19db   :  { %v2172_v48 = vpack.c.bf16 %v2159_v46, %v2157_v44 }
0x19dc   :  { %v3794_v54 = vpop.eup %3793  ;;  %v2173_v55 = vpack.c.bf16 %v2163_v52, %v2161_v47  ;;  %v3663_v52 = vld [vmem:[%s4884_s13 + $0x20] sm:$0xff]  }
0x19dd   :  { %3449 = vmatpush3.bf16.msra.mxu1 %v2177_v38  ;;  %3450 = vmatprep.mubr.msk.bf16.mxu1 %vm540_vm3, %v2172_v48  ;;  %v3796_v56 = vpop.eup %3795  ;;  %v2169_v59 = vmul.f32 %v3794_v54, %v3778_v21  ;;  %v3664_v54 = vld [vmem:[%s4886_s15 + $0xb8] sm:$0xff]  }
0x19de   :  { %3466 = vmatprep.subr.bf16.mxu1 %v4021_v0  ;;  %v2171_v25 = vmul.f32 %v3796_v56, %v3780_v24  ;;  %v3666_v56 = vld [vmem:[%s4886_s15 + $0xa8] sm:$0xff]  }
0x19e0   :  { %v3798_v57 = vpop.eup %3797  ;;  %3451 = vmatmul.mubr.msk.bf16.vlgmr.msra.gmra.mxu1 %vm540_vm3, %v2173_v55  ;;  %v2175_v62 = vpack.c.bf16 %v2171_v25, %v2169_v59  ;;  %v3665_v55 = vld [vmem:[%s4886_s15 + $0xb0] sm:$0xff]  }
0x19e1   :  { %v3800_v49 = vpop.eup %3799  ;;  %v2165_v45 = vmul.f32 %v3798_v57, %v3782_v26  ;;  %v3667_v57 = vld [vmem:[%s4886_s15 + $0xa0] sm:$0xff]  }
0x19e2   :  { %v2167_v58 = vmul.f32 %v3800_v49, %v3784_v20  ;;  %v3668_v49 = vld [vmem:[%s4886_s15 + $0x98] sm:$0xff]  }
0x19e4   :  { %v2174_v60 = vpack.c.bf16 %v2167_v58, %v2165_v45 }
0x19e6   :  { %3454 = vmatprep.mubr.msk.bf16.mxu1 %vm540_vm3, %v2174_v60 }
0x19e8   :  { %3455 = vmatmul.mubr.msk.bf16.gmra.mxu1 %vm540_vm3, %v2175_v62 }
0x19e9   :  { %3470 = vmatprep.mubr.msk.bf16.mxu1 %vm4022_vm0, %v4021_v0 }
0x1aa0   :  { %v3452_v2 = vpop.f32.mrf.mxu1 }
0x1aa2   :  { %v2234_v3 = vpop.f32.mrf.mxu1 }
0x1aa4   :  { %v3453_v23 = vpop.f32.mrf.mxu1 }
0x1aa5   :  { %v3611_v27 = vpack.i.bf16 %v3453_v23, %v3452_v2 }
0x1aa6   :  { %v2237_v5 = vpop.f32.mrf.mxu1 }
0x1aa7   :  { %3612 = vrot.lane.b32.xlu1 %v3611_v27, %s4028_s27 }
0x1aa8   :  { %v3456_v7 = vpop.f32.mrf.mxu1 }
0x1aaa   :  { %v2250_v8 = vpop.f32.mrf.mxu1 }
0x1aac   :  { %v3457_v9 = vpop.f32.mrf.mxu1 }
0x1aad   :  { %v3621_v11 = vpack.i.bf16 %v3457_v9, %v3456_v7 }
0x1aae   :  { %v2253_v12 = vpop.f32.mrf.mxu1 }
0x1aaf   :  { %v3616_v61 = vpack.i.bf16 %v2253_v12, %v2250_v8  ;;  %3622 = vrot.lane.b32.xlu1 %v3621_v11, %s4029_s26  ;;  %v3669_v12 = vld [vmem:[%s4886_s15 + $0x90] sm:$0xff]  }
0x1ab1   :  { %3617 = vrot.lane.b32.xlu0 %v3616_v61, %s4013_s29  ;;  %v3670_v61 = vld [vmem:[%s4886_s15 + $0x88] sm:$0xff]  }
0x1b19   :  { %v3613_v13 = vpop.permute.xlu1 %3612 }
0x1b1a   :  { %v3615_v14 = vunpack.i.h.bf16 %v3613_v13  ;;  %v3614_v15 = vunpack.i.l.bf16 %v3613_v13  ;;  %v3671_v13 = vld [vmem:[%s4886_s15 + $0x80] sm:$0xff]  }
0x1b1c   :  { %v2289_v37 = vsel %vm434_vm2, %v2234_v3, %v3614_v15  ;;  %v2290_v6 = vsel %vm434_vm2, %v2237_v5, %v3615_v14  ;;  %v3082_v3 = vld [vmem:[%s4882_s11 + $0x2] ss:$0 sm:$0xff]  ;;  %v3088_v14 = vld [vmem:[#allocation10 + $0x2] ss:$0 sm:$0xff] }
0x1b1d   :  { %v3083_v5 = vld [vmem:[%s4883_s12 + $0x2] ss:$0 sm:$0xff] }
0x1b21   :  { %v3623_v1 = vpop.permute.xlu1 %3622 }
0x1b22   :  { %v3625_v10 = vunpack.i.h.bf16 %v3623_v1  ;;  %v3624_v21 = vunpack.i.l.bf16 %v3623_v1 }
0x1b23   :  { %v3618_v51 = vpop.permute.xlu0 %3617 }
0x1b24   :  { %v3620_v16 = vunpack.i.h.bf16 %v3618_v51  ;;  %v3619_v17 = vunpack.i.l.bf16 %v3618_v51 }
0x1b26   :  { %v2292_v24 = vsel %vm748_vm4, %v2290_v6, %v3620_v16  ;;  %v2291_v18 = vsel %vm748_vm4, %v2289_v37, %v3619_v17 }
0x1b27   :  { %v2294_v26 = vsel %vm751_vm5, %v2292_v24, %v3625_v10  ;;  %v2293_v29 = vsel %vm751_vm5, %v2291_v18, %v3624_v21  ;;  %v3108_v24 = vld [vmem:[#allocation11 + $0x2] ss:$0 sm:$0xff] }
0x1b28   :  { %v2300_v20 = vpack.c.bf16 %v2294_v26, %v2293_v29 }
0x1b2a   :  { %3463 = vmatmul.mubr.msk.bf16.vlgmr.msra.gmra.mxu0 %vm213_vm1, %v2300_v20 }
0x1b2b   :  { %3490 = vmatprep.mubr.msk.bf16.mxu0 %vm4022_vm0, %v4021_v0  ;;  %3475 = vmatpush3.bf16.msra.mxu0 %v3664_v54 }
0x1b2c   :  { %3476 = vmatprep.subr.bf16.mxu0 %v4021_v0 }
0x1b2f   :  { %3477 = vmatpush3.bf16.msra.mxu0 %v3665_v55  ;;  %v3120_v55 = vld [vmem:[%s4889_s18 + $0x2] ss:$0 sm:$0xff] }
0x1b30   :  { %3478 = vmatprep.subr.bf16.mxu0 %v4021_v0 }
0x1b33   :  { %3479 = vmatpush3.bf16.msra.mxu0 %v3666_v56 }
0x1b34   :  { %3480 = vmatprep.subr.bf16.mxu0 %v4021_v0 }
0x1b37   :  { %3481 = vmatpush3.bf16.msra.mxu0 %v3667_v57 }
0x1b38   :  { %3482 = vmatprep.subr.bf16.mxu0 %v4021_v0 }
0x1b3b   :  { %3483 = vmatpush3.bf16.msra.mxu0 %v3668_v49 }
0x1b3c   :  { %3484 = vmatprep.subr.bf16.mxu0 %v4021_v0 }
0x1b3f   :  { %3485 = vmatpush3.bf16.msra.mxu0 %v3669_v12 }
0x1b40   :  { %3486 = vmatprep.subr.bf16.mxu0 %v4021_v0 }
0x1b43   :  { %3487 = vmatpush3.bf16.msra.mxu0 %v3670_v61  ;;  %v3680_v61 = vld [vmem:[%s4892_s21 + $0x28] sm:$0xff]  }
0x1b44   :  { %3488 = vmatprep.subr.bf16.mxu0 %v4021_v0 }
0x1b47   :  { %3489 = vmatpush3.bf16.msra.mxu0 %v3671_v13  ;;  %v3681_v13 = vld [vmem:[%s4892_s21 + $0x20] sm:$0xff]  }
0x1bea   :  { %v2358_v19 = vpop.f32.mrf.mxu0 }
0x1beb   :  { %v2359_v22 = vadd.f32 %v3076_v30, %v2358_v19 }
0x1bec   :  { %v3464_v33 = vpop.f32.mrf.mxu0 }
0x1bed   :  { %v2365_v31 = vadd.f32 %v2359_v22, %v4622_v40 }
0x1bee   :  { %v2361_v34 = vpop.f32.mrf.mxu0 }
0x1bef   :  { %v2362_v32 = vadd.f32 %v3076_v30, %v2361_v34  ;;  %v2371_v35 = vsel %vm213_vm1, %v2365_v31, 0.0 }
0x1bf0   :  { %2372 = vadd.xlane.f32.xlu0 %v2371_v35  ;;  %v3465_v36 = vpop.f32.mrf.mxu0 }
0x1bf1   :  { %v2366_v39 = vadd.f32 %v2362_v32, %v4624_v41  ;;  %v3662_v41 = vld [vmem:[%s4884_s13 + $0x28] sm:$0xff]  }
0x1bf2   :  { %3467 = vmatpush3.bf16.msra.mxu1 %v3662_v41 }
0x1bf3   :  { %v2374_v28 = vsel %vm213_vm1, %v2366_v39, 0.0  ;;  %3468 = vmatprep.subr.bf16.mxu1 %v4021_v0 }
0x1bf4   :  { %2375 = vadd.xlane.f32.xlu1 %v2374_v28 }
0x1bf6   :  { %3469 = vmatpush3.bf16.msra.mxu1 %v3663_v52  ;;  %v3119_v52 = vld [vmem:[%s4888_s17 + $0x2] ss:$0 sm:$0xff] }
0x1bf7   :  { %3494 = vmatprep.subr.bf16.mxu1 %v4021_v0 }
0x1c79   :  { %v2373_v50 = vpop.xlane.xlu0 %2372 }
0x1c7a   :  { %v2377_v42 = vmul.f32 0.03125, %v2373_v50 }
0x1c7c   :  { %v2379_v53 = vsub.f32 %v2365_v31, %v2377_v42 }
0x1c7d   :  { %v2376_v43 = vpop.xlane.xlu1 %2375 }
0x1c7e   :  { %v2378_v38 = vmul.f32 0.03125, %v2376_v43  ;;  %v2381_v44 = vmul.f32 %v2379_v53, %v2379_v53 }
0x1c80   :  { %v2380_v46 = vsub.f32 %v2366_v39, %v2378_v38  ;;  %v2383_v40 = vsel %vm213_vm1, %v2381_v44, 0.0 }
0x1c81   :  { %2384 = vadd.xlane.f32.xlu0 %v2383_v40 }
0x1c82   :  { %v2382_v47 = vmul.f32 %v2380_v46, %v2380_v46 }
0x1c84   :  { %v2386_v48 = vsel %vm213_vm1, %v2382_v47, 0.0 }
0x1c85   :  { %2387 = vadd.xlane.f32.xlu0 %v2386_v48 }
0x1d0a   :  { %v2385_v45 = vpop.xlane.xlu0 %2384 }
0x1d0b   :  { %v2389_v58 = vmul.f32 0.03125, %v2385_v45 }
0x1d0d   :  { %v2391_v59 = vadd.f32 1e-05, %v2389_v58 }
0x1d0e   :  { %v2388_v25 = vpop.xlane.xlu0 %2387 }
0x1d0f   :  { %3801 = vrsqrt.f32 %v2391_v59  ;;  %v2390_v60 = vmul.f32 0.03125, %v2388_v25  ;;  %v2650_v25 = vld [vmem:[%s4918_s28] sm:$0x3] }
0x1d11   :  { %v2392_v62 = vadd.f32 1e-05, %v2390_v60  ;;  %v3674_v60 = vld [vmem:[%s4890_s19 + $0x14] ss:$8 sps:$4 sm:$0xff]  }
0x1d13   :  { %3803 = vrsqrt.f32 %v2392_v62 }
0x1d1c   :  { %v3802_v63 = vpop.eup %3801 }
0x1d1d   :  { %v2395_v2 = vmul.f32 %v3802_v63, %v2379_v53  ;;  %v2651_v63 = vpack.c.bf16 %v2650_v25, %v2650_v25 }
0x1d1f   :  { %v2403_v27 = vmul.f32 %v3082_v3, %v2395_v2  ;;  %v3672_v2 = vld [vmem:[%s4890_s19 + $0x10] ss:$8 sps:$4 sm:$0xff]  }
0x1d20   :  { %v3804_v23 = vpop.eup %3803 }
0x1d21   :  { %v2396_v4 = vmul.f32 %v3804_v23, %v2380_v46  ;;  %v2411_v8 = vadd.f32 %v3083_v5, %v2403_v27  ;;  %v3675_v23 = vld [vmem:[%s4890_s19] ss:$8 sps:$4 sm:$0xff]   ;;  %v4030_v27 = vmov 0  }
0x1d23   :  { %v2404_v7 = vmul.f32 %v3082_v3, %v2396_v4  ;;  %v3677_v3 = vld [vmem:[%s4890_s19 + $0x4] ss:$8 sps:$4 sm:$0xff]  }
0x1d25   :  { %v2412_v9 = vadd.f32 %v3083_v5, %v2404_v7  ;;  %v3678_v5 = vld [vmem:[%s4892_s21 + $0x38] sm:$0xff]  }
0x1d27   :  { %v2418_v11 = vpack.c.bf16 %v2412_v9, %v2411_v8 }
0x1d29   :  { %3471 = vmatmul.mubr.msk.bf16.vlgmr.msra.gmra.mxu1 %vm213_vm1, %v2418_v11  ;;  %v3679_v11 = vld [vmem:[%s4892_s21 + $0x30] sm:$0xff]  }
0x1d2a   :  { %3496 = vmatprep.mubr.msk.bf16.mxu1 %vm4022_vm0, %v4021_v0 }
0x1de9   :  { %v2476_v15 = vpop.f32.mrf.mxu1 }
0x1dea   :  { %v2477_v51 = vadd.f32 %v3088_v14, %v2476_v15  ;;  %v3683_v15 = vld [vmem:[%s4892_s21 + $0x10] sm:$0xff]  }
0x1deb   :  { %v3472_v1 = vpop.f32.mrf.mxu1 }
0x1dec   :  { %v2483_v6 = vmax.f32 %v2477_v51, 0.0  ;;  %v3684_v1 = vld [vmem:[%s4892_s21 + $0x8] sm:$0xff]   ;;  %v3685_v51 = vld [vmem:[%s4892_s21] sm:$0xff]  }
0x1ded   :  { %v2479_v16 = vpop.f32.mrf.mxu1 }
0x1dee   :  { %v2480_v17 = vadd.f32 %v3088_v14, %v2479_v16  ;;  %v3682_v14 = vld [vmem:[%s4892_s21 + $0x18] sm:$0xff]   ;;  %v3686_v16 = vld [vmem:[%s4892_s21 + $0x50] sm:$0xff]  }
0x1def   :  { %v3473_v37 = vpop.f32.mrf.mxu1 }
0x1df0   :  { %v2484_v10 = vmax.f32 %v2480_v17, 0.0  ;;  %v3687_v17 = vld [vmem:[%s4892_s21 + $0x48] sm:$0xff]   ;;  %v3688_v37 = vld [vmem:[%s4892_s21 + $0x40] sm:$0xff]   ;;  %s4031_s21 = smov [#allocation16]  }
0x1df1   :  { %s2926_s17 = sshll.u32 %s4031_s21, 4  ;;  %s2927_s17 = int_to_ptr.vmem [resolvable:$true] %s2926_s17 }
0x1df2   :  { %v2502_v21 = vpack.c.bf16 %v2484_v10, %v2483_v6  ;;  %v2703_v6 = vlaneseq  ;;  %s3977_s18 = scalar_lea.vmem %s2927_s17, 256  ;;  %p3982_p13 = scmp.lt.s32.totalorder %s2927_s17, %s2927_s17 }
0x1df3   :  { %p3978_p12 = scmp.ne.s32.totalorder %s2927_s17, %s3977_s18  ;;  %p3983_p0 = scmp.lt.s32.totalorder %s3977_s18, %s3977_s18 }
0x1df4   :  { %3491 = vmatmul.mubr.bf16.vlgmr.msra.gmra.mxu0 %v2502_v21  ;;  %v2704_v10 = vshrl.u32 %v2703_v6, 7 }
0x1df5   :  { %p3984_p1 = por %p3983_p0, %p3982_p13 }
0x1df6   :  { %v2705_v21 = vsub.s32 0, %v2704_v10 }
0x1df7   :  { %p3985_p2 = pnand %p3984_p1, %p3978_p12 }
0x1eb4   :  { %v2593_v18 = vpop.f32.mrf.mxu0 }
0x1eb5   :  { %v2594_v26 = vadd.f32 %v3108_v24, %v2593_v18  ;;  %v2709_v18 = vsub.s32 1, %v2704_v10 }
0x1eb6   :  { %v3492_v0 = vpop.f32.mrf.mxu0 }
0x1eb7   :  { %v2600_v29 = vadd.f32 %v2594_v26, %v2411_v8 }
0x1eb8   :  { %v2596_v20 = vpop.f32.mrf.mxu0 }
0x1eb9   :  { %v2597_v30 = vadd.f32 %v3108_v24, %v2596_v20  ;;  %v2606_v19 = vsel %vm213_vm1, %v2600_v29, 0.0  ;;  %v2701_v24 = vld [vmem:[#allocation13] sm:$0x3] }
0x1eba   :  { %2607 = vadd.xlane.f32.xlu1 %v2606_v19  ;;  %v3493_v22 = vpop.f32.mrf.mxu0  ;;  %v2706_v26 = vrot.slane %v2701_v24, %v2705_v21  ;;  %v2710_v0 = vrot.slane %v2701_v24, %v2709_v18 }
0x1ebb   :  { %v2601_v33 = vadd.f32 %v2597_v30, %v2412_v9 }
0x1ebd   :  { %v2609_v31 = vsel %vm213_vm1, %v2601_v33, 0.0 }
0x1ebe   :  { %2610 = vadd.xlane.f32.xlu0 %v2609_v31 }
0x1f43   :  { %v2608_v34 = vpop.xlane.xlu1 %2607 }
0x1f44   :  { %v2612_v32 = vmul.f32 0.03125, %v2608_v34 }
0x1f46   :  { %v2614_v35 = vsub.f32 %v2600_v29, %v2612_v32 }
0x1f47   :  { %v2611_v36 = vpop.xlane.xlu0 %2610 }
0x1f48   :  { %v2613_v39 = vmul.f32 0.03125, %v2611_v36  ;;  %v2616_v28 = vmul.f32 %v2614_v35, %v2614_v35 }
0x1f4a   :  { %v2615_v50 = vsub.f32 %v2601_v33, %v2613_v39  ;;  %v2618_v42 = vsel %vm213_vm1, %v2616_v28, 0.0 }
0x1f4b   :  { %2619 = vadd.xlane.f32.xlu1 %v2618_v42 }
0x1f4c   :  { %v2617_v53 = vmul.f32 %v2615_v50, %v2615_v50 }
0x1f4e   :  { %v2621_v43 = vsel %vm213_vm1, %v2617_v53, 0.0 }
0x1f4f   :  { %2622 = vadd.xlane.f32.xlu0 %v2621_v43 }
0x1fd4   :  { %v2620_v38 = vpop.xlane.xlu1 %2619 }
0x1fd5   :  { %v2624_v44 = vmul.f32 0.03125, %v2620_v38 }
0x1fd7   :  { %v2626_v46 = vadd.f32 1e-05, %v2624_v44 }
0x1fd8   :  { %v2623_v40 = vpop.xlane.xlu0 %2622 }
0x1fd9   :  { %3805 = vrsqrt.f32 %v2626_v46  ;;  %v2625_v47 = vmul.f32 0.03125, %v2623_v40 }
0x1fdb   :  { %v2627_v48 = vadd.f32 1e-05, %v2625_v47 }
0x1fdd   :  { %3807 = vrsqrt.f32 %v2627_v48 }
0x1fe6   :  { %v3806_v41 = vpop.eup %3805 }
0x1fe7   :  { %v2630_v54 = vmul.f32 %v3806_v41, %v2614_v35 }
0x1fe9   :  { %v2638_v56 = vmul.f32 %v3119_v52, %v2630_v54 }
0x1fea   :  { %v3808_v57 = vpop.eup %3807 }
0x1feb   :  { %v2631_v49 = vmul.f32 %v3808_v57, %v2615_v50  ;;  %v2646_v45 = vadd.f32 %v3120_v55, %v2638_v56 }
0x1fed   :  { %v2639_v58 = vmul.f32 %v3119_v52, %v2631_v49  ;;  %2648 = vst.msk [vmem:[#allocation16] sm:$0xff] %vm213_vm1, %v2646_v45 }
0x1fef   :  { %v2647_v59 = vadd.f32 %v3120_v55, %v2639_v58 }
0x1ff1   :  { %v2652_v62 = vpack.c.bf16 %v2647_v59, %v2646_v45  ;;  %2649 = vst.msk [vmem:[#allocation16 + $0x8] sm:$0xff] %vm213_vm1, %v2647_v59 }
0x1ff3   :  { %3495 = vmatpush3.bf16.msra.mxu1 %v2652_v62 }
0x1ff4   :  { %2748 = vmatprep.subr.bf16.mxu1 %v3674_v60 }
0x1ff6   :  { %3497 = vmatmul.mubr.msk.bf16.vlgmr.msra.gmra.mxu1 %vm748_vm4, %v2651_v63 }
0x1ff7   :  { %2749 = vmatpush1.bf16.msra.mxu1 %v3672_v2  ;;  %2768 = vmatprep.mubr.bf16.mxu1 %v4030_v27 }
0x1ff8   :  { %2750 = vmatprep.subr.bf16.mxu1 %v3677_v3 }
0x1ffb   :  { %2751 = vmatpush1.bf16.msra.mxu1 %v3675_v23 }
0x1ffc   :  { %2880 = vmatprep.subr.bf16.mxu1 %v4030_v27 }
0x20b6   :  { %v2690_v4 = vpop.f32.mrf.mxu1 }
0x20b7   :  { %v2700_v7 = vpack.c.bf16 %v2690_v4, %v2690_v4 }
0x20b8   :  { %v3498_v8 = vpop.f32.mrf.mxu1 }
0x20b9   :  { %3126 = vmatmul.mubr.msk.bf16.vlgmr.msra.gmra.mxu1 %vm213_vm1, %v2700_v7 }
0x20ba   :  { %v2693_v9 = vpop.f32.mrf.mxu1  ;;  %2881 = vmatpush1.bf16.msra.mxu1 %v3678_v5 }
0x20bb   :  { %2882 = vmatprep.subr.bf16.mxu1 %v4030_v27 }
0x20bc   :  { %v3499_v12 = vpop.f32.mrf.mxu1 }
0x20be   :  { %2883 = vmatpush1.bf16.msra.mxu1 %v3679_v11 }
0x20bf   :  { %2884 = vmatprep.subr.bf16.mxu1 %v4030_v27 }
0x20c2   :  { %2885 = vmatpush1.bf16.msra.mxu1 %v3680_v61 }
0x20c3   :  { %2886 = vmatprep.subr.bf16.mxu1 %v4030_v27 }
0x20c6   :  { %2887 = vmatpush1.bf16.msra.mxu1 %v3681_v13 }
0x20c7   :  { %2888 = vmatprep.subr.bf16.mxu1 %v4030_v27 }
0x20ca   :  { %2889 = vmatpush1.bf16.msra.mxu1 %v3682_v14 }
0x20cb   :  { %2890 = vmatprep.subr.bf16.mxu1 %v4030_v27 }
0x20ce   :  { %2891 = vmatpush1.bf16.msra.mxu1 %v3683_v15 }
0x20cf   :  { %2892 = vmatprep.subr.bf16.mxu1 %v4030_v27 }
0x20d2   :  { %2893 = vmatpush1.bf16.msra.mxu1 %v3684_v1 }
0x20d3   :  { %2894 = vmatprep.subr.bf16.mxu1 %v4030_v27 }
0x20d6   :  { %2895 = vmatpush1.bf16.msra.mxu1 %v3685_v51 }
0x20d7   :  { %2906 = vmatprep.subr.bf16.mxu1 %v4030_v27 }
0x20da   :  { %2907 = vmatpush2.bf16.msra.mxu1 %v3686_v16 }
0x20db   :  { %2908 = vmatprep.subr.bf16.mxu1 %v4030_v27 }
0x20de   :  { %2909 = vmatpush2.bf16.msra.mxu1 %v3687_v17 }
0x20df   :  { %2910 = vmatprep.subr.bf16.mxu1 %v4030_v27 }
0x20e2   :  { %2911 = vmatpush2.bf16.msra.mxu1 %v3688_v37 }
0x2179   :  { %v2770_v29 = vpop.f32.mrf.mxu1 }
0x217a   :  { %v2771_v20 = vadd.f32 %v2770_v29, %v2706_v26 }
0x217b   :  { %v2772_v30 = vpop.f32.mrf.mxu1 }
0x217c   :  { %v2773_v19 = vadd.f32 %v2772_v30, %v2710_v0  ;;  %v2777_v22 = vmax.f32 %v2771_v20, 0.0 }
0x217d   :  { %v2774_v33 = vpop.f32.mrf.mxu1 }
0x217e   :  { %v2778_v31 = vmax.f32 %v2773_v19, 0.0  ;;  %v2801_v35 = vpack.c.bf16 %v2777_v22, %v2777_v22 }
0x217f   :  { %v2775_v34 = vpop.f32.mrf.mxu1 }
0x2180   :  { %v2802_v32 = vpack.c.bf16 %v2778_v31, %v2778_v31 }
0x2182   :  { %3139 = vmatprep.mubr.msk.bf16.mxu1 %vm2876_vm6, %v2802_v32 }
0x2183   :  { %2913 = vmatmul.mubr.bf16.vlgmr.msra.gmra.mxu1 %v2801_v35 }
0x2184   :  { %3988 = shalt.err (!%p3985_p2)
}
0x2185   :  { %s4032_s8 = smov 128   ;;  %v3127_v36 = vld [vmem:[#allocation14] ss:$0 sm:$0xff]  ;;  %s4919_s24 = sld [smem:[#allocation32_spill]] }
0x2186   :  { %2932 = dma.vmem_to_hbm [thread:$0]  %s2927_s17, 256, %s4894_s23, [#allocation4], %s4032_s8, %s4032_s8, %s4028_s27  }
0x2243   :  { %v2914_v39 = vpop.f32.mrf.mxu1 }
0x2244   :  { %v2915_v28 = vadd.f32 %v3127_v36, %v2914_v39 }
0x2245   :  { %v2916_v50 = vpop.f32.mrf.mxu1 }
0x2246   :  { %2920 = vst [vmem:[%s4919_s24] sm:$0x3] %v2915_v28 }
0x2247   :  { %v2917_v42 = vpop.f32.mrf.mxu1 }
0x2249   :  { %v2918_v53 = vpop.f32.mrf.mxu1 }
0x224a   :  { %4007 = dma.done.wait [#allocation4], 256  }
0x224b   :  { %4008 = vsyncadd [#allocation4], 4294967040 }
0x224c   :  { %2940 = vsyncpa [#allocation3], 1 }
0x224d   :  { %2941 = vsyncpa [#allocation6], 1 }
0x224e   :  { %2942 = vsyncpa [#allocation9], 1 }
0x224f   :  { %2943 = vsyncpa [#allocation12], 1 }
0x2250   :  { %2944 = vsyncpa [#allocation15], 1 }
0x2251   :  { %2945 = vsyncpa [#allocation4], 1 }

</bundles_post_ra>
